<compile_context>
chip_gen: v7x
topology: tpu7x:2x2x1
jax: 0.10.0
libtpu: 0.0.40
codegen_flags: <defaults>
</compile_context>

<pallas_src>
import jax
import jax.numpy as jnp
from jax.experimental import pallas as pl
from jax.experimental.pallas import tpu as pltpu


def _net_kernel(x_ref,
                w1x_ref, b1e_ref,
                w2_ref, b2_ref,
                w3_ref, b3_ref,
                w4_ref, b4_ref,
                w5y_ref, w5x_ref, b5_ref,
                w6_ref, b6_ref,
                w7_ref, b7_ref,
                w8r_ref, b8_ref,
                out_ref):
    x = x_ref[...]                        # [tm, 3] f32 (per-batch tile)
    xb = x.astype(jnp.bfloat16)

    def mm(a_f32, w_ref):
        # bf16 MXU matmul with f32 accumulation.
        return jnp.dot(a_f32.astype(jnp.bfloat16), w_ref[...],
                       preferred_element_type=jnp.float32)

    def mmx(a_bf16, w_ref):
        return jnp.dot(a_bf16, w_ref[...], preferred_element_type=jnp.float32)

    # layer1 on cat([x, z]):  x @ W1[:3]  +  (z @ W1[3:] + b1)   (folded bias)
    h = jnp.maximum(mmx(xb, w1x_ref) + b1e_ref[...], 0.0)
    # layers 2, 3
    h = jnp.maximum(mm(h, w2_ref) + b2_ref[...], 0.0)
    h = jnp.maximum(mm(h, w3_ref) + b3_ref[...], 0.0)
    # layer 4 (512 -> 509, zero-padded to 512; padded lanes stay exactly 0)
    h = jnp.maximum(mm(h, w4_ref) + b4_ref[...], 0.0)
    # layer5 on cat([h4, x]):  h4 @ W5[:509] (padded to 512) + x @ W5[509:]
    h = jnp.maximum(mm(h, w5y_ref) + mmx(xb, w5x_ref) + b5_ref[...], 0.0)
    # layers 6, 7
    h = jnp.maximum(mm(h, w6_ref) + b6_ref[...], 0.0)
    h = jnp.maximum(mm(h, w7_ref) + b7_ref[...], 0.0)
    # layer8 (512 -> 1): VPU multiply + lane reduction instead of a width-1 matmul.
    hb = h.astype(jnp.bfloat16).astype(jnp.float32)
    out_ref[...] = (jnp.sum(hb * w8r_ref[...], axis=-1, keepdims=True)
                    + b8_ref[...])


def init_params(key):
    """Deterministic init mimicking nn.Linear default (U[-1/sqrt(in), 1/sqrt(in)]).

    Weights stored as [in_features, out_features] (transposed for x @ W);
    biases as [1, out_features].  Master copies are float32.
    """
    layer_dims = [
        (3 + 2048, 512),   # layer1
        (512, 512),        # layer2
        (512, 512),        # layer3
        (512, 509),        # layer4
        (512, 512),        # layer5 (input is cat([y(509), x(3)]))
        (512, 512),        # layer6
        (512, 512),        # layer7
        (512, 1),          # layer8
    ]
    params = {}
    for idx, (fan_in, fan_out) in enumerate(layer_dims, start=1):
        key, kw, kb = jax.random.split(key, 3)
        bound = 1.0 / jnp.sqrt(float(fan_in))
        params[f"w{idx}"] = jax.random.uniform(
            kw, (fan_in, fan_out), jnp.float32, minval=-bound, maxval=bound)
        params[f"b{idx}"] = jax.random.uniform(
            kb, (1, fan_out), jnp.float32, minval=-bound, maxval=bound)
    return params


def _round_up(v, m):
    return ((v + m - 1) // m) * m


@jax.jit
def net_forward(x, latent_vector, params):
    # Glue: reproduce `if x.shape[0] == 1: x = x.view(-1, x.shape[-1])`
    if x.shape[0] == 1:
        x = x.reshape(-1, x.shape[-1])
    if latent_vector.ndim == 1:
        latent_vector = latent_vector.reshape(1, -1)

    x = x.astype(jnp.float32)
    latent_vector = latent_vector.astype(jnp.float32)
    n = x.shape[0]
    bf16 = jnp.bfloat16

    # Fold z @ W1[3:] + b1 into an effective layer-1 bias (z is a row broadcast
    # of the latent vector), so the 2048-wide weight slab never enters the kernel.
    w1 = params["w1"]
    b1_eff = (jnp.dot(latent_vector.astype(bf16), w1[3:].astype(bf16),
                      preferred_element_type=jnp.float32) + params["b1"])
    w1x = w1[:3].astype(bf16)                                   # [3, 512]

    # Remove the ragged 509 contraction: zero-pad to 512 (numerically identical).
    w4p = jnp.pad(params["w4"], ((0, 0), (0, 3))).astype(bf16)  # [512, 512]
    b4p = jnp.pad(params["b4"], ((0, 0), (0, 3)))               # [1, 512]
    w5y = jnp.pad(params["w5"][:509], ((0, 3), (0, 0))).astype(bf16)  # [512, 512]
    w5x = params["w5"][509:].astype(bf16)                       # [3, 512]

    w8r = params["w8"].T.astype(jnp.float32)                    # [1, 512]

    args = (
        x,
        w1x, b1_eff,
        params["w2"].astype(bf16), params["b2"],
        params["w3"].astype(bf16), params["b3"],
        w4p, b4p,
        w5y, w5x, params["b5"],
        params["w6"].astype(bf16), params["b6"],
        params["w7"].astype(bf16), params["b7"],
        w8r, params["b8"],
    )

    # Tile the batch dimension; weights stay VMEM-resident (single-buffered).
    tm = min(512, _round_up(n, 8))
    grid = (pl.cdiv(n, tm),)

    resident = pl.BlockSpec(memory_space=pltpu.MemorySpace.VMEM)
    in_specs = ([pl.BlockSpec((tm, 3), lambda i: (i, 0))]
                + [resident] * (len(args) - 1))

    return pl.pallas_call(
        _net_kernel,
        out_shape=jax.ShapeDtypeStruct((n, 1), jnp.float32),
        grid=grid,
        in_specs=in_specs,
        out_specs=pl.BlockSpec((tm, 1), lambda i: (i, 0)),
        compiler_params=pltpu.CompilerParams(
            dimension_semantics=("parallel",),
            vmem_limit_bytes=32 * 1024 * 1024),
    )(*args)


def _reference_forward(x, latent_vector, params):
    """Pure-JAX reference mirroring the PyTorch forward (bf16 weights/activations,
    f32 accumulation — same numerics as the kernel)."""
    if x.shape[0] == 1:
        x = x.reshape(-1, x.shape[-1])
    if latent_vector.ndim == 1:
        latent_vector = latent_vector.reshape(1, -1)

    def lin(a, w, b):
        return jnp.dot(a.astype(jnp.bfloat16), w.astype(jnp.bfloat16),
                       preferred_element_type=jnp.float32) + b

    z = jnp.tile(latent_vector, (x.shape[0], 1))
    z_x = jnp.concatenate([x, z], axis=1)
    y = jax.nn.relu(lin(z_x, params["w1"], params["b1"]))
    y = jax.nn.relu(lin(y, params["w2"], params["b2"]))
    y = jax.nn.relu(lin(y, params["w3"], params["b3"]))
    y = jax.nn.relu(lin(y, params["w4"], params["b4"]))
    y = jax.nn.relu(lin(jnp.concatenate([y, x], axis=1), params["w5"], params["b5"]))
    y = jax.nn.relu(lin(y, params["w6"], params["b6"]))
    y = jax.nn.relu(lin(y, params["w7"], params["b7"]))
    return lin(y, params["w8"], params["b8"])


if __name__ == "__main__":
    key = jax.random.PRNGKey(0)
    k_params, k_x, k_z = jax.random.split(key, 3)

    params = init_params(k_params)

    N = 8
    x = jax.random.normal(k_x, (N, 3), jnp.float32)
    latent_vector = jax.random.normal(k_z, (1, 2048), jnp.float32)

    out = jax.block_until_ready(net_forward(x, latent_vector, params))

    ref = _reference_forward(x, latent_vector, params)
    assert out.shape == (N, 1), out.shape
    assert jnp.allclose(out, ref, atol=2e-2, rtol=2e-2), (out, ref)

    print("KERNEL_OK")
</pallas_src>

<mosaic_0001>
module attributes {stable_mosaic.version = 11 : i64} {
  func.func @_net_kernel(%arg0: i32, %arg1: memref<8x3xf32, #tpu.memory_space<vmem>>, %arg2: memref<3x512xbf16, #tpu.memory_space<vmem>>, %arg3: memref<1x512xf32, #tpu.memory_space<vmem>>, %arg4: memref<512x512xbf16, #tpu.memory_space<vmem>>, %arg5: memref<1x512xf32, #tpu.memory_space<vmem>>, %arg6: memref<512x512xbf16, #tpu.memory_space<vmem>>, %arg7: memref<1x512xf32, #tpu.memory_space<vmem>>, %arg8: memref<512x512xbf16, #tpu.memory_space<vmem>>, %arg9: memref<1x512xf32, #tpu.memory_space<vmem>>, %arg10: memref<512x512xbf16, #tpu.memory_space<vmem>>, %arg11: memref<3x512xbf16, #tpu.memory_space<vmem>>, %arg12: memref<1x512xf32, #tpu.memory_space<vmem>>, %arg13: memref<512x512xbf16, #tpu.memory_space<vmem>>, %arg14: memref<1x512xf32, #tpu.memory_space<vmem>>, %arg15: memref<512x512xbf16, #tpu.memory_space<vmem>>, %arg16: memref<1x512xf32, #tpu.memory_space<vmem>>, %arg17: memref<1x512xf32, #tpu.memory_space<vmem>>, %arg18: memref<1x1xf32, #tpu.memory_space<vmem>>, %arg19: memref<8x1xf32, #tpu.memory_space<vmem>>) attributes {dimension_semantics = [#tpu.dimension_semantics<parallel>], iteration_bounds = array<i64: 1>, scalar_prefetch = 0 : i64, scratch_operands = 0 : i64, tpu.core_type = #tpu.core_type<tc>, window_params = [{transform_indices = @transform_0, window_bounds = array<i64: 8, 3>}, {pipeline_mode = #tpu.pipeline_mode<synchronous>, transform_indices = @transform_1, window_bounds = array<i64: 3, 512>}, {pipeline_mode = #tpu.pipeline_mode<synchronous>, transform_indices = @transform_2, window_bounds = array<i64: 1, 512>}, {pipeline_mode = #tpu.pipeline_mode<synchronous>, transform_indices = @transform_3, window_bounds = array<i64: 512, 512>}, {pipeline_mode = #tpu.pipeline_mode<synchronous>, transform_indices = @transform_4, window_bounds = array<i64: 1, 512>}, {pipeline_mode = #tpu.pipeline_mode<synchronous>, transform_indices = @transform_5, window_bounds = array<i64: 512, 512>}, {pipeline_mode = #tpu.pipeline_mode<synchronous>, transform_indices = @transform_6, window_bounds = array<i64: 1, 512>}, {pipeline_mode = #tpu.pipeline_mode<synchronous>, transform_indices = @transform_7, window_bounds = array<i64: 512, 512>}, {pipeline_mode = #tpu.pipeline_mode<synchronous>, transform_indices = @transform_8, window_bounds = array<i64: 1, 512>}, {pipeline_mode = #tpu.pipeline_mode<synchronous>, transform_indices = @transform_9, window_bounds = array<i64: 512, 512>}, {pipeline_mode = #tpu.pipeline_mode<synchronous>, transform_indices = @transform_10, window_bounds = array<i64: 3, 512>}, {pipeline_mode = #tpu.pipeline_mode<synchronous>, transform_indices = @transform_11, window_bounds = array<i64: 1, 512>}, {pipeline_mode = #tpu.pipeline_mode<synchronous>, transform_indices = @transform_12, window_bounds = array<i64: 512, 512>}, {pipeline_mode = #tpu.pipeline_mode<synchronous>, transform_indices = @transform_13, window_bounds = array<i64: 1, 512>}, {pipeline_mode = #tpu.pipeline_mode<synchronous>, transform_indices = @transform_14, window_bounds = array<i64: 512, 512>}, {pipeline_mode = #tpu.pipeline_mode<synchronous>, transform_indices = @transform_15, window_bounds = array<i64: 1, 512>}, {pipeline_mode = #tpu.pipeline_mode<synchronous>, transform_indices = @transform_16, window_bounds = array<i64: 1, 512>}, {pipeline_mode = #tpu.pipeline_mode<synchronous>, transform_indices = @transform_17, window_bounds = array<i64: 1, 1>}, {transform_indices = @transform_18, window_bounds = array<i64: 8, 1>}]} {
    %c0 = arith.constant 0 : index
    %c0_0 = arith.constant 0 : index
    %0 = vector.load %arg1[%c0, %c0_0] : memref<8x3xf32, #tpu.memory_space<vmem>>, vector<8x3xf32>
    %1 = arith.truncf %0 : vector<8x3xf32> to vector<8x3xbf16>
    %c0_1 = arith.constant 0 : index
    %c0_2 = arith.constant 0 : index
    %2 = vector.load %arg2[%c0_1, %c0_2] : memref<3x512xbf16, #tpu.memory_space<vmem>>, vector<3x512xbf16>
    %cst = arith.constant dense<0.000000e+00> : vector<8x512xf32>
    %3 = tpu.matmul %1, %2, %cst {dimension_numbers = #tpu.dot_dimension_numbers<[1], [0], [0], [1], [0, 0, 1, 1], [], []>} : vector<8x3xbf16>, vector<3x512xbf16>, vector<8x512xf32> -> vector<8x512xf32>
    %c0_3 = arith.constant 0 : index
    %c0_4 = arith.constant 0 : index
    %4 = vector.load %arg3[%c0_3, %c0_4] : memref<1x512xf32, #tpu.memory_space<vmem>>, vector<1x512xf32>
    %5 = vector.broadcast %4 : vector<1x512xf32> to vector<8x512xf32>
    %6 = arith.addf %3, %5 : vector<8x512xf32>
    %cst_5 = arith.constant 0.000000e+00 : f32
    %7 = vector.broadcast %cst_5 : f32 to vector<8x512xf32>
    %8 = arith.maximumf %6, %7 : vector<8x512xf32>
    %9 = arith.truncf %8 : vector<8x512xf32> to vector<8x512xbf16>
    %c0_6 = arith.constant 0 : index
    %c0_7 = arith.constant 0 : index
    %10 = vector.load %arg4[%c0_6, %c0_7] : memref<512x512xbf16, #tpu.memory_space<vmem>>, vector<512x512xbf16>
    %cst_8 = arith.constant dense<0.000000e+00> : vector<8x512xf32>
    %11 = tpu.matmul %9, %10, %cst_8 {dimension_numbers = #tpu.dot_dimension_numbers<[1], [0], [0], [1], [0, 0, 1, 1], [], []>} : vector<8x512xbf16>, vector<512x512xbf16>, vector<8x512xf32> -> vector<8x512xf32>
    %c0_9 = arith.constant 0 : index
    %c0_10 = arith.constant 0 : index
    %12 = vector.load %arg5[%c0_9, %c0_10] : memref<1x512xf32, #tpu.memory_space<vmem>>, vector<1x512xf32>
    %13 = vector.broadcast %12 : vector<1x512xf32> to vector<8x512xf32>
    %14 = arith.addf %11, %13 : vector<8x512xf32>
    %cst_11 = arith.constant 0.000000e+00 : f32
    %15 = vector.broadcast %cst_11 : f32 to vector<8x512xf32>
    %16 = arith.maximumf %14, %15 : vector<8x512xf32>
    %17 = arith.truncf %16 : vector<8x512xf32> to vector<8x512xbf16>
    %c0_12 = arith.constant 0 : index
    %c0_13 = arith.constant 0 : index
    %18 = vector.load %arg6[%c0_12, %c0_13] : memref<512x512xbf16, #tpu.memory_space<vmem>>, vector<512x512xbf16>
    %cst_14 = arith.constant dense<0.000000e+00> : vector<8x512xf32>
    %19 = tpu.matmul %17, %18, %cst_14 {dimension_numbers = #tpu.dot_dimension_numbers<[1], [0], [0], [1], [0, 0, 1, 1], [], []>} : vector<8x512xbf16>, vector<512x512xbf16>, vector<8x512xf32> -> vector<8x512xf32>
    %c0_15 = arith.constant 0 : index
    %c0_16 = arith.constant 0 : index
    %20 = vector.load %arg7[%c0_15, %c0_16] : memref<1x512xf32, #tpu.memory_space<vmem>>, vector<1x512xf32>
    %21 = vector.broadcast %20 : vector<1x512xf32> to vector<8x512xf32>
    %22 = arith.addf %19, %21 : vector<8x512xf32>
    %cst_17 = arith.constant 0.000000e+00 : f32
    %23 = vector.broadcast %cst_17 : f32 to vector<8x512xf32>
    %24 = arith.maximumf %22, %23 : vector<8x512xf32>
    %25 = arith.truncf %24 : vector<8x512xf32> to vector<8x512xbf16>
    %c0_18 = arith.constant 0 : index
    %c0_19 = arith.constant 0 : index
    %26 = vector.load %arg8[%c0_18, %c0_19] : memref<512x512xbf16, #tpu.memory_space<vmem>>, vector<512x512xbf16>
    %cst_20 = arith.constant dense<0.000000e+00> : vector<8x512xf32>
    %27 = tpu.matmul %25, %26, %cst_20 {dimension_numbers = #tpu.dot_dimension_numbers<[1], [0], [0], [1], [0, 0, 1, 1], [], []>} : vector<8x512xbf16>, vector<512x512xbf16>, vector<8x512xf32> -> vector<8x512xf32>
    %c0_21 = arith.constant 0 : index
    %c0_22 = arith.constant 0 : index
    %28 = vector.load %arg9[%c0_21, %c0_22] : memref<1x512xf32, #tpu.memory_space<vmem>>, vector<1x512xf32>
    %29 = vector.broadcast %28 : vector<1x512xf32> to vector<8x512xf32>
    %30 = arith.addf %27, %29 : vector<8x512xf32>
    %cst_23 = arith.constant 0.000000e+00 : f32
    %31 = vector.broadcast %cst_23 : f32 to vector<8x512xf32>
    %32 = arith.maximumf %30, %31 : vector<8x512xf32>
    %33 = arith.truncf %32 : vector<8x512xf32> to vector<8x512xbf16>
    %c0_24 = arith.constant 0 : index
    %c0_25 = arith.constant 0 : index
    %34 = vector.load %arg10[%c0_24, %c0_25] : memref<512x512xbf16, #tpu.memory_space<vmem>>, vector<512x512xbf16>
    %cst_26 = arith.constant dense<0.000000e+00> : vector<8x512xf32>
    %35 = tpu.matmul %33, %34, %cst_26 {dimension_numbers = #tpu.dot_dimension_numbers<[1], [0], [0], [1], [0, 0, 1, 1], [], []>} : vector<8x512xbf16>, vector<512x512xbf16>, vector<8x512xf32> -> vector<8x512xf32>
    %c0_27 = arith.constant 0 : index
    %c0_28 = arith.constant 0 : index
    %36 = vector.load %arg11[%c0_27, %c0_28] : memref<3x512xbf16, #tpu.memory_space<vmem>>, vector<3x512xbf16>
    %cst_29 = arith.constant dense<0.000000e+00> : vector<8x512xf32>
    %37 = tpu.matmul %1, %36, %cst_29 {dimension_numbers = #tpu.dot_dimension_numbers<[1], [0], [0], [1], [0, 0, 1, 1], [], []>} : vector<8x3xbf16>, vector<3x512xbf16>, vector<8x512xf32> -> vector<8x512xf32>
    %38 = arith.addf %35, %37 : vector<8x512xf32>
    %c0_30 = arith.constant 0 : index
    %c0_31 = arith.constant 0 : index
    %39 = vector.load %arg12[%c0_30, %c0_31] : memref<1x512xf32, #tpu.memory_space<vmem>>, vector<1x512xf32>
    %40 = vector.broadcast %39 : vector<1x512xf32> to vector<8x512xf32>
    %41 = arith.addf %38, %40 : vector<8x512xf32>
    %cst_32 = arith.constant 0.000000e+00 : f32
    %42 = vector.broadcast %cst_32 : f32 to vector<8x512xf32>
    %43 = arith.maximumf %41, %42 : vector<8x512xf32>
    %44 = arith.truncf %43 : vector<8x512xf32> to vector<8x512xbf16>
    %c0_33 = arith.constant 0 : index
    %c0_34 = arith.constant 0 : index
    %45 = vector.load %arg13[%c0_33, %c0_34] : memref<512x512xbf16, #tpu.memory_space<vmem>>, vector<512x512xbf16>
    %cst_35 = arith.constant dense<0.000000e+00> : vector<8x512xf32>
    %46 = tpu.matmul %44, %45, %cst_35 {dimension_numbers = #tpu.dot_dimension_numbers<[1], [0], [0], [1], [0, 0, 1, 1], [], []>} : vector<8x512xbf16>, vector<512x512xbf16>, vector<8x512xf32> -> vector<8x512xf32>
    %c0_36 = arith.constant 0 : index
    %c0_37 = arith.constant 0 : index
    %47 = vector.load %arg14[%c0_36, %c0_37] : memref<1x512xf32, #tpu.memory_space<vmem>>, vector<1x512xf32>
    %48 = vector.broadcast %47 : vector<1x512xf32> to vector<8x512xf32>
    %49 = arith.addf %46, %48 : vector<8x512xf32>
    %cst_38 = arith.constant 0.000000e+00 : f32
    %50 = vector.broadcast %cst_38 : f32 to vector<8x512xf32>
    %51 = arith.maximumf %49, %50 : vector<8x512xf32>
    %52 = arith.truncf %51 : vector<8x512xf32> to vector<8x512xbf16>
    %c0_39 = arith.constant 0 : index
    %c0_40 = arith.constant 0 : index
    %53 = vector.load %arg15[%c0_39, %c0_40] : memref<512x512xbf16, #tpu.memory_space<vmem>>, vector<512x512xbf16>
    %cst_41 = arith.constant dense<0.000000e+00> : vector<8x512xf32>
    %54 = tpu.matmul %52, %53, %cst_41 {dimension_numbers = #tpu.dot_dimension_numbers<[1], [0], [0], [1], [0, 0, 1, 1], [], []>} : vector<8x512xbf16>, vector<512x512xbf16>, vector<8x512xf32> -> vector<8x512xf32>
    %c0_42 = arith.constant 0 : index
    %c0_43 = arith.constant 0 : index
    %55 = vector.load %arg16[%c0_42, %c0_43] : memref<1x512xf32, #tpu.memory_space<vmem>>, vector<1x512xf32>
    %56 = vector.broadcast %55 : vector<1x512xf32> to vector<8x512xf32>
    %57 = arith.addf %54, %56 : vector<8x512xf32>
    %cst_44 = arith.constant 0.000000e+00 : f32
    %58 = vector.broadcast %cst_44 : f32 to vector<8x512xf32>
    %59 = arith.maximumf %57, %58 : vector<8x512xf32>
    %60 = arith.truncf %59 : vector<8x512xf32> to vector<8x512xbf16>
    %61 = arith.extf %60 : vector<8x512xbf16> to vector<8x512xf32>
    %c0_45 = arith.constant 0 : index
    %c0_46 = arith.constant 0 : index
    %62 = vector.load %arg17[%c0_45, %c0_46] : memref<1x512xf32, #tpu.memory_space<vmem>>, vector<1x512xf32>
    %63 = vector.broadcast %62 : vector<1x512xf32> to vector<8x512xf32>
    %64 = arith.mulf %61, %63 : vector<8x512xf32>
    %cst_47 = arith.constant dense<0.000000e+00> : vector<8xf32>
    %65 = vector.multi_reduction <add>, %64, %cst_47 [1] : vector<8x512xf32> to vector<8xf32>
    %66 = vector.shape_cast %65 : vector<8xf32> to vector<8x1xf32>
    %c0_48 = arith.constant 0 : index
    %c0_49 = arith.constant 0 : index
    %67 = vector.load %arg18[%c0_48, %c0_49] : memref<1x1xf32, #tpu.memory_space<vmem>>, vector<1x1xf32>
    %68 = vector.broadcast %67 : vector<1x1xf32> to vector<8x1xf32>
    %69 = arith.addf %66, %68 : vector<8x1xf32>
    %c0_50 = arith.constant 0 : index
    %c0_51 = arith.constant 0 : index
    %70 = vector.load %arg19[%c0_50, %c0_51] : memref<8x1xf32, #tpu.memory_space<vmem>>, vector<8x1xf32>
    tpu.vector_store %arg19[%c0_50, %c0_51], %69 {strides = array<i32>} : memref<8x1xf32, #tpu.memory_space<vmem>>, vector<8x1xf32>,
    return
  }
  func.func @transform_0(%arg0: i32) -> (i32, i32) {
    %c0_i32 = arith.constant 0 : i32
    %c0_i32_0 = arith.constant 0 : i32
    return %arg0, %c0_i32 : i32, i32
  }
  func.func @transform_1(%arg0: i32) -> (i32, i32) {
    %c0_i32 = arith.constant 0 : i32
    %c0_i32_0 = arith.constant 0 : i32
    %c0_i32_1 = arith.constant 0 : i32
    return %c0_i32, %c0_i32_0 : i32, i32
  }
  func.func @transform_2(%arg0: i32) -> (i32, i32) {
    %c0_i32 = arith.constant 0 : i32
    %c0_i32_0 = arith.constant 0 : i32
    %c0_i32_1 = arith.constant 0 : i32
    return %c0_i32, %c0_i32_0 : i32, i32
  }
  func.func @transform_3(%arg0: i32) -> (i32, i32) {
    %c0_i32 = arith.constant 0 : i32
    %c0_i32_0 = arith.constant 0 : i32
    %c0_i32_1 = arith.constant 0 : i32
    return %c0_i32, %c0_i32_0 : i32, i32
  }
  func.func @transform_4(%arg0: i32) -> (i32, i32) {
    %c0_i32 = arith.constant 0 : i32
    %c0_i32_0 = arith.constant 0 : i32
    %c0_i32_1 = arith.constant 0 : i32
    return %c0_i32, %c0_i32_0 : i32, i32
  }
  func.func @transform_5(%arg0: i32) -> (i32, i32) {
    %c0_i32 = arith.constant 0 : i32
    %c0_i32_0 = arith.constant 0 : i32
    %c0_i32_1 = arith.constant 0 : i32
    return %c0_i32, %c0_i32_0 : i32, i32
  }
  func.func @transform_6(%arg0: i32) -> (i32, i32) {
    %c0_i32 = arith.constant 0 : i32
    %c0_i32_0 = arith.constant 0 : i32
    %c0_i32_1 = arith.constant 0 : i32
    return %c0_i32, %c0_i32_0 : i32, i32
  }
  func.func @transform_7(%arg0: i32) -> (i32, i32) {
    %c0_i32 = arith.constant 0 : i32
    %c0_i32_0 = arith.constant 0 : i32
    %c0_i32_1 = arith.constant 0 : i32
    return %c0_i32, %c0_i32_0 : i32, i32
  }
  func.func @transform_8(%arg0: i32) -> (i32, i32) {
    %c0_i32 = arith.constant 0 : i32
    %c0_i32_0 = arith.constant 0 : i32
    %c0_i32_1 = arith.constant 0 : i32
    return %c0_i32, %c0_i32_0 : i32, i32
  }
  func.func @transform_9(%arg0: i32) -> (i32, i32) {
    %c0_i32 = arith.constant 0 : i32
    %c0_i32_0 = arith.constant 0 : i32
    %c0_i32_1 = arith.constant 0 : i32
    return %c0_i32, %c0_i32_0 : i32, i32
  }
  func.func @transform_10(%arg0: i32) -> (i32, i32) {
    %c0_i32 = arith.constant 0 : i32
    %c0_i32_0 = arith.constant 0 : i32
    %c0_i32_1 = arith.constant 0 : i32
    return %c0_i32, %c0_i32_0 : i32, i32
  }
  func.func @transform_11(%arg0: i32) -> (i32, i32) {
    %c0_i32 = arith.constant 0 : i32
    %c0_i32_0 = arith.constant 0 : i32
    %c0_i32_1 = arith.constant 0 : i32
    return %c0_i32, %c0_i32_0 : i32, i32
  }
  func.func @transform_12(%arg0: i32) -> (i32, i32) {
    %c0_i32 = arith.constant 0 : i32
    %c0_i32_0 = arith.constant 0 : i32
    %c0_i32_1 = arith.constant 0 : i32
    return %c0_i32, %c0_i32_0 : i32, i32
  }
  func.func @transform_13(%arg0: i32) -> (i32, i32) {
    %c0_i32 = arith.constant 0 : i32
    %c0_i32_0 = arith.constant 0 : i32
    %c0_i32_1 = arith.constant 0 : i32
    return %c0_i32, %c0_i32_0 : i32, i32
  }
  func.func @transform_14(%arg0: i32) -> (i32, i32) {
    %c0_i32 = arith.constant 0 : i32
    %c0_i32_0 = arith.constant 0 : i32
    %c0_i32_1 = arith.constant 0 : i32
    return %c0_i32, %c0_i32_0 : i32, i32
  }
  func.func @transform_15(%arg0: i32) -> (i32, i32) {
    %c0_i32 = arith.constant 0 : i32
    %c0_i32_0 = arith.constant 0 : i32
    %c0_i32_1 = arith.constant 0 : i32
    return %c0_i32, %c0_i32_0 : i32, i32
  }
  func.func @transform_16(%arg0: i32) -> (i32, i32) {
    %c0_i32 = arith.constant 0 : i32
    %c0_i32_0 = arith.constant 0 : i32
    %c0_i32_1 = arith.constant 0 : i32
    return %c0_i32, %c0_i32_0 : i32, i32
  }
  func.func @transform_17(%arg0: i32) -> (i32, i32) {
    %c0_i32 = arith.constant 0 : i32
    %c0_i32_0 = arith.constant 0 : i32
    %c0_i32_1 = arith.constant 0 : i32
    return %c0_i32, %c0_i32_0 : i32, i32
  }
  func.func @transform_18(%arg0: i32) -> (i32, i32) {
    %c0_i32 = arith.constant 0 : i32
    %c0_i32_0 = arith.constant 0 : i32
    return %arg0, %c0_i32 : i32, i32
  }
}

</mosaic_0001>

<bundles_post_ra>
// kernel: net_forward.1
= control target key start
LH: loop header
LB: loop body
LE: loop exit
PB: predicated region body
PF: predicated region fallthrough
CT: control target
= control target key end

     0   :  { %v67_v0 = vlaneseq  ;;  %v8143_v1 = vmov 1983009808   ;;  %vm109_vm0 = vcmask 1040384   ;;  %v8144_v5 = vmov 0   ;;  %s10723_s1 = inlined_call_operand.vmem [shape: bf16[3,512], index: 1, kind: input, shape index: {}]   ;;  %s10724_s3 = inlined_call_operand.vmem [shape: bf16[512,512], index: 3, kind: input, shape index: {}]   ;;  %s10725_s0 = inlined_call_operand.vmem [shape: f32[8,3], index: 0, kind: input, shape index: {}]   ;;  %s10726_s5 = inlined_call_operand.vmem [shape: bf16[512,512], index: 5, kind: input, shape index: {}]   ;;  %s10727_s2 = inlined_call_operand.vmem [shape: f32[1,512], index: 2, kind: input, shape index: {}]   ;;  %s10728_s7 = inlined_call_operand.vmem [shape: bf16[512,512], index: 7, kind: input, shape index: {}]   ;;  %s10729_s4 = inlined_call_operand.vmem [shape: f32[1,512], index: 4, kind: input, shape index: {}]   ;;  %s10730_s9 = inlined_call_operand.vmem [shape: bf16[512,512], index: 9, kind: input, shape index: {}]   ;;  %s10731_s6 = inlined_call_operand.vmem [shape: f32[1,512], index: 6, kind: input, shape index: {}]   ;;  %s10732_s10 = inlined_call_operand.vmem [shape: bf16[3,512], index: 10, kind: input, shape index: {}]   ;;  %s10733_s12 = inlined_call_operand.vmem [shape: bf16[512,512], index: 12, kind: input, shape index: {}]   ;;  %s10734_s8 = inlined_call_operand.vmem [shape: f32[1,512], index: 8, kind: input, shape index: {}]   ;;  %s10735_s14 = inlined_call_operand.vmem [shape: bf16[512,512], index: 14, kind: input, shape index: {}]   ;;  %s10736_s11 = inlined_call_operand.vmem [shape: f32[1,512], index: 11, kind: input, shape index: {}]   ;;  %s10737_s13 = inlined_call_operand.vmem [shape: f32[1,512], index: 13, kind: input, shape index: {}]   ;;  %s10738_s17 = inlined_call_operand.<no memory space> [shape: f32[1,1], index: 17, kind: input, shape index: {}]   ;;  %s10739_s15 = inlined_call_operand.vmem [shape: f32[1,512], index: 15, kind: input, shape index: {}]   ;;  %s10740_s16 = inlined_call_operand.vmem [shape: f32[1,512], index: 16, kind: input, shape index: {}]   ;;  %s10741_s18 = inlined_call_operand.vmem [shape: f32[8,1], index: 18, kind: output, shape index: {}]  }
   0x1   :  { %10743 = sst [smem:[#allocation3_spill]] %s10723_s1  ;;  %v90_v2 = vunpack.c.l.s4 %v8143_v1  ;;  %157 = vmatprep.mubr.bf16.mxu0 %v8144_v5  ;;  %198 = vmatprep.mubr.bf16.mxu1 %v8144_v5  ;;  %vm110_vm1 = vcmask 1041408   ;;  %v8145_v8 = vmov 65535   ;;  %vm105_vm2 = vcmask 23552  }
   0x2   :  { %10744 = sst [smem:[#allocation4_spill]] %s10724_s3  ;;  %s10746_s29 = sld [smem:[#allocation3_spill]]  ;;  %v8244_v4 = vshrl.u32 %v67_v0, 7  ;;  %v111_v9 = vsel %vm109_vm0, 4294967295, %v8145_v8  ;;  %vm6147_vm3 = vcmask 7168  }
   0x3   :  { %10745 = sst [smem:[#allocation5_spill]] %s10725_s0  ;;  %v91_v6 = vunpack.c.0.s8 %v90_v2  ;;  %v8252_v12 = vsel %vm110_vm1, %v111_v9, 0  ;;  %s10748_s21 = sld [smem:[#allocation4_spill]] }
   0x4   :  { %s10747_s19 = sld [smem:[#allocation5_spill]] }
   0x5   :  { %v8249_v10 = vsub.s32 %v91_v6, %v8244_v4 }
   0x8   :  { %v64_v3 = vld [vmem:[%s10746_s29] sm:$0xff] }
   0x9   :  { %v88_v7 = vcombine.high %v64_v3, %v64_v3  ;;  %v95_v11 = vrot.slane %v64_v3, %v8249_v10  ;;  %v6992_v19 = vld [vmem:[%s10748_s21 + $0x4] ss:$16 sps:$4 sm:$0xff]   ;;  %v6995_v22 = vld [vmem:[%s10748_s21 + $0xc] ss:$16 sps:$4 sm:$0xff]   ;;  %v6990_v24 = vld [vmem:[%s10748_s21] ss:$16 sps:$4 sm:$0xff]  }
   0xa   :  { %v62_v17 = vld [vmem:[%s10747_s19] sm:$0xff]  ;;  %v6993_v25 = vld [vmem:[%s10748_s21 + $0x8] ss:$16 sps:$4 sm:$0xff]   ;;  %v7001_v27 = vld [vmem:[%s10748_s21 + $0x2c] ss:$16 sps:$4 sm:$0xff]  }
   0xb   :  { %v102_v13 = vrot.slane %v88_v7, %v8249_v10  ;;  %v103_v14 = vcombine.high %v95_v11, %v95_v11  ;;  %v114_v16 = vand.u32 %v8252_v12, %v95_v11  ;;  %v8268_v23 = vpack.c.bf16 %v62_v17, %v62_v17  ;;  %v6998_v26 = vld [vmem:[%s10748_s21 + $0x24] ss:$16 sps:$4 sm:$0xff]   ;;  %v6996_v28 = vld [vmem:[%s10748_s21 + $0x20] ss:$16 sps:$4 sm:$0xff]   ;;  %v6999_v29 = vld [vmem:[%s10748_s21 + $0x28] ss:$16 sps:$4 sm:$0xff]  }
   0xc   :  { %v7004_v30 = vld [vmem:[%s10748_s21 + $0x44] ss:$16 sps:$4 sm:$0xff]   ;;  %v7007_v31 = vld [vmem:[%s10748_s21 + $0x4c] ss:$16 sps:$4 sm:$0xff]   ;;  %v7002_v32 = vld [vmem:[%s10748_s21 + $0x40] ss:$16 sps:$4 sm:$0xff]  }
   0xd   :  { %v104_v15 = vcombine.high %v102_v13, %v102_v13  ;;  %v120_v18 = vand.u32 %v8252_v12, %v102_v13  ;;  %v117_v20 = vand.u32 %v8252_v12, %v103_v14  ;;  %v7005_v33 = vld [vmem:[%s10748_s21 + $0x48] ss:$16 sps:$4 sm:$0xff]   ;;  %v7010_v34 = vld [vmem:[%s10748_s21 + $0x64] ss:$16 sps:$4 sm:$0xff]   ;;  %v7013_v35 = vld [vmem:[%s10748_s21 + $0x6c] ss:$16 sps:$4 sm:$0xff]  }
   0xe   :  { %v7008_v36 = vld [vmem:[%s10748_s21 + $0x60] ss:$16 sps:$4 sm:$0xff]   ;;  %v7011_v37 = vld [vmem:[%s10748_s21 + $0x68] ss:$16 sps:$4 sm:$0xff]   ;;  %v7016_v38 = vld [vmem:[%s10748_s21 + $0x84] ss:$16 sps:$4 sm:$0xff]  }
   0xf   :  { %v123_v21 = vand.u32 %v8252_v12, %v104_v15  ;;  %125 = vmatprep.subr.bf16.mxu0 %v117_v20  ;;  %v7019_v39 = vld [vmem:[%s10748_s21 + $0x8c] ss:$16 sps:$4 sm:$0xff]   ;;  %v7014_v40 = vld [vmem:[%s10748_s21 + $0x80] ss:$16 sps:$4 sm:$0xff]   ;;  %v7017_v41 = vld [vmem:[%s10748_s21 + $0x88] ss:$16 sps:$4 sm:$0xff]  }
  0x10   :  { %126 = vmatpush1.bf16.msra.mxu0 %v114_v16  ;;  %v7022_v42 = vld [vmem:[%s10748_s21 + $0xa4] ss:$16 sps:$4 sm:$0xff]   ;;  %v7025_v43 = vld [vmem:[%s10748_s21 + $0xac] ss:$16 sps:$4 sm:$0xff]   ;;  %v7020_v44 = vld [vmem:[%s10748_s21 + $0xa0] ss:$16 sps:$4 sm:$0xff]  }
  0x11   :  { %166 = vmatprep.subr.bf16.mxu1 %v123_v21  ;;  %1005 = vmatprep.subr.bf16.mxu0 %v6992_v19  ;;  %v7023_v45 = vld [vmem:[%s10748_s21 + $0xa8] ss:$16 sps:$4 sm:$0xff]   ;;  %v7028_v46 = vld [vmem:[%s10748_s21 + $0xc4] ss:$16 sps:$4 sm:$0xff]   ;;  %v7031_v47 = vld [vmem:[%s10748_s21 + $0xcc] ss:$16 sps:$4 sm:$0xff]  }
  0x12   :  { %167 = vmatpush1.bf16.msra.mxu1 %v120_v18  ;;  %v7026_v48 = vld [vmem:[%s10748_s21 + $0xc0] ss:$16 sps:$4 sm:$0xff]   ;;  %v7029_v49 = vld [vmem:[%s10748_s21 + $0xc8] ss:$16 sps:$4 sm:$0xff]   ;;  %v7034_v50 = vld [vmem:[%s10748_s21 + $0xe4] ss:$16 sps:$4 sm:$0xff]  }
  0x13   :  { %1087 = vmatprep.subr.bf16.mxu1 %v6995_v22  ;;  %6153 = vmatmul.mubr.msk.bf16.vlgmr.msra.gmra.mrb[0].mxu0 %vm105_vm2, %v8268_v23  ;;  %v7037_v51 = vld [vmem:[%s10748_s21 + $0xec] ss:$16 sps:$4 sm:$0xff]   ;;  %v7032_v52 = vld [vmem:[%s10748_s21 + $0xe0] ss:$16 sps:$4 sm:$0xff]   ;;  %v7035_v53 = vld [vmem:[%s10748_s21 + $0xe8] ss:$16 sps:$4 sm:$0xff]  }
  0x14   :  { %1006 = vmatpush1.bf16.msra.mxu0 %v6990_v24  ;;  %v7040_v54 = vld [vmem:[%s10748_s21 + $0x104] ss:$16 sps:$4 sm:$0xff]   ;;  %v7043_v55 = vld [vmem:[%s10748_s21 + $0x10c] ss:$16 sps:$4 sm:$0xff]   ;;  %v7038_v56 = vld [vmem:[%s10748_s21 + $0x100] ss:$16 sps:$4 sm:$0xff]  }
  0x15   :  { %6154 = vmatmul.mubr.msk.bf16.vlgmr.msra.gmra.mrb[0].mxu1 %vm105_vm2, %v8268_v23  ;;  %1007 = vmatprep.subr.bf16.mxu0 %v6998_v26  ;;  %v7041_v57 = vld [vmem:[%s10748_s21 + $0x108] ss:$16 sps:$4 sm:$0xff]   ;;  %v7046_v58 = vld [vmem:[%s10748_s21 + $0x124] ss:$16 sps:$4 sm:$0xff]   ;;  %v7049_v59 = vld [vmem:[%s10748_s21 + $0x12c] ss:$16 sps:$4 sm:$0xff]  }
  0x16   :  { %1088 = vmatpush1.bf16.msra.mxu1 %v6993_v25  ;;  %v7044_v60 = vld [vmem:[%s10748_s21 + $0x120] ss:$16 sps:$4 sm:$0xff]   ;;  %v7047_v61 = vld [vmem:[%s10748_s21 + $0x128] ss:$16 sps:$4 sm:$0xff]   ;;  %v7052_v62 = vld [vmem:[%s10748_s21 + $0x144] ss:$16 sps:$4 sm:$0xff]  }
  0x17   :  { %1089 = vmatprep.subr.bf16.mxu1 %v7001_v27  ;;  %v7055_v63 = vld [vmem:[%s10748_s21 + $0x14c] ss:$16 sps:$4 sm:$0xff]   ;;  %v7050_v0 = vld [vmem:[%s10748_s21 + $0x140] ss:$16 sps:$4 sm:$0xff]   ;;  %v7053_v1 = vld [vmem:[%s10748_s21 + $0x148] ss:$16 sps:$4 sm:$0xff]  }
  0x18   :  { %1008 = vmatpush1.bf16.msra.mxu0 %v6996_v28  ;;  %v7058_v2 = vld [vmem:[%s10748_s21 + $0x164] ss:$16 sps:$4 sm:$0xff]   ;;  %v7061_v3 = vld [vmem:[%s10748_s21 + $0x16c] ss:$16 sps:$4 sm:$0xff]   ;;  %v7056_v6 = vld [vmem:[%s10748_s21 + $0x160] ss:$16 sps:$4 sm:$0xff]  }
  0x19   :  { %1009 = vmatprep.subr.bf16.mxu0 %v7004_v30  ;;  %v7059_v7 = vld [vmem:[%s10748_s21 + $0x168] ss:$16 sps:$4 sm:$0xff]   ;;  %v7064_v8 = vld [vmem:[%s10748_s21 + $0x184] ss:$16 sps:$4 sm:$0xff]   ;;  %v7067_v9 = vld [vmem:[%s10748_s21 + $0x18c] ss:$16 sps:$4 sm:$0xff]  }
  0x1a   :  { %1090 = vmatpush1.bf16.msra.mxu1 %v6999_v29  ;;  %v7062_v11 = vld [vmem:[%s10748_s21 + $0x180] ss:$16 sps:$4 sm:$0xff]   ;;  %v7065_v13 = vld [vmem:[%s10748_s21 + $0x188] ss:$16 sps:$4 sm:$0xff]   ;;  %v7070_v14 = vld [vmem:[%s10748_s21 + $0x1a4] ss:$16 sps:$4 sm:$0xff]  }
  0x1b   :  { %1091 = vmatprep.subr.bf16.mxu1 %v7007_v31  ;;  %v7073_v15 = vld [vmem:[%s10748_s21 + $0x1ac] ss:$16 sps:$4 sm:$0xff]   ;;  %v7068_v16 = vld [vmem:[%s10748_s21 + $0x1a0] ss:$16 sps:$4 sm:$0xff]   ;;  %v7071_v17 = vld [vmem:[%s10748_s21 + $0x1a8] ss:$16 sps:$4 sm:$0xff]  }
  0x1c   :  { %1010 = vmatpush1.bf16.msra.mxu0 %v7002_v32  ;;  %v7076_v18 = vld [vmem:[%s10748_s21 + $0x1c4] ss:$16 sps:$4 sm:$0xff]   ;;  %v7079_v19 = vld [vmem:[%s10748_s21 + $0x1cc] ss:$16 sps:$4 sm:$0xff]   ;;  %v7074_v20 = vld [vmem:[%s10748_s21 + $0x1c0] ss:$16 sps:$4 sm:$0xff]  }
  0x1d   :  { %1011 = vmatprep.subr.bf16.mxu0 %v7010_v34  ;;  %v7077_v21 = vld [vmem:[%s10748_s21 + $0x1c8] ss:$16 sps:$4 sm:$0xff]   ;;  %v7082_v22 = vld [vmem:[%s10748_s21 + $0x1e4] ss:$16 sps:$4 sm:$0xff]   ;;  %v7085_v24 = vld [vmem:[%s10748_s21 + $0x1ec] ss:$16 sps:$4 sm:$0xff]  }
  0x1e   :  { %1092 = vmatpush1.bf16.msra.mxu1 %v7005_v33  ;;  %v7080_v25 = vld [vmem:[%s10748_s21 + $0x1e0] ss:$16 sps:$4 sm:$0xff]   ;;  %v7083_v26 = vld [vmem:[%s10748_s21 + $0x1e8] ss:$16 sps:$4 sm:$0xff]   ;;  %v7088_v27 = vld [vmem:[%s10748_s21 + $0x204] ss:$16 sps:$4 sm:$0xff]  }
  0x1f   :  { %1093 = vmatprep.subr.bf16.mxu1 %v7013_v35  ;;  %v7091_v28 = vld [vmem:[%s10748_s21 + $0x20c] ss:$16 sps:$4 sm:$0xff]   ;;  %v8467_v29 = vsub.s32 0, %v8244_v4  ;;  %v8472_v30 = vld [vmem:[%s10727_s2] sm:$0xf]  ;;  %v8475_v31 = vsub.s32 1, %v8244_v4 }
  0x20   :  { %1012 = vmatpush1.bf16.msra.mxu0 %v7008_v36  ;;  %v8478_v32 = vsub.s32 3, %v8244_v4 }
  0x21   :  { %1013 = vmatprep.subr.bf16.mxu0 %v7016_v38  ;;  %v70_v33 = vrot.slane %v8472_v30, %v8467_v29  ;;  %v74_v34 = vrot.slane %v8472_v30, %v8475_v31 }
  0x22   :  { %1094 = vmatpush1.bf16.msra.mxu1 %v7011_v37  ;;  %v82_v35 = vrot.slane %v8472_v30, %v8478_v32 }
  0x23   :  { %1095 = vmatprep.subr.bf16.mxu1 %v7019_v39 }
  0x24   :  { %1014 = vmatpush1.bf16.msra.mxu0 %v7014_v40 }
  0x25   :  { %1015 = vmatprep.subr.bf16.mxu0 %v7022_v42 }
  0x26   :  { %1096 = vmatpush1.bf16.msra.mxu1 %v7017_v41 }
  0x27   :  { %1097 = vmatprep.subr.bf16.mxu1 %v7025_v43 }
  0x28   :  { %1016 = vmatpush1.bf16.msra.mxu0 %v7020_v44 }
  0x29   :  { %1017 = vmatprep.subr.bf16.mxu0 %v7028_v46 }
  0x2a   :  { %1098 = vmatpush1.bf16.msra.mxu1 %v7023_v45 }
  0x2b   :  { %1099 = vmatprep.subr.bf16.mxu1 %v7031_v47 }
  0x2c   :  { %1018 = vmatpush1.bf16.msra.mxu0 %v7026_v48 }
  0x2d   :  { %1019 = vmatprep.subr.bf16.mxu0 %v7034_v50  ;;  %v7089_v50 = vld [vmem:[%s10748_s21 + $0x208] ss:$16 sps:$4 sm:$0xff]  }
  0x2e   :  { %1100 = vmatpush1.bf16.msra.mxu1 %v7029_v49  ;;  %v7086_v49 = vld [vmem:[%s10748_s21 + $0x200] ss:$16 sps:$4 sm:$0xff]  }
  0x2f   :  { %1101 = vmatprep.subr.bf16.mxu1 %v7037_v51 }
  0x30   :  { %1020 = vmatpush1.bf16.msra.mxu0 %v7032_v52  ;;  %v7094_v52 = vld [vmem:[%s10748_s21 + $0x224] ss:$16 sps:$4 sm:$0xff]  }
  0x31   :  { %1021 = vmatprep.subr.bf16.mxu0 %v7040_v54 }
  0x32   :  { %1102 = vmatpush1.bf16.msra.mxu1 %v7035_v53  ;;  %v7097_v53 = vld [vmem:[%s10748_s21 + $0x22c] ss:$16 sps:$4 sm:$0xff]  }
  0x33   :  { %1103 = vmatprep.subr.bf16.mxu1 %v7043_v55 }
  0x34   :  { %1022 = vmatpush1.bf16.msra.mxu0 %v7038_v56 }
  0x35   :  { %1023 = vmatprep.subr.bf16.mxu0 %v7046_v58  ;;  %v7095_v58 = vld [vmem:[%s10748_s21 + $0x228] ss:$16 sps:$4 sm:$0xff]  }
  0x36   :  { %1104 = vmatpush1.bf16.msra.mxu1 %v7041_v57  ;;  %v7092_v57 = vld [vmem:[%s10748_s21 + $0x220] ss:$16 sps:$4 sm:$0xff]  }
  0x37   :  { %1105 = vmatprep.subr.bf16.mxu1 %v7049_v59  ;;  %v7100_v59 = vld [vmem:[%s10748_s21 + $0x244] ss:$16 sps:$4 sm:$0xff]  }
  0x38   :  { %1024 = vmatpush1.bf16.msra.mxu0 %v7044_v60  ;;  %v7103_v60 = vld [vmem:[%s10748_s21 + $0x24c] ss:$16 sps:$4 sm:$0xff]  }
  0x39   :  { %1025 = vmatprep.subr.bf16.mxu0 %v7052_v62  ;;  %v7101_v62 = vld [vmem:[%s10748_s21 + $0x248] ss:$16 sps:$4 sm:$0xff]  }
  0x3a   :  { %1106 = vmatpush1.bf16.msra.mxu1 %v7047_v61  ;;  %v7098_v61 = vld [vmem:[%s10748_s21 + $0x240] ss:$16 sps:$4 sm:$0xff]  }
  0x3b   :  { %1107 = vmatprep.subr.bf16.mxu1 %v7055_v63  ;;  %v7106_v63 = vld [vmem:[%s10748_s21 + $0x264] ss:$16 sps:$4 sm:$0xff]  }
  0x3c   :  { %1026 = vmatpush1.bf16.msra.mxu0 %v7050_v0  ;;  %v7109_v0 = vld [vmem:[%s10748_s21 + $0x26c] ss:$16 sps:$4 sm:$0xff]  }
  0x3d   :  { %1027 = vmatprep.subr.bf16.mxu0 %v7058_v2  ;;  %v7107_v2 = vld [vmem:[%s10748_s21 + $0x268] ss:$16 sps:$4 sm:$0xff]  }
  0x3e   :  { %1108 = vmatpush1.bf16.msra.mxu1 %v7053_v1  ;;  %v7104_v1 = vld [vmem:[%s10748_s21 + $0x260] ss:$16 sps:$4 sm:$0xff]  }
  0x3f   :  { %1109 = vmatprep.subr.bf16.mxu1 %v7061_v3  ;;  %v7112_v3 = vld [vmem:[%s10748_s21 + $0x284] ss:$16 sps:$4 sm:$0xff]  }
  0x40   :  { %1028 = vmatpush1.bf16.msra.mxu0 %v7056_v6  ;;  %v7115_v6 = vld [vmem:[%s10748_s21 + $0x28c] ss:$16 sps:$4 sm:$0xff]  }
  0x41   :  { %1029 = vmatprep.subr.bf16.mxu0 %v7064_v8  ;;  %v7113_v8 = vld [vmem:[%s10748_s21 + $0x288] ss:$16 sps:$4 sm:$0xff]  }
  0x42   :  { %1110 = vmatpush1.bf16.msra.mxu1 %v7059_v7  ;;  %v7110_v7 = vld [vmem:[%s10748_s21 + $0x280] ss:$16 sps:$4 sm:$0xff]  }
  0x43   :  { %1111 = vmatprep.subr.bf16.mxu1 %v7067_v9  ;;  %v7118_v9 = vld [vmem:[%s10748_s21 + $0x2a4] ss:$16 sps:$4 sm:$0xff]  }
  0x44   :  { %1030 = vmatpush1.bf16.msra.mxu0 %v7062_v11  ;;  %v7121_v11 = vld [vmem:[%s10748_s21 + $0x2ac] ss:$16 sps:$4 sm:$0xff]  }
  0x45   :  { %1031 = vmatprep.subr.bf16.mxu0 %v7070_v14  ;;  %v7119_v14 = vld [vmem:[%s10748_s21 + $0x2a8] ss:$16 sps:$4 sm:$0xff]  }
  0x46   :  { %1112 = vmatpush1.bf16.msra.mxu1 %v7065_v13  ;;  %v7116_v13 = vld [vmem:[%s10748_s21 + $0x2a0] ss:$16 sps:$4 sm:$0xff]  }
  0x47   :  { %1113 = vmatprep.subr.bf16.mxu1 %v7073_v15  ;;  %v7124_v15 = vld [vmem:[%s10748_s21 + $0x2c4] ss:$16 sps:$4 sm:$0xff]  }
  0x48   :  { %1032 = vmatpush1.bf16.msra.mxu0 %v7068_v16  ;;  %v7127_v16 = vld [vmem:[%s10748_s21 + $0x2cc] ss:$16 sps:$4 sm:$0xff]  }
  0x49   :  { %1033 = vmatprep.subr.bf16.mxu0 %v7076_v18  ;;  %v7125_v18 = vld [vmem:[%s10748_s21 + $0x2c8] ss:$16 sps:$4 sm:$0xff]  }
  0x4a   :  { %1114 = vmatpush1.bf16.msra.mxu1 %v7071_v17  ;;  %v7122_v17 = vld [vmem:[%s10748_s21 + $0x2c0] ss:$16 sps:$4 sm:$0xff]  }
  0x4b   :  { %1115 = vmatprep.subr.bf16.mxu1 %v7079_v19  ;;  %v7130_v19 = vld [vmem:[%s10748_s21 + $0x2e4] ss:$16 sps:$4 sm:$0xff]  }
  0x4c   :  { %1034 = vmatpush1.bf16.msra.mxu0 %v7074_v20  ;;  %v7133_v20 = vld [vmem:[%s10748_s21 + $0x2ec] ss:$16 sps:$4 sm:$0xff]  }
  0x4d   :  { %1035 = vmatprep.subr.bf16.mxu0 %v7082_v22  ;;  %v7131_v22 = vld [vmem:[%s10748_s21 + $0x2e8] ss:$16 sps:$4 sm:$0xff]  }
  0x4e   :  { %1116 = vmatpush1.bf16.msra.mxu1 %v7077_v21  ;;  %v7128_v21 = vld [vmem:[%s10748_s21 + $0x2e0] ss:$16 sps:$4 sm:$0xff]  }
  0x4f   :  { %1117 = vmatprep.subr.bf16.mxu1 %v7085_v24  ;;  %v7136_v24 = vld [vmem:[%s10748_s21 + $0x304] ss:$16 sps:$4 sm:$0xff]  }
  0x50   :  { %1036 = vmatpush1.bf16.msra.mxu0 %v7080_v25  ;;  %v7139_v25 = vld [vmem:[%s10748_s21 + $0x30c] ss:$16 sps:$4 sm:$0xff]  }
  0x51   :  { %1046 = vmatprep.subr.bf16.mxu0 %v7088_v27  ;;  %v7137_v27 = vld [vmem:[%s10748_s21 + $0x308] ss:$16 sps:$4 sm:$0xff]  }
  0x52   :  { %1118 = vmatpush1.bf16.msra.mxu1 %v7083_v26  ;;  %v7134_v26 = vld [vmem:[%s10748_s21 + $0x300] ss:$16 sps:$4 sm:$0xff]  }
  0x53   :  { %1128 = vmatprep.subr.bf16.mxu1 %v7091_v28  ;;  %v7142_v28 = vld [vmem:[%s10748_s21 + $0x324] ss:$16 sps:$4 sm:$0xff]  }
  0xe6   :  { %v159_v36 = vpop.f32.mrb[0].mxu0 }
  0xe7   :  { %v160_v38 = vadd.f32 %v159_v36, %v70_v33  ;;  %v161_v39 = vpop.f32.mrb[1].mxu0  ;;  %v7145_v33 = vld [vmem:[%s10748_s21 + $0x32c] ss:$16 sps:$4 sm:$0xff]   ;;  %v7148_v36 = vld [vmem:[%s10748_s21 + $0x344] ss:$16 sps:$4 sm:$0xff]  }
  0xe8   :  { %v8486_v37 = vpop.f32.mrb[0].mxu1  ;;  %v162_v41 = vadd.f32 %v161_v39, %v74_v34  ;;  %v163_v42 = vpop.f32.mrb[2].mxu0  ;;  %v7140_v34 = vld [vmem:[%s10748_s21 + $0x320] ss:$16 sps:$4 sm:$0xff]  }
  0xe9   :  { %v202_v40 = vpop.f32.mrb[1].mxu1  ;;  %v207_v45 = vmax.f32 %v160_v38, 0.0  ;;  %v164_v46 = vpop.f32.mrb[3].mxu0  ;;  %v7151_v38 = vld [vmem:[%s10748_s21 + $0x34c] ss:$16 sps:$4 sm:$0xff]  }
  0xea   :  { %v203_v43 = vadd.f32 %v202_v40, %v82_v35  ;;  %v204_v44 = vpop.f32.mrb[2].mxu1  ;;  %v208_v48 = vmax.f32 %v162_v41, 0.0  ;;  %v7143_v35 = vld [vmem:[%s10748_s21 + $0x328] ss:$16 sps:$4 sm:$0xff]   ;;  %v7146_v39 = vld [vmem:[%s10748_s21 + $0x340] ss:$16 sps:$4 sm:$0xff]  }
  0xeb   :  { %v205_v47 = vpop.f32.mrb[3].mxu1  ;;  %v211_v55 = vpack.c.bf16 %v207_v45, %v207_v45  ;;  %v7149_v40 = vld [vmem:[%s10748_s21 + $0x348] ss:$16 sps:$4 sm:$0xff]   ;;  %v7154_v41 = vld [vmem:[%s10748_s21 + $0x364] ss:$16 sps:$4 sm:$0xff]  }
  0xec   :  { %v210_v51 = vmax.f32 %v203_v43, 0.0  ;;  %v212_v54 = vpack.c.bf16 %v208_v48, %v208_v48  ;;  %v7157_v42 = vld [vmem:[%s10748_s21 + $0x36c] ss:$16 sps:$4 sm:$0xff]   ;;  %v7152_v43 = vld [vmem:[%s10748_s21 + $0x360] ss:$16 sps:$4 sm:$0xff]  }
  0xed   :  { %v7155_v44 = vld [vmem:[%s10748_s21 + $0x368] ss:$16 sps:$4 sm:$0xff]   ;;  %v7160_v45 = vld [vmem:[%s10748_s21 + $0x384] ss:$16 sps:$4 sm:$0xff]   ;;  %v7163_v46 = vld [vmem:[%s10748_s21 + $0x38c] ss:$16 sps:$4 sm:$0xff]  }
  0xee   :  { %1037 = vmatprep.mubr.bf16.mxu0 %v212_v54  ;;  %1119 = vmatprep.mubr.bf16.mxu1 %v212_v54  ;;  %v214_v56 = vpack.c.bf16 %v210_v51, %v210_v51  ;;  %v7158_v47 = vld [vmem:[%s10748_s21 + $0x380] ss:$16 sps:$4 sm:$0xff]   ;;  %v7161_v48 = vld [vmem:[%s10748_s21 + $0x388] ss:$16 sps:$4 sm:$0xff]   ;;  %v7169_v51 = vld [vmem:[%s10748_s21 + $0x3ac] ss:$16 sps:$4 sm:$0xff]  }
  0xef   :  { %1038 = vmatmul.mubr.bf16.vlgmr.msra.gmra.mrb[4].mxu0 %v211_v55  ;;  %1120 = vmatmul.mubr.bf16.vlgmr.msra.gmra.mrb[4].mxu1 %v211_v55  ;;  %v7172_v54 = vld [vmem:[%s10748_s21 + $0x3c4] ss:$16 sps:$4 sm:$0xff]   ;;  %v7175_v55 = vld [vmem:[%s10748_s21 + $0x3cc] ss:$16 sps:$4 sm:$0xff]  }
  0xf0   :  { %1047 = vmatpush1.bf16.msra.mxu0 %v7086_v49  ;;  %1129 = vmatpush1.bf16.msra.mxu1 %v7089_v50  ;;  %v8639_v49 = vsub.s32 2, %v8244_v4  ;;  %v7166_v50 = vld [vmem:[%s10748_s21 + $0x3a4] ss:$16 sps:$4 sm:$0xff]  }
  0xf1   :  { %1048 = vmatprep.subr.bf16.mxu0 %v7094_v52  ;;  %1130 = vmatprep.subr.bf16.mxu1 %v7097_v53  ;;  %v7164_v52 = vld [vmem:[%s10748_s21 + $0x3a0] ss:$16 sps:$4 sm:$0xff]   ;;  %v7167_v53 = vld [vmem:[%s10748_s21 + $0x3a8] ss:$16 sps:$4 sm:$0xff]  }
  0xf2   :  { %1078 = vmatprep.mubr.bf16.mxu0 %v214_v56  ;;  %1160 = vmatprep.mubr.bf16.mxu1 %v214_v56  ;;  %v78_v4 = vrot.slane %v8472_v30, %v8639_v49  ;;  %v7170_v56 = vld [vmem:[%s10748_s21 + $0x3c0] ss:$16 sps:$4 sm:$0xff]   ;;  %v7173_v30 = vld [vmem:[%s10748_s21 + $0x3c8] ss:$16 sps:$4 sm:$0xff]  }
  0xf4   :  { %1049 = vmatpush1.bf16.msra.mxu0 %v7092_v57  ;;  %1131 = vmatpush1.bf16.msra.mxu1 %v7095_v58  ;;  %v201_v57 = vadd.f32 %v8486_v37, %v78_v4  ;;  %v7178_v58 = vld [vmem:[%s10748_s21 + $0x3e4] ss:$16 sps:$4 sm:$0xff]   ;;  %v7179_v37 = vld [vmem:[%s10748_s21 + $0x3e8] ss:$16 sps:$4 sm:$0xff]  }
  0xf5   :  { %1050 = vmatprep.subr.bf16.mxu0 %v7100_v59  ;;  %1132 = vmatprep.subr.bf16.mxu1 %v7103_v60  ;;  %v7181_v59 = vld [vmem:[%s10748_s21 + $0x3ec] ss:$16 sps:$4 sm:$0xff]   ;;  %v7176_v60 = vld [vmem:[%s10748_s21 + $0x3e0] ss:$16 sps:$4 sm:$0xff]   ;;  %v7250_v4 = vld [vmem:[%s10726_s5 + $0x164] ss:$16 sps:$4 sm:$0xff]  }
  0xf8   :  { %1051 = vmatpush1.bf16.msra.mxu0 %v7098_v61  ;;  %1133 = vmatpush1.bf16.msra.mxu1 %v7101_v62  ;;  %v209_v61 = vmax.f32 %v201_v57, 0.0  ;;  %v7184_v62 = vld [vmem:[%s10726_s5 + $0x4] ss:$16 sps:$4 sm:$0xff]   ;;  %v7259_v57 = vld [vmem:[%s10726_s5 + $0x18c] ss:$16 sps:$4 sm:$0xff]  }
  0xf9   :  { %1052 = vmatprep.subr.bf16.mxu0 %v7106_v63  ;;  %1134 = vmatprep.subr.bf16.mxu1 %v7109_v0  ;;  %v7187_v63 = vld [vmem:[%s10726_s5 + $0xc] ss:$16 sps:$4 sm:$0xff]   ;;  %v7182_v0 = vld [vmem:[%s10726_s5] ss:$16 sps:$4 sm:$0xff]  }
  0xfc   :  { %1053 = vmatpush1.bf16.msra.mxu0 %v7104_v1  ;;  %1135 = vmatpush1.bf16.msra.mxu1 %v7107_v2  ;;  %v7185_v1 = vld [vmem:[%s10726_s5 + $0x8] ss:$16 sps:$4 sm:$0xff]   ;;  %v213_v2 = vpack.c.bf16 %v209_v61, %v209_v61  ;;  %v7260_v61 = vld [vmem:[%s10726_s5 + $0x1a0] ss:$16 sps:$4 sm:$0xff]  }
  0xfd   :  { %1054 = vmatprep.subr.bf16.mxu0 %v7112_v3  ;;  %1136 = vmatprep.subr.bf16.mxu1 %v7115_v6  ;;  %v7190_v3 = vld [vmem:[%s10726_s5 + $0x24] ss:$16 sps:$4 sm:$0xff]   ;;  %v7193_v6 = vld [vmem:[%s10726_s5 + $0x2c] ss:$16 sps:$4 sm:$0xff]  }
 0x100   :  { %1055 = vmatpush1.bf16.msra.mxu0 %v7110_v7  ;;  %1137 = vmatpush1.bf16.msra.mxu1 %v7113_v8  ;;  %v7188_v7 = vld [vmem:[%s10726_s5 + $0x20] ss:$16 sps:$4 sm:$0xff]   ;;  %v7191_v8 = vld [vmem:[%s10726_s5 + $0x28] ss:$16 sps:$4 sm:$0xff]  }
 0x101   :  { %1056 = vmatprep.subr.bf16.mxu0 %v7118_v9  ;;  %1138 = vmatprep.subr.bf16.mxu1 %v7121_v11  ;;  %v7196_v9 = vld [vmem:[%s10726_s5 + $0x44] ss:$16 sps:$4 sm:$0xff]   ;;  %v7199_v11 = vld [vmem:[%s10726_s5 + $0x4c] ss:$16 sps:$4 sm:$0xff]  }
 0x104   :  { %1057 = vmatpush1.bf16.msra.mxu0 %v7116_v13  ;;  %1139 = vmatpush1.bf16.msra.mxu1 %v7119_v14  ;;  %v7194_v13 = vld [vmem:[%s10726_s5 + $0x40] ss:$16 sps:$4 sm:$0xff]   ;;  %v7197_v14 = vld [vmem:[%s10726_s5 + $0x48] ss:$16 sps:$4 sm:$0xff]  }
 0x105   :  { %1058 = vmatprep.subr.bf16.mxu0 %v7124_v15  ;;  %1140 = vmatprep.subr.bf16.mxu1 %v7127_v16  ;;  %v7202_v15 = vld [vmem:[%s10726_s5 + $0x64] ss:$16 sps:$4 sm:$0xff]   ;;  %v7205_v16 = vld [vmem:[%s10726_s5 + $0x6c] ss:$16 sps:$4 sm:$0xff]  }
 0x108   :  { %1059 = vmatpush1.bf16.msra.mxu0 %v7122_v17  ;;  %1141 = vmatpush1.bf16.msra.mxu1 %v7125_v18  ;;  %v7200_v17 = vld [vmem:[%s10726_s5 + $0x60] ss:$16 sps:$4 sm:$0xff]   ;;  %v7203_v18 = vld [vmem:[%s10726_s5 + $0x68] ss:$16 sps:$4 sm:$0xff]  }
 0x109   :  { %1060 = vmatprep.subr.bf16.mxu0 %v7130_v19  ;;  %1142 = vmatprep.subr.bf16.mxu1 %v7133_v20  ;;  %v7208_v19 = vld [vmem:[%s10726_s5 + $0x84] ss:$16 sps:$4 sm:$0xff]   ;;  %v7211_v20 = vld [vmem:[%s10726_s5 + $0x8c] ss:$16 sps:$4 sm:$0xff]  }
 0x10c   :  { %1061 = vmatpush1.bf16.msra.mxu0 %v7128_v21  ;;  %1143 = vmatpush1.bf16.msra.mxu1 %v7131_v22  ;;  %v7206_v21 = vld [vmem:[%s10726_s5 + $0x80] ss:$16 sps:$4 sm:$0xff]   ;;  %v7209_v22 = vld [vmem:[%s10726_s5 + $0x88] ss:$16 sps:$4 sm:$0xff]  }
 0x10d   :  { %1062 = vmatprep.subr.bf16.mxu0 %v7136_v24  ;;  %1144 = vmatprep.subr.bf16.mxu1 %v7139_v25  ;;  %v7214_v24 = vld [vmem:[%s10726_s5 + $0xa4] ss:$16 sps:$4 sm:$0xff]   ;;  %v7217_v25 = vld [vmem:[%s10726_s5 + $0xac] ss:$16 sps:$4 sm:$0xff]  }
 0x110   :  { %1063 = vmatpush1.bf16.msra.mxu0 %v7134_v26  ;;  %1145 = vmatpush1.bf16.msra.mxu1 %v7137_v27  ;;  %v7212_v26 = vld [vmem:[%s10726_s5 + $0xa0] ss:$16 sps:$4 sm:$0xff]   ;;  %v7215_v27 = vld [vmem:[%s10726_s5 + $0xa8] ss:$16 sps:$4 sm:$0xff]  }
 0x111   :  { %1064 = vmatprep.subr.bf16.mxu0 %v7142_v28  ;;  %1146 = vmatprep.subr.bf16.mxu1 %v7145_v33  ;;  %v7220_v28 = vld [vmem:[%s10726_s5 + $0xc4] ss:$16 sps:$4 sm:$0xff]   ;;  %v7223_v33 = vld [vmem:[%s10726_s5 + $0xcc] ss:$16 sps:$4 sm:$0xff]  }
 0x114   :  { %1065 = vmatpush1.bf16.msra.mxu0 %v7140_v34  ;;  %1147 = vmatpush1.bf16.msra.mxu1 %v7143_v35  ;;  %v7218_v34 = vld [vmem:[%s10726_s5 + $0xc0] ss:$16 sps:$4 sm:$0xff]   ;;  %v7221_v35 = vld [vmem:[%s10726_s5 + $0xc8] ss:$16 sps:$4 sm:$0xff]  }
 0x115   :  { %1066 = vmatprep.subr.bf16.mxu0 %v7148_v36  ;;  %1148 = vmatprep.subr.bf16.mxu1 %v7151_v38  ;;  %v7226_v36 = vld [vmem:[%s10726_s5 + $0xe4] ss:$16 sps:$4 sm:$0xff]   ;;  %v7229_v38 = vld [vmem:[%s10726_s5 + $0xec] ss:$16 sps:$4 sm:$0xff]  }
 0x118   :  { %1067 = vmatpush1.bf16.msra.mxu0 %v7146_v39  ;;  %1149 = vmatpush1.bf16.msra.mxu1 %v7149_v40  ;;  %v7224_v39 = vld [vmem:[%s10726_s5 + $0xe0] ss:$16 sps:$4 sm:$0xff]   ;;  %v7227_v40 = vld [vmem:[%s10726_s5 + $0xe8] ss:$16 sps:$4 sm:$0xff]  }
 0x119   :  { %1068 = vmatprep.subr.bf16.mxu0 %v7154_v41  ;;  %1150 = vmatprep.subr.bf16.mxu1 %v7157_v42  ;;  %v7232_v41 = vld [vmem:[%s10726_s5 + $0x104] ss:$16 sps:$4 sm:$0xff]   ;;  %v7235_v42 = vld [vmem:[%s10726_s5 + $0x10c] ss:$16 sps:$4 sm:$0xff]  }
 0x11c   :  { %1069 = vmatpush1.bf16.msra.mxu0 %v7152_v43  ;;  %1151 = vmatpush1.bf16.msra.mxu1 %v7155_v44  ;;  %v7230_v43 = vld [vmem:[%s10726_s5 + $0x100] ss:$16 sps:$4 sm:$0xff]   ;;  %v7233_v44 = vld [vmem:[%s10726_s5 + $0x108] ss:$16 sps:$4 sm:$0xff]  }
 0x11d   :  { %1070 = vmatprep.subr.bf16.mxu0 %v7160_v45  ;;  %1152 = vmatprep.subr.bf16.mxu1 %v7163_v46  ;;  %v7238_v45 = vld [vmem:[%s10726_s5 + $0x124] ss:$16 sps:$4 sm:$0xff]   ;;  %v7241_v46 = vld [vmem:[%s10726_s5 + $0x12c] ss:$16 sps:$4 sm:$0xff]  }
 0x120   :  { %1071 = vmatpush1.bf16.msra.mxu0 %v7158_v47  ;;  %1153 = vmatpush1.bf16.msra.mxu1 %v7161_v48  ;;  %v7236_v47 = vld [vmem:[%s10726_s5 + $0x120] ss:$16 sps:$4 sm:$0xff]   ;;  %v7239_v48 = vld [vmem:[%s10726_s5 + $0x128] ss:$16 sps:$4 sm:$0xff]  }
 0x121   :  { %1072 = vmatprep.subr.bf16.mxu0 %v7166_v50  ;;  %1154 = vmatprep.subr.bf16.mxu1 %v7169_v51  ;;  %v7244_v50 = vld [vmem:[%s10726_s5 + $0x144] ss:$16 sps:$4 sm:$0xff]   ;;  %v7247_v51 = vld [vmem:[%s10726_s5 + $0x14c] ss:$16 sps:$4 sm:$0xff]  }
 0x124   :  { %1073 = vmatpush1.bf16.msra.mxu0 %v7164_v52  ;;  %1155 = vmatpush1.bf16.msra.mxu1 %v7167_v53  ;;  %v7242_v52 = vld [vmem:[%s10726_s5 + $0x140] ss:$16 sps:$4 sm:$0xff]   ;;  %v7245_v53 = vld [vmem:[%s10726_s5 + $0x148] ss:$16 sps:$4 sm:$0xff]  }
 0x125   :  { %1074 = vmatprep.subr.bf16.mxu0 %v7172_v54  ;;  %1156 = vmatprep.subr.bf16.mxu1 %v7175_v55  ;;  %v7253_v54 = vld [vmem:[%s10726_s5 + $0x16c] ss:$16 sps:$4 sm:$0xff]   ;;  %v7248_v55 = vld [vmem:[%s10726_s5 + $0x160] ss:$16 sps:$4 sm:$0xff]  }
 0x128   :  { %1075 = vmatpush1.bf16.msra.mxu0 %v7170_v56  ;;  %1157 = vmatpush1.bf16.msra.mxu1 %v7173_v30  ;;  %v7251_v56 = vld [vmem:[%s10726_s5 + $0x168] ss:$16 sps:$4 sm:$0xff]   ;;  %v7256_v30 = vld [vmem:[%s10726_s5 + $0x184] ss:$16 sps:$4 sm:$0xff]  }
 0x129   :  { %1076 = vmatprep.subr.bf16.mxu0 %v7178_v58  ;;  %1158 = vmatprep.subr.bf16.mxu1 %v7181_v59  ;;  %v7254_v58 = vld [vmem:[%s10726_s5 + $0x180] ss:$16 sps:$4 sm:$0xff]   ;;  %v7257_v59 = vld [vmem:[%s10726_s5 + $0x188] ss:$16 sps:$4 sm:$0xff]  }
 0x12c   :  { %1077 = vmatpush1.bf16.msra.mxu0 %v7176_v60  ;;  %1159 = vmatpush1.bf16.msra.mxu1 %v7179_v37  ;;  %v7262_v60 = vld [vmem:[%s10726_s5 + $0x1a4] ss:$16 sps:$4 sm:$0xff]   ;;  %v7265_v37 = vld [vmem:[%s10726_s5 + $0x1ac] ss:$16 sps:$4 sm:$0xff]  }
 0x12d   :  { %1967 = vmatprep.subr.bf16.mxu0 %v7184_v62  ;;  %2049 = vmatprep.subr.bf16.mxu1 %v7187_v63  ;;  %v7263_v62 = vld [vmem:[%s10726_s5 + $0x1a8] ss:$16 sps:$4 sm:$0xff]   ;;  %v7268_v63 = vld [vmem:[%s10726_s5 + $0x1c4] ss:$16 sps:$4 sm:$0xff]  }
 0x12f   :  { %1079 = vmatmul.mubr.bf16.vlgmr.msra.gmra.mrb[4].mxu0 %v213_v2  ;;  %1161 = vmatmul.mubr.bf16.vlgmr.msra.gmra.mrb[4].mxu1 %v213_v2  ;;  %v7269_v2 = vld [vmem:[%s10726_s5 + $0x1c8] ss:$16 sps:$4 sm:$0xff]  }
 0x130   :  { %1968 = vmatpush1.bf16.msra.mxu0 %v7182_v0  ;;  %2050 = vmatpush1.bf16.msra.mxu1 %v7185_v1  ;;  %v7271_v0 = vld [vmem:[%s10726_s5 + $0x1cc] ss:$16 sps:$4 sm:$0xff]   ;;  %v7266_v1 = vld [vmem:[%s10726_s5 + $0x1c0] ss:$16 sps:$4 sm:$0xff]  }
 0x131   :  { %1969 = vmatprep.subr.bf16.mxu0 %v7190_v3  ;;  %2051 = vmatprep.subr.bf16.mxu1 %v7193_v6  ;;  %v7274_v3 = vld [vmem:[%s10726_s5 + $0x1e4] ss:$16 sps:$4 sm:$0xff]   ;;  %v7277_v6 = vld [vmem:[%s10726_s5 + $0x1ec] ss:$16 sps:$4 sm:$0xff]  }
 0x134   :  { %1970 = vmatpush1.bf16.msra.mxu0 %v7188_v7  ;;  %2052 = vmatpush1.bf16.msra.mxu1 %v7191_v8  ;;  %v7272_v7 = vld [vmem:[%s10726_s5 + $0x1e0] ss:$16 sps:$4 sm:$0xff]   ;;  %v7275_v8 = vld [vmem:[%s10726_s5 + $0x1e8] ss:$16 sps:$4 sm:$0xff]  }
 0x135   :  { %1971 = vmatprep.subr.bf16.mxu0 %v7196_v9  ;;  %2053 = vmatprep.subr.bf16.mxu1 %v7199_v11  ;;  %v7280_v9 = vld [vmem:[%s10726_s5 + $0x204] ss:$16 sps:$4 sm:$0xff]   ;;  %v7283_v11 = vld [vmem:[%s10726_s5 + $0x20c] ss:$16 sps:$4 sm:$0xff]  }
 0x138   :  { %1972 = vmatpush1.bf16.msra.mxu0 %v7194_v13  ;;  %2054 = vmatpush1.bf16.msra.mxu1 %v7197_v14  ;;  %v8881_v13 = vld [vmem:[%s10729_s4] sm:$0xf] }
 0x139   :  { %1973 = vmatprep.subr.bf16.mxu0 %v7202_v15  ;;  %2055 = vmatprep.subr.bf16.mxu1 %v7205_v16  ;;  %v348_v14 = vrot.slane %v8881_v13, %v8467_v29  ;;  %v352_v15 = vrot.slane %v8881_v13, %v8475_v31  ;;  %v360_v16 = vrot.slane %v8881_v13, %v8478_v32 }
 0x13c   :  { %1974 = vmatpush1.bf16.msra.mxu0 %v7200_v17  ;;  %2056 = vmatpush1.bf16.msra.mxu1 %v7203_v18 }
 0x13d   :  { %1975 = vmatprep.subr.bf16.mxu0 %v7208_v19  ;;  %2057 = vmatprep.subr.bf16.mxu1 %v7211_v20 }
 0x140   :  { %1976 = vmatpush1.bf16.msra.mxu0 %v7206_v21  ;;  %2058 = vmatpush1.bf16.msra.mxu1 %v7209_v22 }
 0x141   :  { %1977 = vmatprep.subr.bf16.mxu0 %v7214_v24  ;;  %2059 = vmatprep.subr.bf16.mxu1 %v7217_v25 }
 0x144   :  { %1978 = vmatpush1.bf16.msra.mxu0 %v7212_v26  ;;  %2060 = vmatpush1.bf16.msra.mxu1 %v7215_v27 }
 0x145   :  { %1979 = vmatprep.subr.bf16.mxu0 %v7220_v28  ;;  %2061 = vmatprep.subr.bf16.mxu1 %v7223_v33 }
 0x148   :  { %1980 = vmatpush1.bf16.msra.mxu0 %v7218_v34  ;;  %2062 = vmatpush1.bf16.msra.mxu1 %v7221_v35  ;;  %v7278_v35 = vld [vmem:[%s10726_s5 + $0x200] ss:$16 sps:$4 sm:$0xff]  }
 0x149   :  { %1981 = vmatprep.subr.bf16.mxu0 %v7226_v36  ;;  %2063 = vmatprep.subr.bf16.mxu1 %v7229_v38  ;;  %v7281_v36 = vld [vmem:[%s10726_s5 + $0x208] ss:$16 sps:$4 sm:$0xff]  }
 0x14c   :  { %1982 = vmatpush1.bf16.msra.mxu0 %v7224_v39  ;;  %2064 = vmatpush1.bf16.msra.mxu1 %v7227_v40 }
 0x14d   :  { %1983 = vmatprep.subr.bf16.mxu0 %v7232_v41  ;;  %2065 = vmatprep.subr.bf16.mxu1 %v7235_v42  ;;  %v7286_v41 = vld [vmem:[%s10726_s5 + $0x224] ss:$16 sps:$4 sm:$0xff]   ;;  %v7289_v42 = vld [vmem:[%s10726_s5 + $0x22c] ss:$16 sps:$4 sm:$0xff]  }
 0x150   :  { %1984 = vmatpush1.bf16.msra.mxu0 %v7230_v43  ;;  %2066 = vmatpush1.bf16.msra.mxu1 %v7233_v44  ;;  %v7284_v44 = vld [vmem:[%s10726_s5 + $0x220] ss:$16 sps:$4 sm:$0xff]  }
 0x151   :  { %1985 = vmatprep.subr.bf16.mxu0 %v7238_v45  ;;  %2067 = vmatprep.subr.bf16.mxu1 %v7241_v46  ;;  %v7287_v45 = vld [vmem:[%s10726_s5 + $0x228] ss:$16 sps:$4 sm:$0xff]   ;;  %v7292_v46 = vld [vmem:[%s10726_s5 + $0x244] ss:$16 sps:$4 sm:$0xff]  }
 0x154   :  { %1986 = vmatpush1.bf16.msra.mxu0 %v7236_v47  ;;  %2068 = vmatpush1.bf16.msra.mxu1 %v7239_v48  ;;  %v7295_v47 = vld [vmem:[%s10726_s5 + $0x24c] ss:$16 sps:$4 sm:$0xff]   ;;  %v7290_v48 = vld [vmem:[%s10726_s5 + $0x240] ss:$16 sps:$4 sm:$0xff]  }
 0x155   :  { %1987 = vmatprep.subr.bf16.mxu0 %v7244_v50  ;;  %2069 = vmatprep.subr.bf16.mxu1 %v7247_v51  ;;  %v7293_v50 = vld [vmem:[%s10726_s5 + $0x248] ss:$16 sps:$4 sm:$0xff]   ;;  %v7298_v51 = vld [vmem:[%s10726_s5 + $0x264] ss:$16 sps:$4 sm:$0xff]  }
 0x158   :  { %1988 = vmatpush1.bf16.msra.mxu0 %v7242_v52  ;;  %2070 = vmatpush1.bf16.msra.mxu1 %v7245_v53  ;;  %v7301_v52 = vld [vmem:[%s10726_s5 + $0x26c] ss:$16 sps:$4 sm:$0xff]   ;;  %v7296_v53 = vld [vmem:[%s10726_s5 + $0x260] ss:$16 sps:$4 sm:$0xff]  }
 0x159   :  { %1989 = vmatprep.subr.bf16.mxu0 %v7250_v4  ;;  %2071 = vmatprep.subr.bf16.mxu1 %v7253_v54  ;;  %v7299_v4 = vld [vmem:[%s10726_s5 + $0x268] ss:$16 sps:$4 sm:$0xff]   ;;  %v7304_v54 = vld [vmem:[%s10726_s5 + $0x284] ss:$16 sps:$4 sm:$0xff]  }
 0x15c   :  { %1990 = vmatpush1.bf16.msra.mxu0 %v7248_v55  ;;  %2072 = vmatpush1.bf16.msra.mxu1 %v7251_v56  ;;  %v7307_v55 = vld [vmem:[%s10726_s5 + $0x28c] ss:$16 sps:$4 sm:$0xff]   ;;  %v7302_v56 = vld [vmem:[%s10726_s5 + $0x280] ss:$16 sps:$4 sm:$0xff]  }
 0x15d   :  { %1991 = vmatprep.subr.bf16.mxu0 %v7256_v30  ;;  %2073 = vmatprep.subr.bf16.mxu1 %v7259_v57  ;;  %v7305_v30 = vld [vmem:[%s10726_s5 + $0x288] ss:$16 sps:$4 sm:$0xff]   ;;  %v7310_v57 = vld [vmem:[%s10726_s5 + $0x2a4] ss:$16 sps:$4 sm:$0xff]  }
 0x160   :  { %1992 = vmatpush1.bf16.msra.mxu0 %v7254_v58  ;;  %2074 = vmatpush1.bf16.msra.mxu1 %v7257_v59  ;;  %v7313_v58 = vld [vmem:[%s10726_s5 + $0x2ac] ss:$16 sps:$4 sm:$0xff]   ;;  %v7308_v59 = vld [vmem:[%s10726_s5 + $0x2a0] ss:$16 sps:$4 sm:$0xff]  }
 0x161   :  { %1993 = vmatprep.subr.bf16.mxu0 %v7262_v60  ;;  %2075 = vmatprep.subr.bf16.mxu1 %v7265_v37  ;;  %v7311_v60 = vld [vmem:[%s10726_s5 + $0x2a8] ss:$16 sps:$4 sm:$0xff]   ;;  %v7316_v37 = vld [vmem:[%s10726_s5 + $0x2c4] ss:$16 sps:$4 sm:$0xff]  }
 0x164   :  { %1994 = vmatpush1.bf16.msra.mxu0 %v7260_v61  ;;  %2076 = vmatpush1.bf16.msra.mxu1 %v7263_v62  ;;  %v7319_v61 = vld [vmem:[%s10726_s5 + $0x2cc] ss:$16 sps:$4 sm:$0xff]   ;;  %v7314_v62 = vld [vmem:[%s10726_s5 + $0x2c0] ss:$16 sps:$4 sm:$0xff]  }
 0x165   :  { %1995 = vmatprep.subr.bf16.mxu0 %v7268_v63  ;;  %2077 = vmatprep.subr.bf16.mxu1 %v7271_v0  ;;  %v7317_v63 = vld [vmem:[%s10726_s5 + $0x2c8] ss:$16 sps:$4 sm:$0xff]   ;;  %v7322_v0 = vld [vmem:[%s10726_s5 + $0x2e4] ss:$16 sps:$4 sm:$0xff]  }
 0x168   :  { %1996 = vmatpush1.bf16.msra.mxu0 %v7266_v1  ;;  %2078 = vmatpush1.bf16.msra.mxu1 %v7269_v2  ;;  %v7325_v1 = vld [vmem:[%s10726_s5 + $0x2ec] ss:$16 sps:$4 sm:$0xff]   ;;  %v7320_v2 = vld [vmem:[%s10726_s5 + $0x2e0] ss:$16 sps:$4 sm:$0xff]  }
 0x169   :  { %1997 = vmatprep.subr.bf16.mxu0 %v7274_v3  ;;  %2079 = vmatprep.subr.bf16.mxu1 %v7277_v6  ;;  %v7323_v3 = vld [vmem:[%s10726_s5 + $0x2e8] ss:$16 sps:$4 sm:$0xff]   ;;  %v7328_v6 = vld [vmem:[%s10726_s5 + $0x304] ss:$16 sps:$4 sm:$0xff]  }
 0x16c   :  { %1998 = vmatpush1.bf16.msra.mxu0 %v7272_v7  ;;  %2080 = vmatpush1.bf16.msra.mxu1 %v7275_v8  ;;  %v7331_v7 = vld [vmem:[%s10726_s5 + $0x30c] ss:$16 sps:$4 sm:$0xff]   ;;  %v7326_v8 = vld [vmem:[%s10726_s5 + $0x300] ss:$16 sps:$4 sm:$0xff]  }
 0x16d   :  { %2008 = vmatprep.subr.bf16.mxu0 %v7280_v9  ;;  %2090 = vmatprep.subr.bf16.mxu1 %v7283_v11  ;;  %v7329_v9 = vld [vmem:[%s10726_s5 + $0x308] ss:$16 sps:$4 sm:$0xff]   ;;  %v7334_v11 = vld [vmem:[%s10726_s5 + $0x324] ss:$16 sps:$4 sm:$0xff]  }
 0x202   :  { %v1080_v17 = vpop.f32.mrb[4].mxu0  ;;  %v8889_v18 = vpop.f32.mrb[4].mxu1 }
 0x203   :  { %v6926_v19 = vadd.f32 %v1080_v17, %v348_v14  ;;  %v1082_v20 = vpop.f32.mrb[5].mxu0  ;;  %v1164_v21 = vpop.f32.mrb[5].mxu1  ;;  %v7337_v14 = vld [vmem:[%s10726_s5 + $0x32c] ss:$16 sps:$4 sm:$0xff]   ;;  %v7340_v17 = vld [vmem:[%s10726_s5 + $0x344] ss:$16 sps:$4 sm:$0xff]  }
 0x204   :  { %v6927_v22 = vadd.f32 %v1082_v20, %v352_v15  ;;  %v6929_v24 = vadd.f32 %v1164_v21, %v360_v16  ;;  %v1084_v25 = vpop.f32.mrb[6].mxu0  ;;  %v1166_v26 = vpop.f32.mrb[6].mxu1  ;;  %v7332_v15 = vld [vmem:[%s10726_s5 + $0x320] ss:$16 sps:$4 sm:$0xff]   ;;  %v7335_v16 = vld [vmem:[%s10726_s5 + $0x328] ss:$16 sps:$4 sm:$0xff]  }
 0x205   :  { %v1169_v27 = vmax.f32 %v6926_v19, 0.0  ;;  %v1085_v28 = vpop.f32.mrb[7].mxu0  ;;  %v1167_v33 = vpop.f32.mrb[7].mxu1  ;;  %v7343_v19 = vld [vmem:[%s10726_s5 + $0x34c] ss:$16 sps:$4 sm:$0xff]  }
 0x206   :  { %v1170_v34 = vmax.f32 %v6927_v22, 0.0  ;;  %v1172_v38 = vmax.f32 %v6929_v24, 0.0  ;;  %v7338_v20 = vld [vmem:[%s10726_s5 + $0x340] ss:$16 sps:$4 sm:$0xff]   ;;  %v7341_v21 = vld [vmem:[%s10726_s5 + $0x348] ss:$16 sps:$4 sm:$0xff]  }
 0x207   :  { %v1173_v40 = vpack.c.bf16 %v1169_v27, %v1169_v27  ;;  %v7346_v22 = vld [vmem:[%s10726_s5 + $0x364] ss:$16 sps:$4 sm:$0xff]   ;;  %v7349_v24 = vld [vmem:[%s10726_s5 + $0x36c] ss:$16 sps:$4 sm:$0xff]   ;;  %v7344_v25 = vld [vmem:[%s10726_s5 + $0x360] ss:$16 sps:$4 sm:$0xff]  }
 0x208   :  { %v1174_v39 = vpack.c.bf16 %v1170_v34, %v1170_v34  ;;  %v1176_v43 = vpack.c.bf16 %v1172_v38, %v1172_v38  ;;  %v7347_v26 = vld [vmem:[%s10726_s5 + $0x368] ss:$16 sps:$4 sm:$0xff]   ;;  %v7352_v27 = vld [vmem:[%s10726_s5 + $0x384] ss:$16 sps:$4 sm:$0xff]   ;;  %v7355_v28 = vld [vmem:[%s10726_s5 + $0x38c] ss:$16 sps:$4 sm:$0xff]  }
 0x209   :  { %v7350_v33 = vld [vmem:[%s10726_s5 + $0x380] ss:$16 sps:$4 sm:$0xff]   ;;  %v7353_v34 = vld [vmem:[%s10726_s5 + $0x388] ss:$16 sps:$4 sm:$0xff]  }
 0x20a   :  { %1999 = vmatprep.mubr.bf16.mxu0 %v1174_v39  ;;  %2081 = vmatprep.mubr.bf16.mxu1 %v1174_v39  ;;  %v7356_v38 = vld [vmem:[%s10726_s5 + $0x3a0] ss:$16 sps:$4 sm:$0xff]   ;;  %v7359_v39 = vld [vmem:[%s10726_s5 + $0x3a8] ss:$16 sps:$4 sm:$0xff]  }
 0x20b   :  { %2000 = vmatmul.mubr.bf16.vlgmr.msra.gmra.mrb[8].mxu0 %v1173_v40  ;;  %2082 = vmatmul.mubr.bf16.vlgmr.msra.gmra.mrb[8].mxu1 %v1173_v40  ;;  %v356_v40 = vrot.slane %v8881_v13, %v8639_v49  ;;  %v7365_v13 = vld [vmem:[%s10726_s5 + $0x3c8] ss:$16 sps:$4 sm:$0xff]  }
 0x20c   :  { %2009 = vmatpush1.bf16.msra.mxu0 %v7278_v35  ;;  %2091 = vmatpush1.bf16.msra.mxu1 %v7281_v36  ;;  %v7358_v35 = vld [vmem:[%s10726_s5 + $0x3a4] ss:$16 sps:$4 sm:$0xff]   ;;  %v7361_v36 = vld [vmem:[%s10726_s5 + $0x3ac] ss:$16 sps:$4 sm:$0xff]  }
 0x20d   :  { %2040 = vmatprep.mubr.bf16.mxu0 %v1176_v43  ;;  %2122 = vmatprep.mubr.bf16.mxu1 %v1176_v43  ;;  %v7362_v43 = vld [vmem:[%s10726_s5 + $0x3c0] ss:$16 sps:$4 sm:$0xff]  }
 0x20e   :  { %2010 = vmatprep.subr.bf16.mxu0 %v7286_v41  ;;  %2092 = vmatprep.subr.bf16.mxu1 %v7289_v42  ;;  %v7364_v41 = vld [vmem:[%s10726_s5 + $0x3c4] ss:$16 sps:$4 sm:$0xff]   ;;  %v7367_v42 = vld [vmem:[%s10726_s5 + $0x3cc] ss:$16 sps:$4 sm:$0xff]  }
 0x210   :  { %2011 = vmatpush1.bf16.msra.mxu0 %v7284_v44  ;;  %2093 = vmatpush1.bf16.msra.mxu1 %v7287_v45  ;;  %v6928_v44 = vadd.f32 %v8889_v18, %v356_v40  ;;  %v7370_v45 = vld [vmem:[%s10726_s5 + $0x3e4] ss:$16 sps:$4 sm:$0xff]   ;;  %v7371_v18 = vld [vmem:[%s10726_s5 + $0x3e8] ss:$16 sps:$4 sm:$0xff]  }
 0x211   :  { %2012 = vmatprep.subr.bf16.mxu0 %v7292_v46  ;;  %2094 = vmatprep.subr.bf16.mxu1 %v7295_v47  ;;  %v7373_v46 = vld [vmem:[%s10726_s5 + $0x3ec] ss:$16 sps:$4 sm:$0xff]   ;;  %v7368_v47 = vld [vmem:[%s10726_s5 + $0x3e0] ss:$16 sps:$4 sm:$0xff]   ;;  %v7442_v40 = vld [vmem:[%s10728_s7 + $0x164] ss:$16 sps:$4 sm:$0xff]  }
 0x214   :  { %2013 = vmatpush1.bf16.msra.mxu0 %v7290_v48  ;;  %2095 = vmatpush1.bf16.msra.mxu1 %v7293_v50  ;;  %v1171_v48 = vmax.f32 %v6928_v44, 0.0  ;;  %v7376_v50 = vld [vmem:[%s10728_s7 + $0x4] ss:$16 sps:$4 sm:$0xff]   ;;  %v7451_v44 = vld [vmem:[%s10728_s7 + $0x18c] ss:$16 sps:$4 sm:$0xff]  }
 0x215   :  { %2014 = vmatprep.subr.bf16.mxu0 %v7298_v51  ;;  %2096 = vmatprep.subr.bf16.mxu1 %v7301_v52  ;;  %v7379_v51 = vld [vmem:[%s10728_s7 + $0xc] ss:$16 sps:$4 sm:$0xff]   ;;  %v7374_v52 = vld [vmem:[%s10728_s7] ss:$16 sps:$4 sm:$0xff]  }
 0x218   :  { %2015 = vmatpush1.bf16.msra.mxu0 %v7296_v53  ;;  %2097 = vmatpush1.bf16.msra.mxu1 %v7299_v4  ;;  %v7377_v53 = vld [vmem:[%s10728_s7 + $0x8] ss:$16 sps:$4 sm:$0xff]   ;;  %v1175_v4 = vpack.c.bf16 %v1171_v48, %v1171_v48  ;;  %v7452_v48 = vld [vmem:[%s10728_s7 + $0x1a0] ss:$16 sps:$4 sm:$0xff]  }
 0x219   :  { %2016 = vmatprep.subr.bf16.mxu0 %v7304_v54  ;;  %2098 = vmatprep.subr.bf16.mxu1 %v7307_v55  ;;  %v7382_v54 = vld [vmem:[%s10728_s7 + $0x24] ss:$16 sps:$4 sm:$0xff]   ;;  %v7385_v55 = vld [vmem:[%s10728_s7 + $0x2c] ss:$16 sps:$4 sm:$0xff]  }
 0x21c   :  { %2017 = vmatpush1.bf16.msra.mxu0 %v7302_v56  ;;  %2099 = vmatpush1.bf16.msra.mxu1 %v7305_v30  ;;  %v7380_v56 = vld [vmem:[%s10728_s7 + $0x20] ss:$16 sps:$4 sm:$0xff]   ;;  %v7383_v30 = vld [vmem:[%s10728_s7 + $0x28] ss:$16 sps:$4 sm:$0xff]  }
 0x21d   :  { %2018 = vmatprep.subr.bf16.mxu0 %v7310_v57  ;;  %2100 = vmatprep.subr.bf16.mxu1 %v7313_v58  ;;  %v7388_v57 = vld [vmem:[%s10728_s7 + $0x44] ss:$16 sps:$4 sm:$0xff]   ;;  %v7391_v58 = vld [vmem:[%s10728_s7 + $0x4c] ss:$16 sps:$4 sm:$0xff]  }
 0x220   :  { %2019 = vmatpush1.bf16.msra.mxu0 %v7308_v59  ;;  %2101 = vmatpush1.bf16.msra.mxu1 %v7311_v60  ;;  %v7386_v59 = vld [vmem:[%s10728_s7 + $0x40] ss:$16 sps:$4 sm:$0xff]   ;;  %v7389_v60 = vld [vmem:[%s10728_s7 + $0x48] ss:$16 sps:$4 sm:$0xff]  }
 0x221   :  { %2020 = vmatprep.subr.bf16.mxu0 %v7316_v37  ;;  %2102 = vmatprep.subr.bf16.mxu1 %v7319_v61  ;;  %v7394_v37 = vld [vmem:[%s10728_s7 + $0x64] ss:$16 sps:$4 sm:$0xff]   ;;  %v7397_v61 = vld [vmem:[%s10728_s7 + $0x6c] ss:$16 sps:$4 sm:$0xff]  }
 0x224   :  { %2021 = vmatpush1.bf16.msra.mxu0 %v7314_v62  ;;  %2103 = vmatpush1.bf16.msra.mxu1 %v7317_v63  ;;  %v7392_v62 = vld [vmem:[%s10728_s7 + $0x60] ss:$16 sps:$4 sm:$0xff]   ;;  %v7395_v63 = vld [vmem:[%s10728_s7 + $0x68] ss:$16 sps:$4 sm:$0xff]  }
 0x225   :  { %2022 = vmatprep.subr.bf16.mxu0 %v7322_v0  ;;  %2104 = vmatprep.subr.bf16.mxu1 %v7325_v1  ;;  %v7400_v0 = vld [vmem:[%s10728_s7 + $0x84] ss:$16 sps:$4 sm:$0xff]   ;;  %v7403_v1 = vld [vmem:[%s10728_s7 + $0x8c] ss:$16 sps:$4 sm:$0xff]  }
 0x228   :  { %2023 = vmatpush1.bf16.msra.mxu0 %v7320_v2  ;;  %2105 = vmatpush1.bf16.msra.mxu1 %v7323_v3  ;;  %v7398_v2 = vld [vmem:[%s10728_s7 + $0x80] ss:$16 sps:$4 sm:$0xff]   ;;  %v7401_v3 = vld [vmem:[%s10728_s7 + $0x88] ss:$16 sps:$4 sm:$0xff]  }
 0x229   :  { %2024 = vmatprep.subr.bf16.mxu0 %v7328_v6  ;;  %2106 = vmatprep.subr.bf16.mxu1 %v7331_v7  ;;  %v7406_v6 = vld [vmem:[%s10728_s7 + $0xa4] ss:$16 sps:$4 sm:$0xff]   ;;  %v7409_v7 = vld [vmem:[%s10728_s7 + $0xac] ss:$16 sps:$4 sm:$0xff]  }
 0x22c   :  { %2025 = vmatpush1.bf16.msra.mxu0 %v7326_v8  ;;  %2107 = vmatpush1.bf16.msra.mxu1 %v7329_v9  ;;  %v7404_v8 = vld [vmem:[%s10728_s7 + $0xa0] ss:$16 sps:$4 sm:$0xff]   ;;  %v7407_v9 = vld [vmem:[%s10728_s7 + $0xa8] ss:$16 sps:$4 sm:$0xff]  }
 0x22d   :  { %2026 = vmatprep.subr.bf16.mxu0 %v7334_v11  ;;  %2108 = vmatprep.subr.bf16.mxu1 %v7337_v14  ;;  %v7412_v11 = vld [vmem:[%s10728_s7 + $0xc4] ss:$16 sps:$4 sm:$0xff]   ;;  %v7415_v14 = vld [vmem:[%s10728_s7 + $0xcc] ss:$16 sps:$4 sm:$0xff]  }
 0x230   :  { %2027 = vmatpush1.bf16.msra.mxu0 %v7332_v15  ;;  %2109 = vmatpush1.bf16.msra.mxu1 %v7335_v16  ;;  %v7410_v15 = vld [vmem:[%s10728_s7 + $0xc0] ss:$16 sps:$4 sm:$0xff]   ;;  %v7413_v16 = vld [vmem:[%s10728_s7 + $0xc8] ss:$16 sps:$4 sm:$0xff]  }
 0x231   :  { %2028 = vmatprep.subr.bf16.mxu0 %v7340_v17  ;;  %2110 = vmatprep.subr.bf16.mxu1 %v7343_v19  ;;  %v7418_v17 = vld [vmem:[%s10728_s7 + $0xe4] ss:$16 sps:$4 sm:$0xff]   ;;  %v7421_v19 = vld [vmem:[%s10728_s7 + $0xec] ss:$16 sps:$4 sm:$0xff]  }
 0x234   :  { %2029 = vmatpush1.bf16.msra.mxu0 %v7338_v20  ;;  %2111 = vmatpush1.bf16.msra.mxu1 %v7341_v21  ;;  %v7416_v20 = vld [vmem:[%s10728_s7 + $0xe0] ss:$16 sps:$4 sm:$0xff]   ;;  %v7419_v21 = vld [vmem:[%s10728_s7 + $0xe8] ss:$16 sps:$4 sm:$0xff]  }
 0x235   :  { %2030 = vmatprep.subr.bf16.mxu0 %v7346_v22  ;;  %2112 = vmatprep.subr.bf16.mxu1 %v7349_v24  ;;  %v7424_v22 = vld [vmem:[%s10728_s7 + $0x104] ss:$16 sps:$4 sm:$0xff]   ;;  %v7427_v24 = vld [vmem:[%s10728_s7 + $0x10c] ss:$16 sps:$4 sm:$0xff]  }
 0x238   :  { %2031 = vmatpush1.bf16.msra.mxu0 %v7344_v25  ;;  %2113 = vmatpush1.bf16.msra.mxu1 %v7347_v26  ;;  %v7422_v25 = vld [vmem:[%s10728_s7 + $0x100] ss:$16 sps:$4 sm:$0xff]   ;;  %v7425_v26 = vld [vmem:[%s10728_s7 + $0x108] ss:$16 sps:$4 sm:$0xff]  }
 0x239   :  { %2032 = vmatprep.subr.bf16.mxu0 %v7352_v27  ;;  %2114 = vmatprep.subr.bf16.mxu1 %v7355_v28  ;;  %v7430_v27 = vld [vmem:[%s10728_s7 + $0x124] ss:$16 sps:$4 sm:$0xff]   ;;  %v7433_v28 = vld [vmem:[%s10728_s7 + $0x12c] ss:$16 sps:$4 sm:$0xff]  }
 0x23c   :  { %2033 = vmatpush1.bf16.msra.mxu0 %v7350_v33  ;;  %2115 = vmatpush1.bf16.msra.mxu1 %v7353_v34  ;;  %v7428_v33 = vld [vmem:[%s10728_s7 + $0x120] ss:$16 sps:$4 sm:$0xff]   ;;  %v7431_v34 = vld [vmem:[%s10728_s7 + $0x128] ss:$16 sps:$4 sm:$0xff]  }
 0x23d   :  { %2034 = vmatprep.subr.bf16.mxu0 %v7358_v35  ;;  %2116 = vmatprep.subr.bf16.mxu1 %v7361_v36  ;;  %v7436_v35 = vld [vmem:[%s10728_s7 + $0x144] ss:$16 sps:$4 sm:$0xff]   ;;  %v7439_v36 = vld [vmem:[%s10728_s7 + $0x14c] ss:$16 sps:$4 sm:$0xff]  }
 0x240   :  { %2035 = vmatpush1.bf16.msra.mxu0 %v7356_v38  ;;  %2117 = vmatpush1.bf16.msra.mxu1 %v7359_v39  ;;  %v7434_v38 = vld [vmem:[%s10728_s7 + $0x140] ss:$16 sps:$4 sm:$0xff]   ;;  %v7437_v39 = vld [vmem:[%s10728_s7 + $0x148] ss:$16 sps:$4 sm:$0xff]  }
 0x241   :  { %2036 = vmatprep.subr.bf16.mxu0 %v7364_v41  ;;  %2118 = vmatprep.subr.bf16.mxu1 %v7367_v42  ;;  %v7445_v41 = vld [vmem:[%s10728_s7 + $0x16c] ss:$16 sps:$4 sm:$0xff]   ;;  %v7440_v42 = vld [vmem:[%s10728_s7 + $0x160] ss:$16 sps:$4 sm:$0xff]  }
 0x244   :  { %2037 = vmatpush1.bf16.msra.mxu0 %v7362_v43  ;;  %2119 = vmatpush1.bf16.msra.mxu1 %v7365_v13  ;;  %v7443_v43 = vld [vmem:[%s10728_s7 + $0x168] ss:$16 sps:$4 sm:$0xff]   ;;  %v7448_v13 = vld [vmem:[%s10728_s7 + $0x184] ss:$16 sps:$4 sm:$0xff]  }
 0x245   :  { %2038 = vmatprep.subr.bf16.mxu0 %v7370_v45  ;;  %2120 = vmatprep.subr.bf16.mxu1 %v7373_v46  ;;  %v7446_v45 = vld [vmem:[%s10728_s7 + $0x180] ss:$16 sps:$4 sm:$0xff]   ;;  %v7449_v46 = vld [vmem:[%s10728_s7 + $0x188] ss:$16 sps:$4 sm:$0xff]  }
 0x248   :  { %2039 = vmatpush1.bf16.msra.mxu0 %v7368_v47  ;;  %2121 = vmatpush1.bf16.msra.mxu1 %v7371_v18  ;;  %v7454_v47 = vld [vmem:[%s10728_s7 + $0x1a4] ss:$16 sps:$4 sm:$0xff]   ;;  %v7457_v18 = vld [vmem:[%s10728_s7 + $0x1ac] ss:$16 sps:$4 sm:$0xff]  }
 0x249   :  { %2929 = vmatprep.subr.bf16.mxu0 %v7376_v50  ;;  %3011 = vmatprep.subr.bf16.mxu1 %v7379_v51  ;;  %v7455_v50 = vld [vmem:[%s10728_s7 + $0x1a8] ss:$16 sps:$4 sm:$0xff]   ;;  %v7460_v51 = vld [vmem:[%s10728_s7 + $0x1c4] ss:$16 sps:$4 sm:$0xff]  }
 0x24b   :  { %2041 = vmatmul.mubr.bf16.vlgmr.msra.gmra.mrb[8].mxu0 %v1175_v4  ;;  %2123 = vmatmul.mubr.bf16.vlgmr.msra.gmra.mrb[8].mxu1 %v1175_v4  ;;  %v7461_v4 = vld [vmem:[%s10728_s7 + $0x1c8] ss:$16 sps:$4 sm:$0xff]  }
 0x24c   :  { %2930 = vmatpush1.bf16.msra.mxu0 %v7374_v52  ;;  %3012 = vmatpush1.bf16.msra.mxu1 %v7377_v53  ;;  %v7463_v52 = vld [vmem:[%s10728_s7 + $0x1cc] ss:$16 sps:$4 sm:$0xff]   ;;  %v7458_v53 = vld [vmem:[%s10728_s7 + $0x1c0] ss:$16 sps:$4 sm:$0xff]  }
 0x24d   :  { %2931 = vmatprep.subr.bf16.mxu0 %v7382_v54  ;;  %3013 = vmatprep.subr.bf16.mxu1 %v7385_v55  ;;  %v7466_v54 = vld [vmem:[%s10728_s7 + $0x1e4] ss:$16 sps:$4 sm:$0xff]   ;;  %v7469_v55 = vld [vmem:[%s10728_s7 + $0x1ec] ss:$16 sps:$4 sm:$0xff]  }
 0x250   :  { %2932 = vmatpush1.bf16.msra.mxu0 %v7380_v56  ;;  %3014 = vmatpush1.bf16.msra.mxu1 %v7383_v30  ;;  %v7464_v56 = vld [vmem:[%s10728_s7 + $0x1e0] ss:$16 sps:$4 sm:$0xff]   ;;  %v7467_v30 = vld [vmem:[%s10728_s7 + $0x1e8] ss:$16 sps:$4 sm:$0xff]  }
 0x251   :  { %2933 = vmatprep.subr.bf16.mxu0 %v7388_v57  ;;  %3015 = vmatprep.subr.bf16.mxu1 %v7391_v58  ;;  %v7472_v57 = vld [vmem:[%s10728_s7 + $0x204] ss:$16 sps:$4 sm:$0xff]   ;;  %v7475_v58 = vld [vmem:[%s10728_s7 + $0x20c] ss:$16 sps:$4 sm:$0xff]  }
 0x254   :  { %2934 = vmatpush1.bf16.msra.mxu0 %v7386_v59  ;;  %3016 = vmatpush1.bf16.msra.mxu1 %v7389_v60  ;;  %v9281_v59 = vld [vmem:[%s10731_s6] sm:$0xf] }
 0x255   :  { %2935 = vmatprep.subr.bf16.mxu0 %v7394_v37  ;;  %3017 = vmatprep.subr.bf16.mxu1 %v7397_v61  ;;  %v1310_v60 = vrot.slane %v9281_v59, %v8467_v29  ;;  %v1314_v37 = vrot.slane %v9281_v59, %v8475_v31  ;;  %v1322_v61 = vrot.slane %v9281_v59, %v8478_v32 }
 0x258   :  { %2936 = vmatpush1.bf16.msra.mxu0 %v7392_v62  ;;  %3018 = vmatpush1.bf16.msra.mxu1 %v7395_v63 }
 0x259   :  { %2937 = vmatprep.subr.bf16.mxu0 %v7400_v0  ;;  %3019 = vmatprep.subr.bf16.mxu1 %v7403_v1 }
 0x25c   :  { %2938 = vmatpush1.bf16.msra.mxu0 %v7398_v2  ;;  %3020 = vmatpush1.bf16.msra.mxu1 %v7401_v3 }
 0x25d   :  { %2939 = vmatprep.subr.bf16.mxu0 %v7406_v6  ;;  %3021 = vmatprep.subr.bf16.mxu1 %v7409_v7 }
 0x260   :  { %2940 = vmatpush1.bf16.msra.mxu0 %v7404_v8  ;;  %3022 = vmatpush1.bf16.msra.mxu1 %v7407_v9 }
 0x261   :  { %2941 = vmatprep.subr.bf16.mxu0 %v7412_v11  ;;  %3023 = vmatprep.subr.bf16.mxu1 %v7415_v14 }
 0x264   :  { %2942 = vmatpush1.bf16.msra.mxu0 %v7410_v15  ;;  %3024 = vmatpush1.bf16.msra.mxu1 %v7413_v16  ;;  %v7470_v16 = vld [vmem:[%s10728_s7 + $0x200] ss:$16 sps:$4 sm:$0xff]  }
 0x265   :  { %2943 = vmatprep.subr.bf16.mxu0 %v7418_v17  ;;  %3025 = vmatprep.subr.bf16.mxu1 %v7421_v19  ;;  %v7473_v17 = vld [vmem:[%s10728_s7 + $0x208] ss:$16 sps:$4 sm:$0xff]  }
 0x268   :  { %2944 = vmatpush1.bf16.msra.mxu0 %v7416_v20  ;;  %3026 = vmatpush1.bf16.msra.mxu1 %v7419_v21  ;;  %v7478_v21 = vld [vmem:[%s10728_s7 + $0x224] ss:$16 sps:$4 sm:$0xff]  }
 0x269   :  { %2945 = vmatprep.subr.bf16.mxu0 %v7424_v22  ;;  %3027 = vmatprep.subr.bf16.mxu1 %v7427_v24  ;;  %v7481_v24 = vld [vmem:[%s10728_s7 + $0x22c] ss:$16 sps:$4 sm:$0xff]  }
 0x26c   :  { %2946 = vmatpush1.bf16.msra.mxu0 %v7422_v25  ;;  %3028 = vmatpush1.bf16.msra.mxu1 %v7425_v26  ;;  %v7476_v25 = vld [vmem:[%s10728_s7 + $0x220] ss:$16 sps:$4 sm:$0xff]   ;;  %v7479_v26 = vld [vmem:[%s10728_s7 + $0x228] ss:$16 sps:$4 sm:$0xff]  }
 0x26d   :  { %2947 = vmatprep.subr.bf16.mxu0 %v7430_v27  ;;  %3029 = vmatprep.subr.bf16.mxu1 %v7433_v28  ;;  %v7484_v28 = vld [vmem:[%s10728_s7 + $0x244] ss:$16 sps:$4 sm:$0xff]  }
 0x270   :  { %2948 = vmatpush1.bf16.msra.mxu0 %v7428_v33  ;;  %3030 = vmatpush1.bf16.msra.mxu1 %v7431_v34  ;;  %v7487_v33 = vld [vmem:[%s10728_s7 + $0x24c] ss:$16 sps:$4 sm:$0xff]   ;;  %v7482_v34 = vld [vmem:[%s10728_s7 + $0x240] ss:$16 sps:$4 sm:$0xff]  }
 0x271   :  { %2949 = vmatprep.subr.bf16.mxu0 %v7436_v35  ;;  %3031 = vmatprep.subr.bf16.mxu1 %v7439_v36  ;;  %v7485_v35 = vld [vmem:[%s10728_s7 + $0x248] ss:$16 sps:$4 sm:$0xff]   ;;  %v7490_v36 = vld [vmem:[%s10728_s7 + $0x264] ss:$16 sps:$4 sm:$0xff]  }
 0x274   :  { %2950 = vmatpush1.bf16.msra.mxu0 %v7434_v38  ;;  %3032 = vmatpush1.bf16.msra.mxu1 %v7437_v39  ;;  %v7493_v38 = vld [vmem:[%s10728_s7 + $0x26c] ss:$16 sps:$4 sm:$0xff]   ;;  %v7488_v39 = vld [vmem:[%s10728_s7 + $0x260] ss:$16 sps:$4 sm:$0xff]  }
 0x275   :  { %2951 = vmatprep.subr.bf16.mxu0 %v7442_v40  ;;  %3033 = vmatprep.subr.bf16.mxu1 %v7445_v41  ;;  %v7491_v40 = vld [vmem:[%s10728_s7 + $0x268] ss:$16 sps:$4 sm:$0xff]   ;;  %v7496_v41 = vld [vmem:[%s10728_s7 + $0x284] ss:$16 sps:$4 sm:$0xff]  }
 0x278   :  { %2952 = vmatpush1.bf16.msra.mxu0 %v7440_v42  ;;  %3034 = vmatpush1.bf16.msra.mxu1 %v7443_v43  ;;  %v7499_v42 = vld [vmem:[%s10728_s7 + $0x28c] ss:$16 sps:$4 sm:$0xff]   ;;  %v7494_v43 = vld [vmem:[%s10728_s7 + $0x280] ss:$16 sps:$4 sm:$0xff]  }
 0x279   :  { %2953 = vmatprep.subr.bf16.mxu0 %v7448_v13  ;;  %3035 = vmatprep.subr.bf16.mxu1 %v7451_v44  ;;  %v7497_v13 = vld [vmem:[%s10728_s7 + $0x288] ss:$16 sps:$4 sm:$0xff]   ;;  %v7502_v44 = vld [vmem:[%s10728_s7 + $0x2a4] ss:$16 sps:$4 sm:$0xff]  }
 0x27c   :  { %2954 = vmatpush1.bf16.msra.mxu0 %v7446_v45  ;;  %3036 = vmatpush1.bf16.msra.mxu1 %v7449_v46  ;;  %v7505_v45 = vld [vmem:[%s10728_s7 + $0x2ac] ss:$16 sps:$4 sm:$0xff]   ;;  %v7500_v46 = vld [vmem:[%s10728_s7 + $0x2a0] ss:$16 sps:$4 sm:$0xff]  }
 0x27d   :  { %2955 = vmatprep.subr.bf16.mxu0 %v7454_v47  ;;  %3037 = vmatprep.subr.bf16.mxu1 %v7457_v18  ;;  %v7503_v47 = vld [vmem:[%s10728_s7 + $0x2a8] ss:$16 sps:$4 sm:$0xff]   ;;  %v7508_v18 = vld [vmem:[%s10728_s7 + $0x2c4] ss:$16 sps:$4 sm:$0xff]  }
 0x280   :  { %2956 = vmatpush1.bf16.msra.mxu0 %v7452_v48  ;;  %3038 = vmatpush1.bf16.msra.mxu1 %v7455_v50  ;;  %v7511_v48 = vld [vmem:[%s10728_s7 + $0x2cc] ss:$16 sps:$4 sm:$0xff]   ;;  %v7506_v50 = vld [vmem:[%s10728_s7 + $0x2c0] ss:$16 sps:$4 sm:$0xff]  }
 0x281   :  { %2957 = vmatprep.subr.bf16.mxu0 %v7460_v51  ;;  %3039 = vmatprep.subr.bf16.mxu1 %v7463_v52  ;;  %v7509_v51 = vld [vmem:[%s10728_s7 + $0x2c8] ss:$16 sps:$4 sm:$0xff]   ;;  %v7514_v52 = vld [vmem:[%s10728_s7 + $0x2e4] ss:$16 sps:$4 sm:$0xff]  }
 0x284   :  { %2958 = vmatpush1.bf16.msra.mxu0 %v7458_v53  ;;  %3040 = vmatpush1.bf16.msra.mxu1 %v7461_v4  ;;  %v7517_v53 = vld [vmem:[%s10728_s7 + $0x2ec] ss:$16 sps:$4 sm:$0xff]   ;;  %v7512_v4 = vld [vmem:[%s10728_s7 + $0x2e0] ss:$16 sps:$4 sm:$0xff]  }
 0x285   :  { %2959 = vmatprep.subr.bf16.mxu0 %v7466_v54  ;;  %3041 = vmatprep.subr.bf16.mxu1 %v7469_v55  ;;  %v7515_v54 = vld [vmem:[%s10728_s7 + $0x2e8] ss:$16 sps:$4 sm:$0xff]   ;;  %v7520_v55 = vld [vmem:[%s10728_s7 + $0x304] ss:$16 sps:$4 sm:$0xff]  }
 0x288   :  { %2960 = vmatpush1.bf16.msra.mxu0 %v7464_v56  ;;  %3042 = vmatpush1.bf16.msra.mxu1 %v7467_v30  ;;  %v7523_v56 = vld [vmem:[%s10728_s7 + $0x30c] ss:$16 sps:$4 sm:$0xff]   ;;  %v7518_v30 = vld [vmem:[%s10728_s7 + $0x300] ss:$16 sps:$4 sm:$0xff]  }
 0x289   :  { %2970 = vmatprep.subr.bf16.mxu0 %v7472_v57  ;;  %3052 = vmatprep.subr.bf16.mxu1 %v7475_v58  ;;  %v7521_v57 = vld [vmem:[%s10728_s7 + $0x308] ss:$16 sps:$4 sm:$0xff]   ;;  %v7526_v58 = vld [vmem:[%s10728_s7 + $0x324] ss:$16 sps:$4 sm:$0xff]  }
 0x31e   :  { %v2042_v62 = vpop.f32.mrb[8].mxu0  ;;  %v9289_v63 = vpop.f32.mrb[8].mxu1 }
 0x31f   :  { %v6930_v0 = vadd.f32 %v2042_v62, %v1310_v60  ;;  %v2044_v1 = vpop.f32.mrb[9].mxu0  ;;  %v2126_v2 = vpop.f32.mrb[9].mxu1  ;;  %v7529_v60 = vld [vmem:[%s10728_s7 + $0x32c] ss:$16 sps:$4 sm:$0xff]   ;;  %v7532_v62 = vld [vmem:[%s10728_s7 + $0x344] ss:$16 sps:$4 sm:$0xff]  }
 0x320   :  { %v6931_v3 = vadd.f32 %v2044_v1, %v1314_v37  ;;  %v6933_v6 = vadd.f32 %v2126_v2, %v1322_v61  ;;  %v2046_v7 = vpop.f32.mrb[10].mxu0  ;;  %v2128_v8 = vpop.f32.mrb[10].mxu1  ;;  %v7524_v37 = vld [vmem:[%s10728_s7 + $0x320] ss:$16 sps:$4 sm:$0xff]   ;;  %v7527_v61 = vld [vmem:[%s10728_s7 + $0x328] ss:$16 sps:$4 sm:$0xff]  }
 0x321   :  { %v2131_v9 = vmax.f32 %v6930_v0, 0.0  ;;  %v2047_v11 = vpop.f32.mrb[11].mxu0  ;;  %v2129_v14 = vpop.f32.mrb[11].mxu1  ;;  %v7535_v0 = vld [vmem:[%s10728_s7 + $0x34c] ss:$16 sps:$4 sm:$0xff]  }
 0x322   :  { %v2132_v15 = vmax.f32 %v6931_v3, 0.0  ;;  %v2134_v19 = vmax.f32 %v6933_v6, 0.0  ;;  %v7530_v1 = vld [vmem:[%s10728_s7 + $0x340] ss:$16 sps:$4 sm:$0xff]   ;;  %v7533_v2 = vld [vmem:[%s10728_s7 + $0x348] ss:$16 sps:$4 sm:$0xff]  }
 0x323   :  { %v2135_v22 = vpack.c.bf16 %v2131_v9, %v2131_v9  ;;  %v7538_v3 = vld [vmem:[%s10728_s7 + $0x364] ss:$16 sps:$4 sm:$0xff]   ;;  %v7541_v6 = vld [vmem:[%s10728_s7 + $0x36c] ss:$16 sps:$4 sm:$0xff]   ;;  %v7536_v7 = vld [vmem:[%s10728_s7 + $0x360] ss:$16 sps:$4 sm:$0xff]  }
 0x324   :  { %v2136_v20 = vpack.c.bf16 %v2132_v15, %v2132_v15  ;;  %v2138_v27 = vpack.c.bf16 %v2134_v19, %v2134_v19  ;;  %v7539_v8 = vld [vmem:[%s10728_s7 + $0x368] ss:$16 sps:$4 sm:$0xff]   ;;  %v7544_v9 = vld [vmem:[%s10728_s7 + $0x384] ss:$16 sps:$4 sm:$0xff]   ;;  %v7547_v11 = vld [vmem:[%s10728_s7 + $0x38c] ss:$16 sps:$4 sm:$0xff]  }
 0x325   :  { %v3229_v14 = vld [vmem:[%s10732_s10] sm:$0xff]  ;;  %v7553_v19 = vld [vmem:[%s10728_s7 + $0x3ac] ss:$16 sps:$4 sm:$0xff]  }
 0x326   :  { %2961 = vmatprep.mubr.bf16.mxu0 %v2136_v20  ;;  %3043 = vmatprep.mubr.bf16.mxu1 %v2136_v20  ;;  %v7542_v15 = vld [vmem:[%s10728_s7 + $0x380] ss:$16 sps:$4 sm:$0xff]   ;;  %v3231_v20 = vcombine.high %v3229_v14, %v3229_v14 }
 0x327   :  { %2962 = vmatmul.mubr.bf16.vlgmr.msra.gmra.mrb[12].mxu0 %v2135_v22  ;;  %3044 = vmatmul.mubr.bf16.vlgmr.msra.gmra.mrb[12].mxu1 %v2135_v22  ;;  %v7551_v22 = vld [vmem:[%s10728_s7 + $0x3a8] ss:$16 sps:$4 sm:$0xff]  }
 0x328   :  { %2971 = vmatpush1.bf16.msra.mxu0 %v7470_v16  ;;  %3053 = vmatpush1.bf16.msra.mxu1 %v7473_v17  ;;  %v7545_v16 = vld [vmem:[%s10728_s7 + $0x388] ss:$16 sps:$4 sm:$0xff]   ;;  %v7550_v17 = vld [vmem:[%s10728_s7 + $0x3a4] ss:$16 sps:$4 sm:$0xff]  }
 0x329   :  { %3002 = vmatprep.mubr.bf16.mxu0 %v2138_v27  ;;  %3084 = vmatprep.mubr.bf16.mxu1 %v2138_v27  ;;  %v3238_v27 = vrot.slane %v3229_v14, %v8249_v10  ;;  %v7617_v14 = vld [vmem:[%s10730_s9 + $0x104] ss:$16 sps:$4 sm:$0xff]  }
 0x32a   :  { %2972 = vmatprep.subr.bf16.mxu0 %v7478_v21  ;;  %3054 = vmatprep.subr.bf16.mxu1 %v7481_v24  ;;  %v7548_v21 = vld [vmem:[%s10728_s7 + $0x3a0] ss:$16 sps:$4 sm:$0xff]   ;;  %v1318_v24 = vrot.slane %v9281_v59, %v8639_v49 }
 0x32b   :  { %v7554_v59 = vld [vmem:[%s10728_s7 + $0x3c0] ss:$16 sps:$4 sm:$0xff]  }
 0x32c   :  { %2973 = vmatpush1.bf16.msra.mxu0 %v7476_v25  ;;  %3055 = vmatpush1.bf16.msra.mxu1 %v7479_v26  ;;  %v7556_v25 = vld [vmem:[%s10728_s7 + $0x3c4] ss:$16 sps:$4 sm:$0xff]   ;;  %v7559_v26 = vld [vmem:[%s10728_s7 + $0x3cc] ss:$16 sps:$4 sm:$0xff]  }
 0x32d   :  { %2974 = vmatprep.subr.bf16.mxu0 %v7484_v28  ;;  %3056 = vmatprep.subr.bf16.mxu1 %v7487_v33  ;;  %v3245_v28 = vrot.slane %v3231_v20, %v8249_v10  ;;  %v7557_v33 = vld [vmem:[%s10728_s7 + $0x3c8] ss:$16 sps:$4 sm:$0xff]   ;;  %v7565_v10 = vld [vmem:[%s10728_s7 + $0x3ec] ss:$16 sps:$4 sm:$0xff]   ;;  %v7626_v20 = vld [vmem:[%s10730_s9 + $0x324] ss:$16 sps:$4 sm:$0xff]  }
 0x330   :  { %2975 = vmatpush1.bf16.msra.mxu0 %v7482_v34  ;;  %3057 = vmatpush1.bf16.msra.mxu1 %v7485_v35  ;;  %v6932_v34 = vadd.f32 %v9289_v63, %v1318_v24  ;;  %v7562_v35 = vld [vmem:[%s10728_s7 + $0x3e4] ss:$16 sps:$4 sm:$0xff]   ;;  %v7563_v63 = vld [vmem:[%s10728_s7 + $0x3e8] ss:$16 sps:$4 sm:$0xff]  }
 0x331   :  { %2976 = vmatprep.subr.bf16.mxu0 %v7490_v36  ;;  %3058 = vmatprep.subr.bf16.mxu1 %v7493_v38  ;;  %v3246_v36 = vcombine.high %v3238_v27, %v3238_v27  ;;  %v3247_v38 = vcombine.high %v3245_v28, %v3245_v28  ;;  %v7629_v24 = vld [vmem:[%s10730_s9 + $0x144] ss:$16 sps:$4 sm:$0xff]  }
 0x334   :  { %2977 = vmatpush1.bf16.msra.mxu0 %v7488_v39  ;;  %3059 = vmatpush1.bf16.msra.mxu1 %v7491_v40  ;;  %v7560_v39 = vld [vmem:[%s10728_s7 + $0x3e0] ss:$16 sps:$4 sm:$0xff]   ;;  %v2133_v40 = vmax.f32 %v6932_v34, 0.0 }
 0x335   :  { %2978 = vmatprep.subr.bf16.mxu0 %v7496_v41  ;;  %3060 = vmatprep.subr.bf16.mxu1 %v7499_v42  ;;  %v3252_v41 = vand.u32 %v3246_v36, %v8252_v12  ;;  %v3258_v42 = vand.u32 %v3247_v38, %v8252_v12  ;;  %v7636_v34 = vld [vmem:[%s10730_s9 + $0x360] ss:$16 sps:$4 sm:$0xff]  }
 0x336   :  { %v7639_v36 = vld [vmem:[%s10730_s9 + $0x180] ss:$16 sps:$4 sm:$0xff]  }
 0x337   :  { %v7642_v38 = vld [vmem:[%s10730_s9 + $0x380] ss:$16 sps:$4 sm:$0xff]  }
 0x338   :  { %2979 = vmatpush1.bf16.msra.mxu0 %v7494_v43  ;;  %3061 = vmatpush1.bf16.msra.mxu1 %v7497_v13  ;;  %v3249_v43 = vand.u32 %v3238_v27, %v8252_v12  ;;  %v3255_v13 = vand.u32 %v3245_v28, %v8252_v12  ;;  %v7567_v12 = vld [vmem:[%s10730_s9] ss:$16 sps:$4 sm:$0xff]   ;;  %v7635_v28 = vld [vmem:[%s10730_s9 + $0x164] ss:$16 sps:$4 sm:$0xff]  }
 0x339   :  { %2980 = vmatprep.subr.bf16.mxu0 %v7502_v44  ;;  %3062 = vmatprep.subr.bf16.mxu1 %v7505_v45  ;;  %v2137_v44 = vpack.c.bf16 %v2133_v40, %v2133_v40  ;;  %v7569_v45 = vld [vmem:[%s10730_s9 + $0x4] ss:$16 sps:$4 sm:$0xff]   ;;  %v7630_v27 = vld [vmem:[%s10730_s9 + $0x340] ss:$16 sps:$4 sm:$0xff]  }
 0x33a   :  { %v7645_v40 = vld [vmem:[%s10730_s9 + $0x1a0] ss:$16 sps:$4 sm:$0xff]  }
 0x33c   :  { %2981 = vmatpush1.bf16.msra.mxu0 %v7500_v46  ;;  %3063 = vmatpush1.bf16.msra.mxu1 %v7503_v47  ;;  %v7572_v46 = vld [vmem:[%s10730_s9 + $0x204] ss:$16 sps:$4 sm:$0xff]   ;;  %v7570_v47 = vld [vmem:[%s10730_s9 + $0x200] ss:$16 sps:$4 sm:$0xff]  }
 0x33d   :  { %2982 = vmatprep.subr.bf16.mxu0 %v7508_v18  ;;  %3064 = vmatprep.subr.bf16.mxu1 %v7511_v48  ;;  %v7575_v18 = vld [vmem:[%s10730_s9 + $0x24] ss:$16 sps:$4 sm:$0xff]  }
 0x33e   :  { %v7578_v48 = vld [vmem:[%s10730_s9 + $0x224] ss:$16 sps:$4 sm:$0xff]  }
 0x340   :  { %2983 = vmatpush1.bf16.msra.mxu0 %v7506_v50  ;;  %3065 = vmatpush1.bf16.msra.mxu1 %v7509_v51  ;;  %v7576_v50 = vld [vmem:[%s10730_s9 + $0x220] ss:$16 sps:$4 sm:$0xff]   ;;  %v7581_v51 = vld [vmem:[%s10730_s9 + $0x44] ss:$16 sps:$4 sm:$0xff]  }
 0x341   :  { %2984 = vmatprep.subr.bf16.mxu0 %v7514_v52  ;;  %3066 = vmatprep.subr.bf16.mxu1 %v7517_v53  ;;  %v7579_v52 = vld [vmem:[%s10730_s9 + $0x40] ss:$16 sps:$4 sm:$0xff]  }
 0x342   :  { %v7582_v53 = vld [vmem:[%s10730_s9 + $0x240] ss:$16 sps:$4 sm:$0xff]  }
 0x344   :  { %2985 = vmatpush1.bf16.msra.mxu0 %v7512_v4  ;;  %3067 = vmatpush1.bf16.msra.mxu1 %v7515_v54  ;;  %v7587_v4 = vld [vmem:[%s10730_s9 + $0x64] ss:$16 sps:$4 sm:$0xff]  }
 0x345   :  { %2986 = vmatprep.subr.bf16.mxu0 %v7520_v55  ;;  %3068 = vmatprep.subr.bf16.mxu1 %v7523_v56  ;;  %v7590_v54 = vld [vmem:[%s10730_s9 + $0x264] ss:$16 sps:$4 sm:$0xff]   ;;  %v7585_v55 = vld [vmem:[%s10730_s9 + $0x60] ss:$16 sps:$4 sm:$0xff]  }
 0x346   :  { %v7588_v56 = vld [vmem:[%s10730_s9 + $0x260] ss:$16 sps:$4 sm:$0xff]  }
 0x348   :  { %2987 = vmatpush1.bf16.msra.mxu0 %v7518_v30  ;;  %3069 = vmatpush1.bf16.msra.mxu1 %v7521_v57  ;;  %v7593_v30 = vld [vmem:[%s10730_s9 + $0x84] ss:$16 sps:$4 sm:$0xff]  }
 0x349   :  { %2988 = vmatprep.subr.bf16.mxu0 %v7526_v58  ;;  %3070 = vmatprep.subr.bf16.mxu1 %v7529_v60  ;;  %v7596_v57 = vld [vmem:[%s10730_s9 + $0x284] ss:$16 sps:$4 sm:$0xff]   ;;  %v7591_v58 = vld [vmem:[%s10730_s9 + $0x80] ss:$16 sps:$4 sm:$0xff]  }
 0x34a   :  { %v7594_v60 = vld [vmem:[%s10730_s9 + $0x280] ss:$16 sps:$4 sm:$0xff]  }
 0x34c   :  { %2989 = vmatpush1.bf16.msra.mxu0 %v7524_v37  ;;  %3071 = vmatpush1.bf16.msra.mxu1 %v7527_v61  ;;  %v7599_v37 = vld [vmem:[%s10730_s9 + $0xa4] ss:$16 sps:$4 sm:$0xff]  }
 0x34d   :  { %2990 = vmatprep.subr.bf16.mxu0 %v7532_v62  ;;  %3072 = vmatprep.subr.bf16.mxu1 %v7535_v0  ;;  %v7602_v61 = vld [vmem:[%s10730_s9 + $0x2a4] ss:$16 sps:$4 sm:$0xff]   ;;  %v7597_v62 = vld [vmem:[%s10730_s9 + $0xa0] ss:$16 sps:$4 sm:$0xff]  }
 0x34e   :  { %v7600_v0 = vld [vmem:[%s10730_s9 + $0x2a0] ss:$16 sps:$4 sm:$0xff]  }
 0x350   :  { %2991 = vmatpush1.bf16.msra.mxu0 %v7530_v1  ;;  %3073 = vmatpush1.bf16.msra.mxu1 %v7533_v2  ;;  %v7605_v1 = vld [vmem:[%s10730_s9 + $0xc4] ss:$16 sps:$4 sm:$0xff]  }
 0x351   :  { %2992 = vmatprep.subr.bf16.mxu0 %v7538_v3  ;;  %3074 = vmatprep.subr.bf16.mxu1 %v7541_v6  ;;  %v7608_v2 = vld [vmem:[%s10730_s9 + $0x2c4] ss:$16 sps:$4 sm:$0xff]   ;;  %v7603_v3 = vld [vmem:[%s10730_s9 + $0xc0] ss:$16 sps:$4 sm:$0xff]  }
 0x352   :  { %v7606_v6 = vld [vmem:[%s10730_s9 + $0x2c0] ss:$16 sps:$4 sm:$0xff]  }
 0x354   :  { %2993 = vmatpush1.bf16.msra.mxu0 %v7536_v7  ;;  %3075 = vmatpush1.bf16.msra.mxu1 %v7539_v8  ;;  %v7611_v7 = vld [vmem:[%s10730_s9 + $0xe4] ss:$16 sps:$4 sm:$0xff]  }
 0x355   :  { %2994 = vmatprep.subr.bf16.mxu0 %v7544_v9  ;;  %3076 = vmatprep.subr.bf16.mxu1 %v7547_v11  ;;  %v7614_v8 = vld [vmem:[%s10730_s9 + $0x2e4] ss:$16 sps:$4 sm:$0xff]   ;;  %v7609_v9 = vld [vmem:[%s10730_s9 + $0xe0] ss:$16 sps:$4 sm:$0xff]  }
 0x356   :  { %v7612_v11 = vld [vmem:[%s10730_s9 + $0x2e0] ss:$16 sps:$4 sm:$0xff]  }
 0x358   :  { %2995 = vmatpush1.bf16.msra.mxu0 %v7542_v15  ;;  %3077 = vmatpush1.bf16.msra.mxu1 %v7545_v16  ;;  %v7620_v15 = vld [vmem:[%s10730_s9 + $0x304] ss:$16 sps:$4 sm:$0xff]   ;;  %v7615_v16 = vld [vmem:[%s10730_s9 + $0x100] ss:$16 sps:$4 sm:$0xff]  }
 0x359   :  { %2996 = vmatprep.subr.bf16.mxu0 %v7550_v17  ;;  %3078 = vmatprep.subr.bf16.mxu1 %v7553_v19  ;;  %v7618_v17 = vld [vmem:[%s10730_s9 + $0x300] ss:$16 sps:$4 sm:$0xff]   ;;  %v7623_v19 = vld [vmem:[%s10730_s9 + $0x124] ss:$16 sps:$4 sm:$0xff]  }
 0x35c   :  { %2997 = vmatpush1.bf16.msra.mxu0 %v7548_v21  ;;  %3079 = vmatpush1.bf16.msra.mxu1 %v7551_v22  ;;  %v7621_v21 = vld [vmem:[%s10730_s9 + $0x120] ss:$16 sps:$4 sm:$0xff]  }
 0x35d   :  { %2998 = vmatprep.subr.bf16.mxu0 %v7556_v25  ;;  %3080 = vmatprep.subr.bf16.mxu1 %v7559_v26  ;;  %v7624_v22 = vld [vmem:[%s10730_s9 + $0x320] ss:$16 sps:$4 sm:$0xff]   ;;  %v7632_v25 = vld [vmem:[%s10730_s9 + $0x344] ss:$16 sps:$4 sm:$0xff]  }
 0x35e   :  { %v7627_v26 = vld [vmem:[%s10730_s9 + $0x140] ss:$16 sps:$4 sm:$0xff]  }
 0x360   :  { %2999 = vmatpush1.bf16.msra.mxu0 %v7554_v59  ;;  %3081 = vmatpush1.bf16.msra.mxu1 %v7557_v33  ;;  %v7638_v59 = vld [vmem:[%s10730_s9 + $0x364] ss:$16 sps:$4 sm:$0xff]   ;;  %v7633_v33 = vld [vmem:[%s10730_s9 + $0x160] ss:$16 sps:$4 sm:$0xff]  }
 0x361   :  { %3000 = vmatprep.subr.bf16.mxu0 %v7562_v35  ;;  %3082 = vmatprep.subr.bf16.mxu1 %v7565_v10  ;;  %v7641_v35 = vld [vmem:[%s10730_s9 + $0x184] ss:$16 sps:$4 sm:$0xff]  }
 0x362   :  { %v7644_v10 = vld [vmem:[%s10730_s9 + $0x384] ss:$16 sps:$4 sm:$0xff]  }
 0x364   :  { %3001 = vmatpush1.bf16.msra.mxu0 %v7560_v39  ;;  %3083 = vmatpush1.bf16.msra.mxu1 %v7563_v63  ;;  %v7647_v39 = vld [vmem:[%s10730_s9 + $0x1a4] ss:$16 sps:$4 sm:$0xff]  }
 0x365   :  { %3260 = vmatprep.subr.bf16.mxu0 %v3252_v41  ;;  %3301 = vmatprep.subr.bf16.mxu1 %v3258_v42  ;;  %v7650_v63 = vld [vmem:[%s10730_s9 + $0x3a4] ss:$16 sps:$4 sm:$0xff]   ;;  %v7648_v41 = vld [vmem:[%s10730_s9 + $0x3a0] ss:$16 sps:$4 sm:$0xff]  }
 0x366   :  { %v7653_v42 = vld [vmem:[%s10730_s9 + $0x1c4] ss:$16 sps:$4 sm:$0xff]  }
 0x367   :  { %3003 = vmatmul.mubr.bf16.vlgmr.msra.gmra.mrb[12].mxu0 %v2137_v44  ;;  %3085 = vmatmul.mubr.bf16.vlgmr.msra.gmra.mrb[12].mxu1 %v2137_v44  ;;  %v7654_v44 = vld [vmem:[%s10730_s9 + $0x3c0] ss:$16 sps:$4 sm:$0xff]  }
 0x368   :  { %3261 = vmatpush1.bf16.msra.mxu0 %v3249_v43  ;;  %3302 = vmatpush1.bf16.msra.mxu1 %v3255_v13  ;;  %v7656_v43 = vld [vmem:[%s10730_s9 + $0x3c4] ss:$16 sps:$4 sm:$0xff]   ;;  %v7651_v13 = vld [vmem:[%s10730_s9 + $0x1c0] ss:$16 sps:$4 sm:$0xff]  }
 0x369   :  { %3292 = vmatprep.mubr.bf16.mxu0 %v8144_v5  ;;  %3333 = vmatprep.mubr.bf16.mxu1 %v8144_v5  ;;  %v7573_v5 = vld [vmem:[%s10730_s9 + $0x20] ss:$16 sps:$4 sm:$0xff]  }
 0x36a   :  { %3982 = vmatprep.subr.bf16.mxu0 %v7569_v45  ;;  %4023 = vmatprep.subr.bf16.mxu1 %v7572_v46  ;;  %v7659_v45 = vld [vmem:[%s10730_s9 + $0x1e4] ss:$16 sps:$4 sm:$0xff]  }
 0x36b   :  { %v7662_v46 = vld [vmem:[%s10730_s9 + $0x3e4] ss:$16 sps:$4 sm:$0xff]  }
 0x36f   :  { %6539 = vmatmul.mubr.msk.bf16.vlgmr.msra.gmra.mrb[16].mxu0 %vm105_vm2, %v8268_v23  ;;  %6540 = vmatmul.mubr.msk.bf16.vlgmr.msra.gmra.mrb[16].mxu1 %vm105_vm2, %v8268_v23  ;;  %v7584_v23 = vld [vmem:[%s10730_s9 + $0x244] ss:$16 sps:$4 sm:$0xff]  }
 0x370   :  { %3983 = vmatpush1.bf16.msra.mxu0 %v7567_v12  ;;  %4024 = vmatpush1.bf16.msra.mxu1 %v7570_v47  ;;  %v7657_v12 = vld [vmem:[%s10730_s9 + $0x1e0] ss:$16 sps:$4 sm:$0xff]  }
 0x371   :  { %3984 = vmatprep.subr.bf16.mxu0 %v7575_v18  ;;  %4025 = vmatprep.subr.bf16.mxu1 %v7578_v48  ;;  %v7660_v47 = vld [vmem:[%s10730_s9 + $0x3e0] ss:$16 sps:$4 sm:$0xff]   ;;  %v7665_v18 = vld [vmem:[%s10730_s9 + $0xc] ss:$16 sps:$4 sm:$0xff]  }
 0x372   :  { %v7668_v48 = vld [vmem:[%s10730_s9 + $0x20c] ss:$16 sps:$4 sm:$0xff]  }
 0x374   :  { %3985 = vmatpush1.bf16.msra.mxu0 %v7573_v5  ;;  %4026 = vmatpush1.bf16.msra.mxu1 %v7576_v50  ;;  %v2267_v5 = vld [vmem:[%s10734_s8] sm:$0xf] }
 0x375   :  { %3986 = vmatprep.subr.bf16.mxu0 %v7581_v51  ;;  %4027 = vmatprep.subr.bf16.mxu1 %v7584_v23  ;;  %v2272_v50 = vrot.slane %v2267_v5, %v8467_v29  ;;  %v2280_v51 = vrot.slane %v2267_v5, %v8639_v49  ;;  %v2276_v23 = vrot.slane %v2267_v5, %v8475_v31 }
 0x378   :  { %3987 = vmatpush1.bf16.msra.mxu0 %v7579_v52  ;;  %4028 = vmatpush1.bf16.msra.mxu1 %v7582_v53  ;;  %v2284_v52 = vrot.slane %v2267_v5, %v8478_v32  ;;  %v7710_v5 = vld [vmem:[%s10730_s9 + $0x2ec] ss:$16 sps:$4 sm:$0xff]  }
 0x379   :  { %3988 = vmatprep.subr.bf16.mxu0 %v7587_v4  ;;  %4029 = vmatprep.subr.bf16.mxu1 %v7590_v54 }
 0x37c   :  { %3989 = vmatpush1.bf16.msra.mxu0 %v7585_v55  ;;  %4030 = vmatpush1.bf16.msra.mxu1 %v7588_v56 }
 0x37d   :  { %3990 = vmatprep.subr.bf16.mxu0 %v7593_v30  ;;  %4031 = vmatprep.subr.bf16.mxu1 %v7596_v57 }
 0x380   :  { %3991 = vmatpush1.bf16.msra.mxu0 %v7591_v58  ;;  %4032 = vmatpush1.bf16.msra.mxu1 %v7594_v60 }
 0x381   :  { %3992 = vmatprep.subr.bf16.mxu0 %v7599_v37  ;;  %4033 = vmatprep.subr.bf16.mxu1 %v7602_v61 }
 0x384   :  { %3993 = vmatpush1.bf16.msra.mxu0 %v7597_v62  ;;  %4034 = vmatpush1.bf16.msra.mxu1 %v7600_v0 }
 0x385   :  { %3994 = vmatprep.subr.bf16.mxu0 %v7605_v1  ;;  %4035 = vmatprep.subr.bf16.mxu1 %v7608_v2 }
 0x388   :  { %3995 = vmatpush1.bf16.msra.mxu0 %v7603_v3  ;;  %4036 = vmatpush1.bf16.msra.mxu1 %v7606_v6 }
 0x389   :  { %3996 = vmatprep.subr.bf16.mxu0 %v7611_v7  ;;  %4037 = vmatprep.subr.bf16.mxu1 %v7614_v8  ;;  %v7663_v8 = vld [vmem:[%s10730_s9 + $0x8] ss:$16 sps:$4 sm:$0xff]  }
 0x38c   :  { %3997 = vmatpush1.bf16.msra.mxu0 %v7609_v9  ;;  %4038 = vmatpush1.bf16.msra.mxu1 %v7612_v11  ;;  %v7666_v9 = vld [vmem:[%s10730_s9 + $0x208] ss:$16 sps:$4 sm:$0xff]  }
 0x38d   :  { %3998 = vmatprep.subr.bf16.mxu0 %v7617_v14  ;;  %4039 = vmatprep.subr.bf16.mxu1 %v7620_v15  ;;  %v7671_v15 = vld [vmem:[%s10730_s9 + $0x2c] ss:$16 sps:$4 sm:$0xff]  }
 0x390   :  { %3999 = vmatpush1.bf16.msra.mxu0 %v7615_v16  ;;  %4040 = vmatpush1.bf16.msra.mxu1 %v7618_v17  ;;  %v7674_v16 = vld [vmem:[%s10730_s9 + $0x22c] ss:$16 sps:$4 sm:$0xff]  }
 0x391   :  { %4000 = vmatprep.subr.bf16.mxu0 %v7623_v19  ;;  %4041 = vmatprep.subr.bf16.mxu1 %v7626_v20 }
 0x394   :  { %4001 = vmatpush1.bf16.msra.mxu0 %v7621_v21  ;;  %4042 = vmatpush1.bf16.msra.mxu1 %v7624_v22  ;;  %v7669_v22 = vld [vmem:[%s10730_s9 + $0x28] ss:$16 sps:$4 sm:$0xff]  }
 0x395   :  { %4002 = vmatprep.subr.bf16.mxu0 %v7629_v24  ;;  %4043 = vmatprep.subr.bf16.mxu1 %v7632_v25  ;;  %v7672_v24 = vld [vmem:[%s10730_s9 + $0x228] ss:$16 sps:$4 sm:$0xff]  }
 0x398   :  { %4003 = vmatpush1.bf16.msra.mxu0 %v7627_v26  ;;  %4044 = vmatpush1.bf16.msra.mxu1 %v7630_v27  ;;  %v7677_v27 = vld [vmem:[%s10730_s9 + $0x4c] ss:$16 sps:$4 sm:$0xff]  }
 0x399   :  { %4004 = vmatprep.subr.bf16.mxu0 %v7635_v28  ;;  %4045 = vmatprep.subr.bf16.mxu1 %v7638_v59  ;;  %v7680_v28 = vld [vmem:[%s10730_s9 + $0x24c] ss:$16 sps:$4 sm:$0xff]  }
 0x39c   :  { %4005 = vmatpush1.bf16.msra.mxu0 %v7633_v33  ;;  %4046 = vmatpush1.bf16.msra.mxu1 %v7636_v34  ;;  %v7675_v34 = vld [vmem:[%s10730_s9 + $0x48] ss:$16 sps:$4 sm:$0xff]  }
 0x39d   :  { %4006 = vmatprep.subr.bf16.mxu0 %v7641_v35  ;;  %4047 = vmatprep.subr.bf16.mxu1 %v7644_v10  ;;  %v7678_v35 = vld [vmem:[%s10730_s9 + $0x248] ss:$16 sps:$4 sm:$0xff]   ;;  %v7683_v10 = vld [vmem:[%s10730_s9 + $0x6c] ss:$16 sps:$4 sm:$0xff]  }
 0x3a0   :  { %4007 = vmatpush1.bf16.msra.mxu0 %v7639_v36  ;;  %4048 = vmatpush1.bf16.msra.mxu1 %v7642_v38  ;;  %v7686_v36 = vld [vmem:[%s10730_s9 + $0x26c] ss:$16 sps:$4 sm:$0xff]   ;;  %v7681_v38 = vld [vmem:[%s10730_s9 + $0x68] ss:$16 sps:$4 sm:$0xff]  }
 0x3a1   :  { %4008 = vmatprep.subr.bf16.mxu0 %v7647_v39  ;;  %4049 = vmatprep.subr.bf16.mxu1 %v7650_v63  ;;  %v7684_v39 = vld [vmem:[%s10730_s9 + $0x268] ss:$16 sps:$4 sm:$0xff]   ;;  %v7689_v63 = vld [vmem:[%s10730_s9 + $0x8c] ss:$16 sps:$4 sm:$0xff]  }
 0x3a4   :  { %4009 = vmatpush1.bf16.msra.mxu0 %v7645_v40  ;;  %4050 = vmatpush1.bf16.msra.mxu1 %v7648_v41  ;;  %v7692_v40 = vld [vmem:[%s10730_s9 + $0x28c] ss:$16 sps:$4 sm:$0xff]   ;;  %v7687_v41 = vld [vmem:[%s10730_s9 + $0x88] ss:$16 sps:$4 sm:$0xff]  }
 0x3a5   :  { %4010 = vmatprep.subr.bf16.mxu0 %v7653_v42  ;;  %4051 = vmatprep.subr.bf16.mxu1 %v7656_v43  ;;  %v7690_v42 = vld [vmem:[%s10730_s9 + $0x288] ss:$16 sps:$4 sm:$0xff]   ;;  %v7695_v43 = vld [vmem:[%s10730_s9 + $0xac] ss:$16 sps:$4 sm:$0xff]  }
 0x3a8   :  { %4011 = vmatpush1.bf16.msra.mxu0 %v7651_v13  ;;  %4052 = vmatpush1.bf16.msra.mxu1 %v7654_v44  ;;  %v7698_v13 = vld [vmem:[%s10730_s9 + $0x2ac] ss:$16 sps:$4 sm:$0xff]   ;;  %v7693_v44 = vld [vmem:[%s10730_s9 + $0xa8] ss:$16 sps:$4 sm:$0xff]  }
 0x3a9   :  { %4012 = vmatprep.subr.bf16.mxu0 %v7659_v45  ;;  %4053 = vmatprep.subr.bf16.mxu1 %v7662_v46  ;;  %v7696_v45 = vld [vmem:[%s10730_s9 + $0x2a8] ss:$16 sps:$4 sm:$0xff]   ;;  %v7701_v46 = vld [vmem:[%s10730_s9 + $0xcc] ss:$16 sps:$4 sm:$0xff]  }
 0x3ac   :  { %4013 = vmatpush1.bf16.msra.mxu0 %v7657_v12  ;;  %4054 = vmatpush1.bf16.msra.mxu1 %v7660_v47  ;;  %v7704_v12 = vld [vmem:[%s10730_s9 + $0x2cc] ss:$16 sps:$4 sm:$0xff]   ;;  %v7699_v47 = vld [vmem:[%s10730_s9 + $0xc8] ss:$16 sps:$4 sm:$0xff]  }
 0x3ad   :  { %4064 = vmatprep.subr.bf16.mxu0 %v7665_v18  ;;  %4105 = vmatprep.subr.bf16.mxu1 %v7668_v48  ;;  %v7702_v18 = vld [vmem:[%s10730_s9 + $0x2c8] ss:$16 sps:$4 sm:$0xff]   ;;  %v7707_v48 = vld [vmem:[%s10730_s9 + $0xec] ss:$16 sps:$4 sm:$0xff]  }
 0x43a   :  { %v3004_v53 = vpop.f32.mrb[12].mxu0  ;;  %v3086_v4 = vpop.f32.mrb[12].mxu1 }
 0x43b   :  { %v6934_v54 = vadd.f32 %v3004_v53, %v2272_v50  ;;  %v6936_v55 = vadd.f32 %v3086_v4, %v2280_v51  ;;  %v3006_v56 = vpop.f32.mrb[13].mxu0  ;;  %v3088_v30 = vpop.f32.mrb[13].mxu1  ;;  %v7705_v50 = vld [vmem:[%s10730_s9 + $0xe8] ss:$16 sps:$4 sm:$0xff]  }
 0x43c   :  { %v6935_v57 = vadd.f32 %v3006_v56, %v2276_v23  ;;  %v6937_v58 = vadd.f32 %v3088_v30, %v2284_v52  ;;  %v3008_v60 = vpop.f32.mrb[14].mxu0  ;;  %v3090_v37 = vpop.f32.mrb[14].mxu1  ;;  %v7708_v51 = vld [vmem:[%s10730_s9 + $0x2e8] ss:$16 sps:$4 sm:$0xff]   ;;  %v7713_v23 = vld [vmem:[%s10730_s9 + $0x10c] ss:$16 sps:$4 sm:$0xff]  }
 0x43d   :  { %v3093_v61 = vmax.f32 %v6934_v54, 0.0  ;;  %v3095_v62 = vmax.f32 %v6936_v55, 0.0  ;;  %v3009_v0 = vpop.f32.mrb[15].mxu0  ;;  %v3091_v1 = vpop.f32.mrb[15].mxu1  ;;  %v7716_v52 = vld [vmem:[%s10730_s9 + $0x30c] ss:$16 sps:$4 sm:$0xff]  }
 0x43e   :  { %v3094_v2 = vmax.f32 %v6935_v57, 0.0  ;;  %v3096_v3 = vmax.f32 %v6937_v58, 0.0  ;;  %v7711_v53 = vld [vmem:[%s10730_s9 + $0x108] ss:$16 sps:$4 sm:$0xff]   ;;  %v7719_v54 = vld [vmem:[%s10730_s9 + $0x12c] ss:$16 sps:$4 sm:$0xff]  }
 0x43f   :  { %v9706_v11 = vpack.c.bf16 %v3093_v61, %v3093_v61  ;;  %v9708_v14 = vpack.c.bf16 %v3095_v62, %v3095_v62  ;;  %v7714_v4 = vld [vmem:[%s10730_s9 + $0x308] ss:$16 sps:$4 sm:$0xff]   ;;  %v7722_v55 = vld [vmem:[%s10730_s9 + $0x32c] ss:$16 sps:$4 sm:$0xff]  }
 0x440   :  { %v3098_v6 = vpack.c.bf16 %v3094_v2, %v3094_v2  ;;  %v3100_v7 = vpack.c.bf16 %v3096_v3, %v3096_v3  ;;  %v7717_v56 = vld [vmem:[%s10730_s9 + $0x128] ss:$16 sps:$4 sm:$0xff]   ;;  %v7725_v57 = vld [vmem:[%s10730_s9 + $0x14c] ss:$16 sps:$4 sm:$0xff]  }
 0x441   :  { %v7720_v30 = vld [vmem:[%s10730_s9 + $0x328] ss:$16 sps:$4 sm:$0xff]   ;;  %v7728_v58 = vld [vmem:[%s10730_s9 + $0x34c] ss:$16 sps:$4 sm:$0xff]  }
 0x442   :  { %4014 = vmatprep.mubr.bf16.mxu0 %v3098_v6  ;;  %4055 = vmatprep.mubr.bf16.mxu1 %v3100_v7  ;;  %v9716_v17 = vpop.f32.mrb[16].mxu0  ;;  %v9718_v19 = vpop.f32.mrb[16].mxu1  ;;  %v7723_v60 = vld [vmem:[%s10730_s9 + $0x148] ss:$16 sps:$4 sm:$0xff]   ;;  %v7731_v61 = vld [vmem:[%s10730_s9 + $0x16c] ss:$16 sps:$4 sm:$0xff]  }
 0x443   :  { %4015 = vmatmul.mubr.bf16.vlgmr.msra.gmra.mrb[20].mxu0 %v9706_v11  ;;  %4056 = vmatmul.mubr.bf16.vlgmr.msra.gmra.mrb[20].mxu1 %v9708_v14  ;;  %v9722_v20 = vpop.f32.mrb[17].mxu0  ;;  %v9724_v21 = vpop.f32.mrb[17].mxu1  ;;  %v7726_v37 = vld [vmem:[%s10730_s9 + $0x348] ss:$16 sps:$4 sm:$0xff]   ;;  %v7734_v62 = vld [vmem:[%s10730_s9 + $0x36c] ss:$16 sps:$4 sm:$0xff]  }
 0x444   :  { %4065 = vmatpush1.bf16.msra.mxu0 %v7663_v8  ;;  %4106 = vmatpush1.bf16.msra.mxu1 %v7666_v9  ;;  %v3298_v25 = vpop.f32.mrb[18].mxu0  ;;  %v3339_v26 = vpop.f32.mrb[18].mxu1  ;;  %v7729_v0 = vld [vmem:[%s10730_s9 + $0x168] ss:$16 sps:$4 sm:$0xff]   ;;  %v7737_v2 = vld [vmem:[%s10730_s9 + $0x18c] ss:$16 sps:$4 sm:$0xff]  }
 0x445   :  { %4096 = vmatprep.mubr.bf16.mxu0 %v3098_v6  ;;  %4137 = vmatprep.mubr.bf16.mxu1 %v3100_v7  ;;  %v3299_v59 = vpop.f32.mrb[19].mxu0  ;;  %v3340_v33 = vpop.f32.mrb[19].mxu1  ;;  %v7732_v1 = vld [vmem:[%s10730_s9 + $0x368] ss:$16 sps:$4 sm:$0xff]   ;;  %v7740_v3 = vld [vmem:[%s10730_s9 + $0x38c] ss:$16 sps:$4 sm:$0xff]  }
 0x446   :  { %4066 = vmatprep.subr.bf16.mxu0 %v7671_v15  ;;  %4107 = vmatprep.subr.bf16.mxu1 %v7674_v16  ;;  %v7735_v6 = vld [vmem:[%s10730_s9 + $0x188] ss:$16 sps:$4 sm:$0xff]   ;;  %v7743_v8 = vld [vmem:[%s10730_s9 + $0x1ac] ss:$16 sps:$4 sm:$0xff]  }
 0x447   :  { %v7738_v7 = vld [vmem:[%s10730_s9 + $0x388] ss:$16 sps:$4 sm:$0xff]   ;;  %v7746_v9 = vld [vmem:[%s10730_s9 + $0x3ac] ss:$16 sps:$4 sm:$0xff]  }
 0x448   :  { %4067 = vmatpush1.bf16.msra.mxu0 %v7669_v22  ;;  %4108 = vmatpush1.bf16.msra.mxu1 %v7672_v24  ;;  %v7741_v15 = vld [vmem:[%s10730_s9 + $0x1a8] ss:$16 sps:$4 sm:$0xff]   ;;  %v7749_v22 = vld [vmem:[%s10730_s9 + $0x1cc] ss:$16 sps:$4 sm:$0xff]  }
 0x449   :  { %4068 = vmatprep.subr.bf16.mxu0 %v7677_v27  ;;  %4109 = vmatprep.subr.bf16.mxu1 %v7680_v28  ;;  %v7744_v16 = vld [vmem:[%s10730_s9 + $0x3a8] ss:$16 sps:$4 sm:$0xff]   ;;  %v7752_v24 = vld [vmem:[%s10730_s9 + $0x3cc] ss:$16 sps:$4 sm:$0xff]  }
 0x44a   :  { %v7747_v25 = vld [vmem:[%s10730_s9 + $0x1c8] ss:$16 sps:$4 sm:$0xff]   ;;  %v7755_v27 = vld [vmem:[%s10730_s9 + $0x1ec] ss:$16 sps:$4 sm:$0xff]  }
 0x44b   :  { %v7750_v26 = vld [vmem:[%s10730_s9 + $0x3c8] ss:$16 sps:$4 sm:$0xff]   ;;  %v7758_v28 = vld [vmem:[%s10730_s9 + $0x3ec] ss:$16 sps:$4 sm:$0xff]  }
 0x44c   :  { %4069 = vmatpush1.bf16.msra.mxu0 %v7675_v34  ;;  %4110 = vmatpush1.bf16.msra.mxu1 %v7678_v35  ;;  %v7753_v59 = vld [vmem:[%s10730_s9 + $0x1e8] ss:$16 sps:$4 sm:$0xff]   ;;  %v7761_v34 = vld [vmem:[%s10733_s12 + $0x4] ss:$16 sps:$4 sm:$0xff]   ;;  %v7764_v35 = vld [vmem:[%s10733_s12 + $0xc] ss:$16 sps:$4 sm:$0xff]  }
 0x44d   :  { %4070 = vmatprep.subr.bf16.mxu0 %v7683_v10  ;;  %4111 = vmatprep.subr.bf16.mxu1 %v7686_v36  ;;  %v7756_v33 = vld [vmem:[%s10730_s9 + $0x3e8] ss:$16 sps:$4 sm:$0xff]   ;;  %v7759_v10 = vld [vmem:[%s10733_s12] ss:$16 sps:$4 sm:$0xff]  }
 0x44e   :  { %v7762_v36 = vld [vmem:[%s10733_s12 + $0x8] ss:$16 sps:$4 sm:$0xff]  }
 0x450   :  { %4071 = vmatpush1.bf16.msra.mxu0 %v7681_v38  ;;  %4112 = vmatpush1.bf16.msra.mxu1 %v7684_v39  ;;  %v7767_v38 = vld [vmem:[%s10733_s12 + $0x24] ss:$16 sps:$4 sm:$0xff]   ;;  %v7770_v39 = vld [vmem:[%s10733_s12 + $0x2c] ss:$16 sps:$4 sm:$0xff]  }
 0x451   :  { %4072 = vmatprep.subr.bf16.mxu0 %v7689_v63  ;;  %4113 = vmatprep.subr.bf16.mxu1 %v7692_v40  ;;  %v7765_v63 = vld [vmem:[%s10733_s12 + $0x20] ss:$16 sps:$4 sm:$0xff]   ;;  %v7768_v40 = vld [vmem:[%s10733_s12 + $0x28] ss:$16 sps:$4 sm:$0xff]  }
 0x454   :  { %4073 = vmatpush1.bf16.msra.mxu0 %v7687_v41  ;;  %4114 = vmatpush1.bf16.msra.mxu1 %v7690_v42  ;;  %v7773_v41 = vld [vmem:[%s10733_s12 + $0x44] ss:$16 sps:$4 sm:$0xff]   ;;  %v7774_v42 = vld [vmem:[%s10733_s12 + $0x48] ss:$16 sps:$4 sm:$0xff]  }
 0x455   :  { %4074 = vmatprep.subr.bf16.mxu0 %v7695_v43  ;;  %4115 = vmatprep.subr.bf16.mxu1 %v7698_v13  ;;  %v7779_v43 = vld [vmem:[%s10733_s12 + $0x64] ss:$16 sps:$4 sm:$0xff]   ;;  %v7782_v13 = vld [vmem:[%s10733_s12 + $0x6c] ss:$16 sps:$4 sm:$0xff]  }
 0x458   :  { %4075 = vmatpush1.bf16.msra.mxu0 %v7693_v44  ;;  %4116 = vmatpush1.bf16.msra.mxu1 %v7696_v45  ;;  %v7777_v44 = vld [vmem:[%s10733_s12 + $0x60] ss:$16 sps:$4 sm:$0xff]   ;;  %v7780_v45 = vld [vmem:[%s10733_s12 + $0x68] ss:$16 sps:$4 sm:$0xff]  }
 0x459   :  { %4076 = vmatprep.subr.bf16.mxu0 %v7701_v46  ;;  %4117 = vmatprep.subr.bf16.mxu1 %v7704_v12  ;;  %v7785_v46 = vld [vmem:[%s10733_s12 + $0x84] ss:$16 sps:$4 sm:$0xff]   ;;  %v7788_v12 = vld [vmem:[%s10733_s12 + $0x8c] ss:$16 sps:$4 sm:$0xff]  }
 0x45c   :  { %4077 = vmatpush1.bf16.msra.mxu0 %v7699_v47  ;;  %4118 = vmatpush1.bf16.msra.mxu1 %v7702_v18  ;;  %v7783_v47 = vld [vmem:[%s10733_s12 + $0x80] ss:$16 sps:$4 sm:$0xff]   ;;  %v7786_v18 = vld [vmem:[%s10733_s12 + $0x88] ss:$16 sps:$4 sm:$0xff]  }
 0x45d   :  { %4078 = vmatprep.subr.bf16.mxu0 %v7707_v48  ;;  %4119 = vmatprep.subr.bf16.mxu1 %v7710_v5  ;;  %v7791_v48 = vld [vmem:[%s10733_s12 + $0xa4] ss:$16 sps:$4 sm:$0xff]   ;;  %v7794_v5 = vld [vmem:[%s10733_s12 + $0xac] ss:$16 sps:$4 sm:$0xff]  }
 0x460   :  { %4079 = vmatpush1.bf16.msra.mxu0 %v7705_v50  ;;  %4120 = vmatpush1.bf16.msra.mxu1 %v7708_v51  ;;  %v7789_v50 = vld [vmem:[%s10733_s12 + $0xa0] ss:$16 sps:$4 sm:$0xff]   ;;  %v7792_v51 = vld [vmem:[%s10733_s12 + $0xa8] ss:$16 sps:$4 sm:$0xff]  }
 0x461   :  { %4080 = vmatprep.subr.bf16.mxu0 %v7713_v23  ;;  %4121 = vmatprep.subr.bf16.mxu1 %v7716_v52  ;;  %v7797_v23 = vld [vmem:[%s10733_s12 + $0xc4] ss:$16 sps:$4 sm:$0xff]   ;;  %v7800_v52 = vld [vmem:[%s10733_s12 + $0xcc] ss:$16 sps:$4 sm:$0xff]  }
 0x464   :  { %4081 = vmatpush1.bf16.msra.mxu0 %v7711_v53  ;;  %4122 = vmatpush1.bf16.msra.mxu1 %v7714_v4  ;;  %v7795_v53 = vld [vmem:[%s10733_s12 + $0xc0] ss:$16 sps:$4 sm:$0xff]   ;;  %v7798_v4 = vld [vmem:[%s10733_s12 + $0xc8] ss:$16 sps:$4 sm:$0xff]  }
 0x465   :  { %4082 = vmatprep.subr.bf16.mxu0 %v7719_v54  ;;  %4123 = vmatprep.subr.bf16.mxu1 %v7722_v55  ;;  %v7803_v54 = vld [vmem:[%s10733_s12 + $0xe4] ss:$16 sps:$4 sm:$0xff]   ;;  %v7806_v55 = vld [vmem:[%s10733_s12 + $0xec] ss:$16 sps:$4 sm:$0xff]  }
 0x468   :  { %4083 = vmatpush1.bf16.msra.mxu0 %v7717_v56  ;;  %4124 = vmatpush1.bf16.msra.mxu1 %v7720_v30  ;;  %v7801_v56 = vld [vmem:[%s10733_s12 + $0xe0] ss:$16 sps:$4 sm:$0xff]   ;;  %v7804_v30 = vld [vmem:[%s10733_s12 + $0xe8] ss:$16 sps:$4 sm:$0xff]  }
 0x469   :  { %4084 = vmatprep.subr.bf16.mxu0 %v7725_v57  ;;  %4125 = vmatprep.subr.bf16.mxu1 %v7728_v58  ;;  %v7809_v57 = vld [vmem:[%s10733_s12 + $0x104] ss:$16 sps:$4 sm:$0xff]   ;;  %v7812_v58 = vld [vmem:[%s10733_s12 + $0x10c] ss:$16 sps:$4 sm:$0xff]  }
 0x46c   :  { %4085 = vmatpush1.bf16.msra.mxu0 %v7723_v60  ;;  %4126 = vmatpush1.bf16.msra.mxu1 %v7726_v37  ;;  %v7807_v60 = vld [vmem:[%s10733_s12 + $0x100] ss:$16 sps:$4 sm:$0xff]   ;;  %v7810_v37 = vld [vmem:[%s10733_s12 + $0x108] ss:$16 sps:$4 sm:$0xff]  }
 0x46d   :  { %4086 = vmatprep.subr.bf16.mxu0 %v7731_v61  ;;  %4127 = vmatprep.subr.bf16.mxu1 %v7734_v62  ;;  %v7815_v61 = vld [vmem:[%s10733_s12 + $0x124] ss:$16 sps:$4 sm:$0xff]   ;;  %v7818_v62 = vld [vmem:[%s10733_s12 + $0x12c] ss:$16 sps:$4 sm:$0xff]  }
 0x470   :  { %4087 = vmatpush1.bf16.msra.mxu0 %v7729_v0  ;;  %4128 = vmatpush1.bf16.msra.mxu1 %v7732_v1  ;;  %v7813_v0 = vld [vmem:[%s10733_s12 + $0x120] ss:$16 sps:$4 sm:$0xff]   ;;  %v7816_v1 = vld [vmem:[%s10733_s12 + $0x128] ss:$16 sps:$4 sm:$0xff]  }
 0x471   :  { %4088 = vmatprep.subr.bf16.mxu0 %v7737_v2  ;;  %4129 = vmatprep.subr.bf16.mxu1 %v7740_v3  ;;  %v7821_v2 = vld [vmem:[%s10733_s12 + $0x144] ss:$16 sps:$4 sm:$0xff]   ;;  %v7824_v3 = vld [vmem:[%s10733_s12 + $0x14c] ss:$16 sps:$4 sm:$0xff]  }
 0x474   :  { %4089 = vmatpush1.bf16.msra.mxu0 %v7735_v6  ;;  %4130 = vmatpush1.bf16.msra.mxu1 %v7738_v7  ;;  %v7819_v6 = vld [vmem:[%s10733_s12 + $0x140] ss:$16 sps:$4 sm:$0xff]   ;;  %v7822_v7 = vld [vmem:[%s10733_s12 + $0x148] ss:$16 sps:$4 sm:$0xff]  }
 0x475   :  { %4090 = vmatprep.subr.bf16.mxu0 %v7743_v8  ;;  %4131 = vmatprep.subr.bf16.mxu1 %v7746_v9  ;;  %v7827_v8 = vld [vmem:[%s10733_s12 + $0x164] ss:$16 sps:$4 sm:$0xff]   ;;  %v7830_v9 = vld [vmem:[%s10733_s12 + $0x16c] ss:$16 sps:$4 sm:$0xff]  }
 0x478   :  { %4091 = vmatpush1.bf16.msra.mxu0 %v7741_v15  ;;  %4132 = vmatpush1.bf16.msra.mxu1 %v7744_v16  ;;  %v7825_v15 = vld [vmem:[%s10733_s12 + $0x160] ss:$16 sps:$4 sm:$0xff]   ;;  %v7828_v16 = vld [vmem:[%s10733_s12 + $0x168] ss:$16 sps:$4 sm:$0xff]  }
 0x479   :  { %4092 = vmatprep.subr.bf16.mxu0 %v7749_v22  ;;  %4133 = vmatprep.subr.bf16.mxu1 %v7752_v24  ;;  %v7833_v22 = vld [vmem:[%s10733_s12 + $0x184] ss:$16 sps:$4 sm:$0xff]   ;;  %v7836_v24 = vld [vmem:[%s10733_s12 + $0x18c] ss:$16 sps:$4 sm:$0xff]  }
 0x47c   :  { %4093 = vmatpush1.bf16.msra.mxu0 %v7747_v25  ;;  %4134 = vmatpush1.bf16.msra.mxu1 %v7750_v26  ;;  %v7831_v25 = vld [vmem:[%s10733_s12 + $0x180] ss:$16 sps:$4 sm:$0xff]   ;;  %v7834_v26 = vld [vmem:[%s10733_s12 + $0x188] ss:$16 sps:$4 sm:$0xff]  }
 0x47d   :  { %4094 = vmatprep.subr.bf16.mxu0 %v7755_v27  ;;  %4135 = vmatprep.subr.bf16.mxu1 %v7758_v28  ;;  %v7839_v27 = vld [vmem:[%s10733_s12 + $0x1a4] ss:$16 sps:$4 sm:$0xff]   ;;  %v7842_v28 = vld [vmem:[%s10733_s12 + $0x1ac] ss:$16 sps:$4 sm:$0xff]  }
 0x480   :  { %4095 = vmatpush1.bf16.msra.mxu0 %v7753_v59  ;;  %4136 = vmatpush1.bf16.msra.mxu1 %v7756_v33  ;;  %v7837_v59 = vld [vmem:[%s10733_s12 + $0x1a0] ss:$16 sps:$4 sm:$0xff]   ;;  %v7840_v33 = vld [vmem:[%s10733_s12 + $0x1a8] ss:$16 sps:$4 sm:$0xff]  }
 0x481   :  { %4970 = vmatprep.subr.bf16.mxu0 %v7761_v34  ;;  %5052 = vmatprep.subr.bf16.mxu1 %v7764_v35  ;;  %v7845_v34 = vld [vmem:[%s10733_s12 + $0x1c4] ss:$16 sps:$4 sm:$0xff]   ;;  %v7848_v35 = vld [vmem:[%s10733_s12 + $0x1cc] ss:$16 sps:$4 sm:$0xff]  }
 0x483   :  { %4097 = vmatmul.mubr.bf16.vlgmr.msra.gmra.mrb[24].mxu0 %v9706_v11  ;;  %4138 = vmatmul.mubr.bf16.vlgmr.msra.gmra.mrb[24].mxu1 %v9708_v14  ;;  %v7776_v11 = vld [vmem:[%s10733_s12 + $0x4c] ss:$16 sps:$4 sm:$0xff]   ;;  %v7771_v14 = vld [vmem:[%s10733_s12 + $0x40] ss:$16 sps:$4 sm:$0xff]  }
 0x484   :  { %4971 = vmatpush1.bf16.msra.mxu0 %v7759_v10  ;;  %5053 = vmatpush1.bf16.msra.mxu1 %v7762_v36  ;;  %v7843_v10 = vld [vmem:[%s10733_s12 + $0x1c0] ss:$16 sps:$4 sm:$0xff]   ;;  %v7846_v36 = vld [vmem:[%s10733_s12 + $0x1c8] ss:$16 sps:$4 sm:$0xff]  }
 0x485   :  { %4972 = vmatprep.subr.bf16.mxu0 %v7767_v38  ;;  %5054 = vmatprep.subr.bf16.mxu1 %v7770_v39  ;;  %v7851_v38 = vld [vmem:[%s10733_s12 + $0x1e4] ss:$16 sps:$4 sm:$0xff]   ;;  %v7854_v39 = vld [vmem:[%s10733_s12 + $0x1ec] ss:$16 sps:$4 sm:$0xff]  }
 0x488   :  { %4973 = vmatpush1.bf16.msra.mxu0 %v7765_v63  ;;  %5055 = vmatpush1.bf16.msra.mxu1 %v7768_v40  ;;  %v7849_v63 = vld [vmem:[%s10733_s12 + $0x1e0] ss:$16 sps:$4 sm:$0xff]   ;;  %v7852_v40 = vld [vmem:[%s10733_s12 + $0x1e8] ss:$16 sps:$4 sm:$0xff]  }
 0x489   :  { %4974 = vmatprep.subr.bf16.mxu0 %v7773_v41  ;;  %5056 = vmatprep.subr.bf16.mxu1 %v7776_v11  ;;  %v7857_v41 = vld [vmem:[%s10733_s12 + $0x204] ss:$16 sps:$4 sm:$0xff]   ;;  %v7860_v11 = vld [vmem:[%s10733_s12 + $0x20c] ss:$16 sps:$4 sm:$0xff]  }
 0x48c   :  { %4975 = vmatpush1.bf16.msra.mxu0 %v7771_v14  ;;  %5057 = vmatpush1.bf16.msra.mxu1 %v7774_v42  ;;  %v10103_v14 = vld [vmem:[%s10736_s11] sm:$0xf] }
 0x48d   :  { %4976 = vmatprep.subr.bf16.mxu0 %v7779_v43  ;;  %5058 = vmatprep.subr.bf16.mxu1 %v7782_v13 }
 0x490   :  { %4977 = vmatpush1.bf16.msra.mxu0 %v7777_v44  ;;  %5059 = vmatpush1.bf16.msra.mxu1 %v7780_v45  ;;  %v4151_v44 = vrot.slane %v10103_v14, %v8467_v29 }
 0x491   :  { %4978 = vmatprep.subr.bf16.mxu0 %v7785_v46  ;;  %5060 = vmatprep.subr.bf16.mxu1 %v7788_v12 }
 0x494   :  { %4979 = vmatpush1.bf16.msra.mxu0 %v7783_v47  ;;  %5061 = vmatpush1.bf16.msra.mxu1 %v7786_v18  ;;  %v4155_v47 = vrot.slane %v10103_v14, %v8475_v31 }
 0x495   :  { %4980 = vmatprep.subr.bf16.mxu0 %v7791_v48  ;;  %5062 = vmatprep.subr.bf16.mxu1 %v7794_v5 }
 0x498   :  { %4981 = vmatpush1.bf16.msra.mxu0 %v7789_v50  ;;  %5063 = vmatpush1.bf16.msra.mxu1 %v7792_v51 }
 0x499   :  { %4982 = vmatprep.subr.bf16.mxu0 %v7797_v23  ;;  %5064 = vmatprep.subr.bf16.mxu1 %v7800_v52 }
 0x49c   :  { %4983 = vmatpush1.bf16.msra.mxu0 %v7795_v53  ;;  %5065 = vmatpush1.bf16.msra.mxu1 %v7798_v4 }
 0x49d   :  { %4984 = vmatprep.subr.bf16.mxu0 %v7803_v54  ;;  %5066 = vmatprep.subr.bf16.mxu1 %v7806_v55  ;;  %v7855_v54 = vld [vmem:[%s10733_s12 + $0x200] ss:$16 sps:$4 sm:$0xff]   ;;  %v7863_v55 = vld [vmem:[%s10733_s12 + $0x224] ss:$16 sps:$4 sm:$0xff]  }
 0x4a0   :  { %4985 = vmatpush1.bf16.msra.mxu0 %v7801_v56  ;;  %5067 = vmatpush1.bf16.msra.mxu1 %v7804_v30 }
 0x4a1   :  { %4986 = vmatprep.subr.bf16.mxu0 %v7809_v57  ;;  %5068 = vmatprep.subr.bf16.mxu1 %v7812_v58  ;;  %v7866_v57 = vld [vmem:[%s10733_s12 + $0x22c] ss:$16 sps:$4 sm:$0xff]   ;;  %v7861_v58 = vld [vmem:[%s10733_s12 + $0x220] ss:$16 sps:$4 sm:$0xff]  }
 0x4a4   :  { %4987 = vmatpush1.bf16.msra.mxu0 %v7807_v60  ;;  %5069 = vmatpush1.bf16.msra.mxu1 %v7810_v37  ;;  %v7864_v60 = vld [vmem:[%s10733_s12 + $0x228] ss:$16 sps:$4 sm:$0xff]   ;;  %v7869_v37 = vld [vmem:[%s10733_s12 + $0x244] ss:$16 sps:$4 sm:$0xff]  }
 0x4a5   :  { %4988 = vmatprep.subr.bf16.mxu0 %v7815_v61  ;;  %5070 = vmatprep.subr.bf16.mxu1 %v7818_v62  ;;  %v7872_v61 = vld [vmem:[%s10733_s12 + $0x24c] ss:$16 sps:$4 sm:$0xff]   ;;  %v7867_v62 = vld [vmem:[%s10733_s12 + $0x240] ss:$16 sps:$4 sm:$0xff]  }
 0x4a8   :  { %4989 = vmatpush1.bf16.msra.mxu0 %v7813_v0  ;;  %5071 = vmatpush1.bf16.msra.mxu1 %v7816_v1  ;;  %v7870_v0 = vld [vmem:[%s10733_s12 + $0x248] ss:$16 sps:$4 sm:$0xff]   ;;  %v7875_v1 = vld [vmem:[%s10733_s12 + $0x264] ss:$16 sps:$4 sm:$0xff]  }
 0x4a9   :  { %4990 = vmatprep.subr.bf16.mxu0 %v7821_v2  ;;  %5072 = vmatprep.subr.bf16.mxu1 %v7824_v3  ;;  %v7878_v2 = vld [vmem:[%s10733_s12 + $0x26c] ss:$16 sps:$4 sm:$0xff]   ;;  %v7873_v3 = vld [vmem:[%s10733_s12 + $0x260] ss:$16 sps:$4 sm:$0xff]  }
 0x4ac   :  { %4991 = vmatpush1.bf16.msra.mxu0 %v7819_v6  ;;  %5073 = vmatpush1.bf16.msra.mxu1 %v7822_v7  ;;  %v7876_v6 = vld [vmem:[%s10733_s12 + $0x268] ss:$16 sps:$4 sm:$0xff]   ;;  %v7881_v7 = vld [vmem:[%s10733_s12 + $0x284] ss:$16 sps:$4 sm:$0xff]  }
 0x4ad   :  { %4992 = vmatprep.subr.bf16.mxu0 %v7827_v8  ;;  %5074 = vmatprep.subr.bf16.mxu1 %v7830_v9  ;;  %v7884_v8 = vld [vmem:[%s10733_s12 + $0x28c] ss:$16 sps:$4 sm:$0xff]   ;;  %v7879_v9 = vld [vmem:[%s10733_s12 + $0x280] ss:$16 sps:$4 sm:$0xff]  }
 0x4b0   :  { %4993 = vmatpush1.bf16.msra.mxu0 %v7825_v15  ;;  %5075 = vmatpush1.bf16.msra.mxu1 %v7828_v16  ;;  %v7882_v15 = vld [vmem:[%s10733_s12 + $0x288] ss:$16 sps:$4 sm:$0xff]   ;;  %v7887_v16 = vld [vmem:[%s10733_s12 + $0x2a4] ss:$16 sps:$4 sm:$0xff]  }
 0x4b1   :  { %4994 = vmatprep.subr.bf16.mxu0 %v7833_v22  ;;  %5076 = vmatprep.subr.bf16.mxu1 %v7836_v24  ;;  %v7890_v22 = vld [vmem:[%s10733_s12 + $0x2ac] ss:$16 sps:$4 sm:$0xff]   ;;  %v7885_v24 = vld [vmem:[%s10733_s12 + $0x2a0] ss:$16 sps:$4 sm:$0xff]  }
 0x4b4   :  { %4995 = vmatpush1.bf16.msra.mxu0 %v7831_v25  ;;  %5077 = vmatpush1.bf16.msra.mxu1 %v7834_v26  ;;  %v7888_v25 = vld [vmem:[%s10733_s12 + $0x2a8] ss:$16 sps:$4 sm:$0xff]   ;;  %v7893_v26 = vld [vmem:[%s10733_s12 + $0x2c4] ss:$16 sps:$4 sm:$0xff]  }
 0x4b5   :  { %4996 = vmatprep.subr.bf16.mxu0 %v7839_v27  ;;  %5078 = vmatprep.subr.bf16.mxu1 %v7842_v28  ;;  %v7896_v27 = vld [vmem:[%s10733_s12 + $0x2cc] ss:$16 sps:$4 sm:$0xff]   ;;  %v7891_v28 = vld [vmem:[%s10733_s12 + $0x2c0] ss:$16 sps:$4 sm:$0xff]  }
 0x4b8   :  { %4997 = vmatpush1.bf16.msra.mxu0 %v7837_v59  ;;  %5079 = vmatpush1.bf16.msra.mxu1 %v7840_v33  ;;  %v7894_v59 = vld [vmem:[%s10733_s12 + $0x2c8] ss:$16 sps:$4 sm:$0xff]   ;;  %v7899_v33 = vld [vmem:[%s10733_s12 + $0x2e4] ss:$16 sps:$4 sm:$0xff]  }
 0x4b9   :  { %4998 = vmatprep.subr.bf16.mxu0 %v7845_v34  ;;  %5080 = vmatprep.subr.bf16.mxu1 %v7848_v35  ;;  %v7902_v34 = vld [vmem:[%s10733_s12 + $0x2ec] ss:$16 sps:$4 sm:$0xff]   ;;  %v7897_v35 = vld [vmem:[%s10733_s12 + $0x2e0] ss:$16 sps:$4 sm:$0xff]  }
 0x4bc   :  { %4999 = vmatpush1.bf16.msra.mxu0 %v7843_v10  ;;  %5081 = vmatpush1.bf16.msra.mxu1 %v7846_v36  ;;  %v7900_v10 = vld [vmem:[%s10733_s12 + $0x2e8] ss:$16 sps:$4 sm:$0xff]   ;;  %v7905_v36 = vld [vmem:[%s10733_s12 + $0x304] ss:$16 sps:$4 sm:$0xff]  }
 0x4bd   :  { %5000 = vmatprep.subr.bf16.mxu0 %v7851_v38  ;;  %5082 = vmatprep.subr.bf16.mxu1 %v7854_v39  ;;  %v7908_v38 = vld [vmem:[%s10733_s12 + $0x30c] ss:$16 sps:$4 sm:$0xff]   ;;  %v7903_v39 = vld [vmem:[%s10733_s12 + $0x300] ss:$16 sps:$4 sm:$0xff]  }
 0x4c0   :  { %5001 = vmatpush1.bf16.msra.mxu0 %v7849_v63  ;;  %5083 = vmatpush1.bf16.msra.mxu1 %v7852_v40  ;;  %v7906_v63 = vld [vmem:[%s10733_s12 + $0x308] ss:$16 sps:$4 sm:$0xff]   ;;  %v7911_v40 = vld [vmem:[%s10733_s12 + $0x324] ss:$16 sps:$4 sm:$0xff]  }
 0x4c1   :  { %5011 = vmatprep.subr.bf16.mxu0 %v7857_v41  ;;  %5093 = vmatprep.subr.bf16.mxu1 %v7860_v11  ;;  %v7914_v41 = vld [vmem:[%s10733_s12 + $0x32c] ss:$16 sps:$4 sm:$0xff]   ;;  %v7909_v11 = vld [vmem:[%s10733_s12 + $0x320] ss:$16 sps:$4 sm:$0xff]  }
 0x516   :  { %v4016_v42 = vpop.f32.mrb[20].mxu0  ;;  %v4057_v43 = vpop.f32.mrb[20].mxu1 }
 0x517   :  { %v4017_v13 = vadd.f32 %v4016_v42, %v9716_v17  ;;  %v4018_v45 = vpop.f32.mrb[21].mxu0  ;;  %v4059_v46 = vpop.f32.mrb[21].mxu1  ;;  %v7912_v42 = vld [vmem:[%s10733_s12 + $0x328] ss:$16 sps:$4 sm:$0xff]  }
 0x518   :  { %v4019_v12 = vadd.f32 %v4018_v45, %v9722_v20  ;;  %v4020_v18 = vpop.f32.mrb[22].mxu0  ;;  %v4061_v48 = vpop.f32.mrb[22].mxu1  ;;  %v7858_v20 = vld [vmem:[%s10733_s12 + $0x208] ss:$16 sps:$4 sm:$0xff]  }
 0x519   :  { %v4058_v5 = vadd.f32 %v4057_v43, %v4017_v13  ;;  %v4021_v50 = vpop.f32.mrb[23].mxu0  ;;  %v4062_v51 = vpop.f32.mrb[23].mxu1  ;;  %v7917_v43 = vld [vmem:[%s10733_s12 + $0x344] ss:$16 sps:$4 sm:$0xff]   ;;  %v7920_v13 = vld [vmem:[%s10733_s12 + $0x34c] ss:$16 sps:$4 sm:$0xff]  }
 0x51a   :  { %v4060_v23 = vadd.f32 %v4059_v46, %v4019_v12  ;;  %v7918_v45 = vld [vmem:[%s10733_s12 + $0x348] ss:$16 sps:$4 sm:$0xff]   ;;  %v7923_v46 = vld [vmem:[%s10733_s12 + $0x364] ss:$16 sps:$4 sm:$0xff]   ;;  %v7926_v12 = vld [vmem:[%s10733_s12 + $0x36c] ss:$16 sps:$4 sm:$0xff]  }
 0x51b   :  { %v4168_v52 = vadd.f32 %v4151_v44, %v4058_v5  ;;  %v7915_v44 = vld [vmem:[%s10733_s12 + $0x340] ss:$16 sps:$4 sm:$0xff]   ;;  %v7924_v18 = vld [vmem:[%s10733_s12 + $0x368] ss:$16 sps:$4 sm:$0xff]   ;;  %v7929_v48 = vld [vmem:[%s10733_s12 + $0x384] ss:$16 sps:$4 sm:$0xff]  }
 0x51c   :  { %v4169_v53 = vadd.f32 %v4155_v47, %v4060_v23  ;;  %v7921_v47 = vld [vmem:[%s10733_s12 + $0x360] ss:$16 sps:$4 sm:$0xff]   ;;  %v7932_v5 = vld [vmem:[%s10733_s12 + $0x38c] ss:$16 sps:$4 sm:$0xff]   ;;  %v7930_v51 = vld [vmem:[%s10733_s12 + $0x388] ss:$16 sps:$4 sm:$0xff]  }
 0x51d   :  { %v4172_v4 = vmax.f32 %v4168_v52, 0.0  ;;  %v7927_v50 = vld [vmem:[%s10733_s12 + $0x380] ss:$16 sps:$4 sm:$0xff]   ;;  %v7935_v23 = vld [vmem:[%s10733_s12 + $0x3a4] ss:$16 sps:$4 sm:$0xff]  }
 0x51e   :  { %v4173_v17 = vmax.f32 %v4169_v53, 0.0  ;;  %v7938_v52 = vld [vmem:[%s10733_s12 + $0x3ac] ss:$16 sps:$4 sm:$0xff]   ;;  %v7933_v53 = vld [vmem:[%s10733_s12 + $0x3a0] ss:$16 sps:$4 sm:$0xff]  }
 0x51f   :  { %v4176_v30 = vpack.c.bf16 %v4172_v4, %v4172_v4  ;;  %v7936_v4 = vld [vmem:[%s10733_s12 + $0x3a8] ss:$16 sps:$4 sm:$0xff]  }
 0x520   :  { %v4177_v56 = vpack.c.bf16 %v4173_v17, %v4173_v17  ;;  %v7941_v17 = vld [vmem:[%s10733_s12 + $0x3c4] ss:$16 sps:$4 sm:$0xff]  }
 0x522   :  { %5002 = vmatprep.mubr.bf16.mxu0 %v4177_v56  ;;  %5084 = vmatprep.mubr.bf16.mxu1 %v4177_v56 }
 0x523   :  { %5003 = vmatmul.mubr.bf16.vlgmr.msra.gmra.mrb[28].mxu0 %v4176_v30  ;;  %5085 = vmatmul.mubr.bf16.vlgmr.msra.gmra.mrb[28].mxu1 %v4176_v30  ;;  %v4159_v30 = vrot.slane %v10103_v14, %v8639_v49 }
 0x524   :  { %5012 = vmatpush1.bf16.msra.mxu0 %v7855_v54  ;;  %5094 = vmatpush1.bf16.msra.mxu1 %v7858_v20  ;;  %v7944_v54 = vld [vmem:[%s10733_s12 + $0x3cc] ss:$16 sps:$4 sm:$0xff]  }
 0x525   :  { %5013 = vmatprep.subr.bf16.mxu0 %v7863_v55  ;;  %5095 = vmatprep.subr.bf16.mxu1 %v7866_v57 }
 0x528   :  { %5014 = vmatpush1.bf16.msra.mxu0 %v7861_v58  ;;  %5096 = vmatpush1.bf16.msra.mxu1 %v7864_v60 }
 0x529   :  { %5015 = vmatprep.subr.bf16.mxu0 %v7869_v37  ;;  %5097 = vmatprep.subr.bf16.mxu1 %v7872_v61  ;;  %v4163_v37 = vrot.slane %v10103_v14, %v8478_v32  ;;  %v7950_v14 = vld [vmem:[%s10733_s12 + $0x3ec] ss:$16 sps:$4 sm:$0xff]  }
 0x52c   :  { %5016 = vmatpush1.bf16.msra.mxu0 %v7867_v62  ;;  %5098 = vmatpush1.bf16.msra.mxu1 %v7870_v0  ;;  %v7939_v0 = vld [vmem:[%s10733_s12 + $0x3c0] ss:$16 sps:$4 sm:$0xff]  }
 0x52d   :  { %5017 = vmatprep.subr.bf16.mxu0 %v7875_v1  ;;  %5099 = vmatprep.subr.bf16.mxu1 %v7878_v2 }
 0x530   :  { %5018 = vmatpush1.bf16.msra.mxu0 %v7873_v3  ;;  %5100 = vmatpush1.bf16.msra.mxu1 %v7876_v6 }
 0x531   :  { %5019 = vmatprep.subr.bf16.mxu0 %v7881_v7  ;;  %5101 = vmatprep.subr.bf16.mxu1 %v7884_v8 }
 0x534   :  { %5020 = vmatpush1.bf16.msra.mxu0 %v7879_v9  ;;  %5102 = vmatpush1.bf16.msra.mxu1 %v7882_v15  ;;  %v7945_v9 = vld [vmem:[%s10733_s12 + $0x3e0] ss:$16 sps:$4 sm:$0xff]   ;;  %v7948_v15 = vld [vmem:[%s10733_s12 + $0x3e8] ss:$16 sps:$4 sm:$0xff]  }
 0x535   :  { %5021 = vmatprep.subr.bf16.mxu0 %v7887_v16  ;;  %5103 = vmatprep.subr.bf16.mxu1 %v7890_v22  ;;  %v7953_v22 = vld [vmem:[%s10735_s14 + $0x4] ss:$16 sps:$4 sm:$0xff]  }
 0x538   :  { %5022 = vmatpush1.bf16.msra.mxu0 %v7885_v24  ;;  %5104 = vmatpush1.bf16.msra.mxu1 %v7888_v25  ;;  %v7956_v24 = vld [vmem:[%s10735_s14 + $0xc] ss:$16 sps:$4 sm:$0xff]  }
 0x539   :  { %5023 = vmatprep.subr.bf16.mxu0 %v7893_v26  ;;  %5105 = vmatprep.subr.bf16.mxu1 %v7896_v27  ;;  %v7951_v27 = vld [vmem:[%s10735_s14] ss:$16 sps:$4 sm:$0xff]  }
 0x53c   :  { %5024 = vmatpush1.bf16.msra.mxu0 %v7891_v28  ;;  %5106 = vmatpush1.bf16.msra.mxu1 %v7894_v59  ;;  %v7954_v28 = vld [vmem:[%s10735_s14 + $0x8] ss:$16 sps:$4 sm:$0xff]  }
 0x53d   :  { %5025 = vmatprep.subr.bf16.mxu0 %v7899_v33  ;;  %5107 = vmatprep.subr.bf16.mxu1 %v7902_v34  ;;  %v7959_v33 = vld [vmem:[%s10735_s14 + $0x24] ss:$16 sps:$4 sm:$0xff]   ;;  %v7962_v34 = vld [vmem:[%s10735_s14 + $0x2c] ss:$16 sps:$4 sm:$0xff]  }
 0x540   :  { %5026 = vmatpush1.bf16.msra.mxu0 %v7897_v35  ;;  %5108 = vmatpush1.bf16.msra.mxu1 %v7900_v10  ;;  %v7957_v35 = vld [vmem:[%s10735_s14 + $0x20] ss:$16 sps:$4 sm:$0xff]   ;;  %v7960_v10 = vld [vmem:[%s10735_s14 + $0x28] ss:$16 sps:$4 sm:$0xff]  }
 0x541   :  { %5027 = vmatprep.subr.bf16.mxu0 %v7905_v36  ;;  %5109 = vmatprep.subr.bf16.mxu1 %v7908_v38  ;;  %v7965_v36 = vld [vmem:[%s10735_s14 + $0x44] ss:$16 sps:$4 sm:$0xff]   ;;  %v7968_v38 = vld [vmem:[%s10735_s14 + $0x4c] ss:$16 sps:$4 sm:$0xff]  }
 0x544   :  { %5028 = vmatpush1.bf16.msra.mxu0 %v7903_v39  ;;  %5110 = vmatpush1.bf16.msra.mxu1 %v7906_v63  ;;  %v7963_v39 = vld [vmem:[%s10735_s14 + $0x40] ss:$16 sps:$4 sm:$0xff]   ;;  %v7966_v63 = vld [vmem:[%s10735_s14 + $0x48] ss:$16 sps:$4 sm:$0xff]  }
 0x545   :  { %5029 = vmatprep.subr.bf16.mxu0 %v7911_v40  ;;  %5111 = vmatprep.subr.bf16.mxu1 %v7914_v41  ;;  %v7971_v40 = vld [vmem:[%s10735_s14 + $0x64] ss:$16 sps:$4 sm:$0xff]   ;;  %v7974_v41 = vld [vmem:[%s10735_s14 + $0x6c] ss:$16 sps:$4 sm:$0xff]  }
 0x548   :  { %5030 = vmatpush1.bf16.msra.mxu0 %v7909_v11  ;;  %5112 = vmatpush1.bf16.msra.mxu1 %v7912_v42  ;;  %v7969_v11 = vld [vmem:[%s10735_s14 + $0x60] ss:$16 sps:$4 sm:$0xff]   ;;  %v7972_v42 = vld [vmem:[%s10735_s14 + $0x68] ss:$16 sps:$4 sm:$0xff]  }
 0x549   :  { %5031 = vmatprep.subr.bf16.mxu0 %v7917_v43  ;;  %5113 = vmatprep.subr.bf16.mxu1 %v7920_v13  ;;  %v7977_v43 = vld [vmem:[%s10735_s14 + $0x84] ss:$16 sps:$4 sm:$0xff]   ;;  %v7980_v13 = vld [vmem:[%s10735_s14 + $0x8c] ss:$16 sps:$4 sm:$0xff]  }
 0x54c   :  { %5032 = vmatpush1.bf16.msra.mxu0 %v7915_v44  ;;  %5114 = vmatpush1.bf16.msra.mxu1 %v7918_v45  ;;  %v7975_v44 = vld [vmem:[%s10735_s14 + $0x80] ss:$16 sps:$4 sm:$0xff]   ;;  %v7978_v45 = vld [vmem:[%s10735_s14 + $0x88] ss:$16 sps:$4 sm:$0xff]  }
 0x54d   :  { %5033 = vmatprep.subr.bf16.mxu0 %v7923_v46  ;;  %5115 = vmatprep.subr.bf16.mxu1 %v7926_v12  ;;  %v7983_v46 = vld [vmem:[%s10735_s14 + $0xa4] ss:$16 sps:$4 sm:$0xff]   ;;  %v7986_v12 = vld [vmem:[%s10735_s14 + $0xac] ss:$16 sps:$4 sm:$0xff]  }
 0x550   :  { %5034 = vmatpush1.bf16.msra.mxu0 %v7921_v47  ;;  %5116 = vmatpush1.bf16.msra.mxu1 %v7924_v18  ;;  %v7981_v47 = vld [vmem:[%s10735_s14 + $0xa0] ss:$16 sps:$4 sm:$0xff]   ;;  %v7984_v18 = vld [vmem:[%s10735_s14 + $0xa8] ss:$16 sps:$4 sm:$0xff]  }
 0x551   :  { %5035 = vmatprep.subr.bf16.mxu0 %v7929_v48  ;;  %5117 = vmatprep.subr.bf16.mxu1 %v7932_v5  ;;  %v7989_v48 = vld [vmem:[%s10735_s14 + $0xc4] ss:$16 sps:$4 sm:$0xff]   ;;  %v7992_v5 = vld [vmem:[%s10735_s14 + $0xcc] ss:$16 sps:$4 sm:$0xff]  }
 0x554   :  { %5036 = vmatpush1.bf16.msra.mxu0 %v7927_v50  ;;  %5118 = vmatpush1.bf16.msra.mxu1 %v7930_v51  ;;  %v7987_v50 = vld [vmem:[%s10735_s14 + $0xc0] ss:$16 sps:$4 sm:$0xff]   ;;  %v7990_v51 = vld [vmem:[%s10735_s14 + $0xc8] ss:$16 sps:$4 sm:$0xff]  }
 0x555   :  { %5037 = vmatprep.subr.bf16.mxu0 %v7935_v23  ;;  %5119 = vmatprep.subr.bf16.mxu1 %v7938_v52  ;;  %v7995_v23 = vld [vmem:[%s10735_s14 + $0xe4] ss:$16 sps:$4 sm:$0xff]   ;;  %v7998_v52 = vld [vmem:[%s10735_s14 + $0xec] ss:$16 sps:$4 sm:$0xff]  }
 0x556   :  { %v4098_v20 = vpop.f32.mrb[24].mxu0  ;;  %v4139_v55 = vpop.f32.mrb[24].mxu1 }
 0x557   :  { %v4099_v56 = vadd.f32 %v4098_v20, %v9718_v19  ;;  %v4100_v57 = vpop.f32.mrb[25].mxu0  ;;  %v4141_v58 = vpop.f32.mrb[25].mxu1  ;;  %v7942_v19 = vld [vmem:[%s10733_s12 + $0x3c8] ss:$16 sps:$4 sm:$0xff]   ;;  %v7999_v20 = vld [vmem:[%s10735_s14 + $0x100] ss:$16 sps:$4 sm:$0xff]  }
 0x558   :  { %v4101_v60 = vadd.f32 %v4100_v57, %v9724_v21  ;;  %v4102_v61 = vpop.f32.mrb[26].mxu0  ;;  %v4143_v62 = vpop.f32.mrb[26].mxu1  ;;  %5038 = vmatpush1.bf16.msra.mxu0 %v7933_v53  ;;  %5120 = vmatpush1.bf16.msra.mxu1 %v7936_v4  ;;  %v7947_v21 = vld [vmem:[%s10733_s12 + $0x3e4] ss:$16 sps:$4 sm:$0xff]   ;;  %v7993_v53 = vld [vmem:[%s10735_s14 + $0xe0] ss:$16 sps:$4 sm:$0xff]  }
 0x559   :  { %v4140_v1 = vadd.f32 %v4139_v55, %v4099_v56  ;;  %v4103_v2 = vpop.f32.mrb[27].mxu0  ;;  %v4144_v3 = vpop.f32.mrb[27].mxu1  ;;  %5039 = vmatprep.subr.bf16.mxu0 %v7941_v17  ;;  %5121 = vmatprep.subr.bf16.mxu1 %v7944_v54  ;;  %v7996_v4 = vld [vmem:[%s10735_s14 + $0xe8] ss:$16 sps:$4 sm:$0xff]   ;;  %v8001_v17 = vld [vmem:[%s10735_s14 + $0x104] ss:$16 sps:$4 sm:$0xff]  }
 0x55a   :  { %v4142_v6 = vadd.f32 %v4141_v58, %v4101_v60  ;;  %v8004_v54 = vld [vmem:[%s10735_s14 + $0x10c] ss:$16 sps:$4 sm:$0xff]   ;;  %v8002_v55 = vld [vmem:[%s10735_s14 + $0x108] ss:$16 sps:$4 sm:$0xff]   ;;  %v8007_v56 = vld [vmem:[%s10735_s14 + $0x124] ss:$16 sps:$4 sm:$0xff]  }
 0x55b   :  { %v4170_v7 = vadd.f32 %v4159_v30, %v4140_v1  ;;  %v8010_v30 = vld [vmem:[%s10735_s14 + $0x12c] ss:$16 sps:$4 sm:$0xff]   ;;  %v8005_v57 = vld [vmem:[%s10735_s14 + $0x120] ss:$16 sps:$4 sm:$0xff]   ;;  %v8008_v58 = vld [vmem:[%s10735_s14 + $0x128] ss:$16 sps:$4 sm:$0xff]  }
 0x55c   :  { %v4171_v8 = vadd.f32 %v4163_v37, %v4142_v6  ;;  %5040 = vmatpush1.bf16.msra.mxu0 %v7939_v0  ;;  %5122 = vmatpush1.bf16.msra.mxu1 %v7942_v19  ;;  %v8013_v60 = vld [vmem:[%s10735_s14 + $0x144] ss:$16 sps:$4 sm:$0xff]   ;;  %v8016_v37 = vld [vmem:[%s10735_s14 + $0x14c] ss:$16 sps:$4 sm:$0xff]   ;;  %v8011_v61 = vld [vmem:[%s10735_s14 + $0x140] ss:$16 sps:$4 sm:$0xff]  }
 0x55d   :  { %v4174_v16 = vmax.f32 %v4170_v7, 0.0  ;;  %5041 = vmatprep.subr.bf16.mxu0 %v7947_v21  ;;  %5123 = vmatprep.subr.bf16.mxu1 %v7950_v14  ;;  %v8014_v62 = vld [vmem:[%s10735_s14 + $0x148] ss:$16 sps:$4 sm:$0xff]   ;;  %v8019_v0 = vld [vmem:[%s10735_s14 + $0x164] ss:$16 sps:$4 sm:$0xff]  }
 0x55e   :  { %v4175_v25 = vmax.f32 %v4171_v8, 0.0  ;;  %v8022_v19 = vld [vmem:[%s10735_s14 + $0x16c] ss:$16 sps:$4 sm:$0xff]   ;;  %v8017_v1 = vld [vmem:[%s10735_s14 + $0x160] ss:$16 sps:$4 sm:$0xff]  }
 0x55f   :  { %v4178_v59 = vpack.c.bf16 %v4174_v16, %v4174_v16  ;;  %v8020_v2 = vld [vmem:[%s10735_s14 + $0x168] ss:$16 sps:$4 sm:$0xff]   ;;  %v8025_v3 = vld [vmem:[%s10735_s14 + $0x184] ss:$16 sps:$4 sm:$0xff]   ;;  %v8028_v21 = vld [vmem:[%s10735_s14 + $0x18c] ss:$16 sps:$4 sm:$0xff]  }
 0x560   :  { %v4179_v26 = vpack.c.bf16 %v4175_v25, %v4175_v25  ;;  %5042 = vmatpush1.bf16.msra.mxu0 %v7945_v9  ;;  %5124 = vmatpush1.bf16.msra.mxu1 %v7948_v15  ;;  %v8023_v14 = vld [vmem:[%s10735_s14 + $0x180] ss:$16 sps:$4 sm:$0xff]   ;;  %v8026_v6 = vld [vmem:[%s10735_s14 + $0x188] ss:$16 sps:$4 sm:$0xff]   ;;  %v8031_v7 = vld [vmem:[%s10735_s14 + $0x1a4] ss:$16 sps:$4 sm:$0xff]  }
 0x561   :  { %5932 = vmatprep.subr.bf16.mxu0 %v7953_v22  ;;  %6014 = vmatprep.subr.bf16.mxu1 %v7956_v24  ;;  %v8034_v8 = vld [vmem:[%s10735_s14 + $0x1ac] ss:$16 sps:$4 sm:$0xff]   ;;  %v8029_v9 = vld [vmem:[%s10735_s14 + $0x1a0] ss:$16 sps:$4 sm:$0xff]   ;;  %v8032_v15 = vld [vmem:[%s10735_s14 + $0x1a8] ss:$16 sps:$4 sm:$0xff]  }
 0x562   :  { %5043 = vmatprep.mubr.bf16.mxu0 %v4179_v26  ;;  %5125 = vmatprep.mubr.bf16.mxu1 %v4179_v26  ;;  %v8037_v16 = vld [vmem:[%s10735_s14 + $0x1c4] ss:$16 sps:$4 sm:$0xff]   ;;  %v8040_v22 = vld [vmem:[%s10735_s14 + $0x1cc] ss:$16 sps:$4 sm:$0xff]   ;;  %v8035_v24 = vld [vmem:[%s10735_s14 + $0x1c0] ss:$16 sps:$4 sm:$0xff]  }
 0x563   :  { %5044 = vmatmul.mubr.bf16.vlgmr.msra.gmra.mrb[28].mxu0 %v4178_v59  ;;  %5126 = vmatmul.mubr.bf16.vlgmr.msra.gmra.mrb[28].mxu1 %v4178_v59  ;;  %v8038_v25 = vld [vmem:[%s10735_s14 + $0x1c8] ss:$16 sps:$4 sm:$0xff]   ;;  %v8043_v26 = vld [vmem:[%s10735_s14 + $0x1e4] ss:$16 sps:$4 sm:$0xff]  }
 0x564   :  { %5933 = vmatpush1.bf16.msra.mxu0 %v7951_v27  ;;  %6015 = vmatpush1.bf16.msra.mxu1 %v7954_v28  ;;  %v8046_v27 = vld [vmem:[%s10735_s14 + $0x1ec] ss:$16 sps:$4 sm:$0xff]   ;;  %v8041_v28 = vld [vmem:[%s10735_s14 + $0x1e0] ss:$16 sps:$4 sm:$0xff]   ;;  %v8044_v59 = vld [vmem:[%s10735_s14 + $0x1e8] ss:$16 sps:$4 sm:$0xff]  }
 0x565   :  { %5934 = vmatprep.subr.bf16.mxu0 %v7959_v33  ;;  %6016 = vmatprep.subr.bf16.mxu1 %v7962_v34  ;;  %v8049_v33 = vld [vmem:[%s10735_s14 + $0x204] ss:$16 sps:$4 sm:$0xff]   ;;  %v8052_v34 = vld [vmem:[%s10735_s14 + $0x20c] ss:$16 sps:$4 sm:$0xff]  }
 0x568   :  { %5935 = vmatpush1.bf16.msra.mxu0 %v7957_v35  ;;  %6017 = vmatpush1.bf16.msra.mxu1 %v7960_v10  ;;  %v10504_v35 = vld [vmem:[%s10737_s13] sm:$0xf] }
 0x569   :  { %5936 = vmatprep.subr.bf16.mxu0 %v7965_v36  ;;  %6018 = vmatprep.subr.bf16.mxu1 %v7968_v38  ;;  %v4313_v10 = vrot.slane %v10504_v35, %v8467_v29  ;;  %v4317_v36 = vrot.slane %v10504_v35, %v8475_v31  ;;  %v4325_v38 = vrot.slane %v10504_v35, %v8478_v32 }
 0x56c   :  { %5937 = vmatpush1.bf16.msra.mxu0 %v7963_v39  ;;  %6019 = vmatpush1.bf16.msra.mxu1 %v7966_v63 }
 0x56d   :  { %5938 = vmatprep.subr.bf16.mxu0 %v7971_v40  ;;  %6020 = vmatprep.subr.bf16.mxu1 %v7974_v41 }
 0x570   :  { %5939 = vmatpush1.bf16.msra.mxu0 %v7969_v11  ;;  %6021 = vmatpush1.bf16.msra.mxu1 %v7972_v42 }
 0x571   :  { %5940 = vmatprep.subr.bf16.mxu0 %v7977_v43  ;;  %6022 = vmatprep.subr.bf16.mxu1 %v7980_v13 }
 0x574   :  { %5941 = vmatpush1.bf16.msra.mxu0 %v7975_v44  ;;  %6023 = vmatpush1.bf16.msra.mxu1 %v7978_v45 }
 0x575   :  { %5942 = vmatprep.subr.bf16.mxu0 %v7983_v46  ;;  %6024 = vmatprep.subr.bf16.mxu1 %v7986_v12 }
 0x578   :  { %5943 = vmatpush1.bf16.msra.mxu0 %v7981_v47  ;;  %6025 = vmatpush1.bf16.msra.mxu1 %v7984_v18 }
 0x579   :  { %5944 = vmatprep.subr.bf16.mxu0 %v7989_v48  ;;  %6026 = vmatprep.subr.bf16.mxu1 %v7992_v5  ;;  %v8047_v5 = vld [vmem:[%s10735_s14 + $0x200] ss:$16 sps:$4 sm:$0xff]  }
 0x57c   :  { %5945 = vmatpush1.bf16.msra.mxu0 %v7987_v50  ;;  %6027 = vmatpush1.bf16.msra.mxu1 %v7990_v51  ;;  %v8050_v50 = vld [vmem:[%s10735_s14 + $0x208] ss:$16 sps:$4 sm:$0xff]  }
 0x57d   :  { %5946 = vmatprep.subr.bf16.mxu0 %v7995_v23  ;;  %6028 = vmatprep.subr.bf16.mxu1 %v7998_v52  ;;  %v8055_v23 = vld [vmem:[%s10735_s14 + $0x224] ss:$16 sps:$4 sm:$0xff]   ;;  %v8058_v52 = vld [vmem:[%s10735_s14 + $0x22c] ss:$16 sps:$4 sm:$0xff]  }
 0x580   :  { %5947 = vmatpush1.bf16.msra.mxu0 %v7993_v53  ;;  %6029 = vmatpush1.bf16.msra.mxu1 %v7996_v4  ;;  %v8053_v4 = vld [vmem:[%s10735_s14 + $0x220] ss:$16 sps:$4 sm:$0xff]  }
 0x581   :  { %5948 = vmatprep.subr.bf16.mxu0 %v8001_v17  ;;  %6030 = vmatprep.subr.bf16.mxu1 %v8004_v54  ;;  %v8056_v17 = vld [vmem:[%s10735_s14 + $0x228] ss:$16 sps:$4 sm:$0xff]   ;;  %v8061_v54 = vld [vmem:[%s10735_s14 + $0x244] ss:$16 sps:$4 sm:$0xff]  }
 0x584   :  { %5949 = vmatpush1.bf16.msra.mxu0 %v7999_v20  ;;  %6031 = vmatpush1.bf16.msra.mxu1 %v8002_v55  ;;  %v8064_v20 = vld [vmem:[%s10735_s14 + $0x24c] ss:$16 sps:$4 sm:$0xff]   ;;  %v8059_v55 = vld [vmem:[%s10735_s14 + $0x240] ss:$16 sps:$4 sm:$0xff]  }
 0x585   :  { %5950 = vmatprep.subr.bf16.mxu0 %v8007_v56  ;;  %6032 = vmatprep.subr.bf16.mxu1 %v8010_v30  ;;  %v8062_v56 = vld [vmem:[%s10735_s14 + $0x248] ss:$16 sps:$4 sm:$0xff]   ;;  %v8067_v30 = vld [vmem:[%s10735_s14 + $0x264] ss:$16 sps:$4 sm:$0xff]  }
 0x588   :  { %5951 = vmatpush1.bf16.msra.mxu0 %v8005_v57  ;;  %6033 = vmatpush1.bf16.msra.mxu1 %v8008_v58  ;;  %v8070_v57 = vld [vmem:[%s10735_s14 + $0x26c] ss:$16 sps:$4 sm:$0xff]   ;;  %v8065_v58 = vld [vmem:[%s10735_s14 + $0x260] ss:$16 sps:$4 sm:$0xff]  }
 0x589   :  { %5952 = vmatprep.subr.bf16.mxu0 %v8013_v60  ;;  %6034 = vmatprep.subr.bf16.mxu1 %v8016_v37  ;;  %v8068_v60 = vld [vmem:[%s10735_s14 + $0x268] ss:$16 sps:$4 sm:$0xff]   ;;  %v8073_v37 = vld [vmem:[%s10735_s14 + $0x284] ss:$16 sps:$4 sm:$0xff]  }
 0x58c   :  { %5953 = vmatpush1.bf16.msra.mxu0 %v8011_v61  ;;  %6035 = vmatpush1.bf16.msra.mxu1 %v8014_v62  ;;  %v8076_v61 = vld [vmem:[%s10735_s14 + $0x28c] ss:$16 sps:$4 sm:$0xff]   ;;  %v8071_v62 = vld [vmem:[%s10735_s14 + $0x280] ss:$16 sps:$4 sm:$0xff]  }
 0x58d   :  { %5954 = vmatprep.subr.bf16.mxu0 %v8019_v0  ;;  %6036 = vmatprep.subr.bf16.mxu1 %v8022_v19  ;;  %v8074_v0 = vld [vmem:[%s10735_s14 + $0x288] ss:$16 sps:$4 sm:$0xff]   ;;  %v8079_v19 = vld [vmem:[%s10735_s14 + $0x2a4] ss:$16 sps:$4 sm:$0xff]  }
 0x590   :  { %5955 = vmatpush1.bf16.msra.mxu0 %v8017_v1  ;;  %6037 = vmatpush1.bf16.msra.mxu1 %v8020_v2  ;;  %v8082_v1 = vld [vmem:[%s10735_s14 + $0x2ac] ss:$16 sps:$4 sm:$0xff]   ;;  %v8077_v2 = vld [vmem:[%s10735_s14 + $0x2a0] ss:$16 sps:$4 sm:$0xff]  }
 0x591   :  { %5956 = vmatprep.subr.bf16.mxu0 %v8025_v3  ;;  %6038 = vmatprep.subr.bf16.mxu1 %v8028_v21  ;;  %v8080_v3 = vld [vmem:[%s10735_s14 + $0x2a8] ss:$16 sps:$4 sm:$0xff]   ;;  %v8085_v21 = vld [vmem:[%s10735_s14 + $0x2c4] ss:$16 sps:$4 sm:$0xff]  }
 0x594   :  { %5957 = vmatpush1.bf16.msra.mxu0 %v8023_v14  ;;  %6039 = vmatpush1.bf16.msra.mxu1 %v8026_v6  ;;  %v8088_v14 = vld [vmem:[%s10735_s14 + $0x2cc] ss:$16 sps:$4 sm:$0xff]   ;;  %v8083_v6 = vld [vmem:[%s10735_s14 + $0x2c0] ss:$16 sps:$4 sm:$0xff]  }
 0x595   :  { %5958 = vmatprep.subr.bf16.mxu0 %v8031_v7  ;;  %6040 = vmatprep.subr.bf16.mxu1 %v8034_v8  ;;  %v8086_v7 = vld [vmem:[%s10735_s14 + $0x2c8] ss:$16 sps:$4 sm:$0xff]   ;;  %v8091_v8 = vld [vmem:[%s10735_s14 + $0x2e4] ss:$16 sps:$4 sm:$0xff]  }
 0x598   :  { %5959 = vmatpush1.bf16.msra.mxu0 %v8029_v9  ;;  %6041 = vmatpush1.bf16.msra.mxu1 %v8032_v15  ;;  %v8094_v9 = vld [vmem:[%s10735_s14 + $0x2ec] ss:$16 sps:$4 sm:$0xff]   ;;  %v8089_v15 = vld [vmem:[%s10735_s14 + $0x2e0] ss:$16 sps:$4 sm:$0xff]  }
 0x599   :  { %5960 = vmatprep.subr.bf16.mxu0 %v8037_v16  ;;  %6042 = vmatprep.subr.bf16.mxu1 %v8040_v22  ;;  %v8092_v16 = vld [vmem:[%s10735_s14 + $0x2e8] ss:$16 sps:$4 sm:$0xff]   ;;  %v8097_v22 = vld [vmem:[%s10735_s14 + $0x304] ss:$16 sps:$4 sm:$0xff]  }
 0x59c   :  { %5961 = vmatpush1.bf16.msra.mxu0 %v8035_v24  ;;  %6043 = vmatpush1.bf16.msra.mxu1 %v8038_v25  ;;  %v8100_v24 = vld [vmem:[%s10735_s14 + $0x30c] ss:$16 sps:$4 sm:$0xff]   ;;  %v8095_v25 = vld [vmem:[%s10735_s14 + $0x300] ss:$16 sps:$4 sm:$0xff]  }
 0x59d   :  { %5962 = vmatprep.subr.bf16.mxu0 %v8043_v26  ;;  %6044 = vmatprep.subr.bf16.mxu1 %v8046_v27  ;;  %v8098_v26 = vld [vmem:[%s10735_s14 + $0x308] ss:$16 sps:$4 sm:$0xff]   ;;  %v8103_v27 = vld [vmem:[%s10735_s14 + $0x324] ss:$16 sps:$4 sm:$0xff]  }
 0x5a0   :  { %5963 = vmatpush1.bf16.msra.mxu0 %v8041_v28  ;;  %6045 = vmatpush1.bf16.msra.mxu1 %v8044_v59  ;;  %v8106_v28 = vld [vmem:[%s10735_s14 + $0x32c] ss:$16 sps:$4 sm:$0xff]   ;;  %v8101_v59 = vld [vmem:[%s10735_s14 + $0x320] ss:$16 sps:$4 sm:$0xff]  }
 0x5a1   :  { %5973 = vmatprep.subr.bf16.mxu0 %v8049_v33  ;;  %6055 = vmatprep.subr.bf16.mxu1 %v8052_v34  ;;  %v8104_v33 = vld [vmem:[%s10735_s14 + $0x328] ss:$16 sps:$4 sm:$0xff]   ;;  %v8109_v34 = vld [vmem:[%s10735_s14 + $0x344] ss:$16 sps:$4 sm:$0xff]  }
 0x636   :  { %v5045_v39 = vpop.f32.mrb[28].mxu0  ;;  %v10512_v63 = vpop.f32.mrb[28].mxu1 }
 0x637   :  { %v6938_v40 = vadd.f32 %v5045_v39, %v4313_v10  ;;  %v5047_v41 = vpop.f32.mrb[29].mxu0  ;;  %v5129_v11 = vpop.f32.mrb[29].mxu1  ;;  %v8112_v10 = vld [vmem:[%s10735_s14 + $0x34c] ss:$16 sps:$4 sm:$0xff]   ;;  %v8115_v39 = vld [vmem:[%s10735_s14 + $0x364] ss:$16 sps:$4 sm:$0xff]  }
 0x638   :  { %v6939_v42 = vadd.f32 %v5047_v41, %v4317_v36  ;;  %v6941_v43 = vadd.f32 %v5129_v11, %v4325_v38  ;;  %v5049_v13 = vpop.f32.mrb[30].mxu0  ;;  %v5131_v44 = vpop.f32.mrb[30].mxu1  ;;  %v8107_v36 = vld [vmem:[%s10735_s14 + $0x340] ss:$16 sps:$4 sm:$0xff]   ;;  %v8110_v38 = vld [vmem:[%s10735_s14 + $0x348] ss:$16 sps:$4 sm:$0xff]  }
 0x639   :  { %v5134_v45 = vmax.f32 %v6938_v40, 0.0  ;;  %v5050_v46 = vpop.f32.mrb[31].mxu0  ;;  %v5132_v12 = vpop.f32.mrb[31].mxu1  ;;  %v8118_v40 = vld [vmem:[%s10735_s14 + $0x36c] ss:$16 sps:$4 sm:$0xff]  }
 0x63a   :  { %v5135_v47 = vmax.f32 %v6939_v42, 0.0  ;;  %v5137_v18 = vmax.f32 %v6941_v43, 0.0  ;;  %v8113_v41 = vld [vmem:[%s10735_s14 + $0x360] ss:$16 sps:$4 sm:$0xff]   ;;  %v8116_v11 = vld [vmem:[%s10735_s14 + $0x368] ss:$16 sps:$4 sm:$0xff]  }
 0x63b   :  { %v5138_v51 = vpack.c.bf16 %v5134_v45, %v5134_v45  ;;  %v8121_v42 = vld [vmem:[%s10735_s14 + $0x384] ss:$16 sps:$4 sm:$0xff]   ;;  %v8124_v43 = vld [vmem:[%s10735_s14 + $0x38c] ss:$16 sps:$4 sm:$0xff]   ;;  %v8119_v13 = vld [vmem:[%s10735_s14 + $0x380] ss:$16 sps:$4 sm:$0xff]  }
 0x63c   :  { %v5139_v48 = vpack.c.bf16 %v5135_v47, %v5135_v47  ;;  %v5141_v53 = vpack.c.bf16 %v5137_v18, %v5137_v18  ;;  %v8122_v44 = vld [vmem:[%s10735_s14 + $0x388] ss:$16 sps:$4 sm:$0xff]   ;;  %v8127_v45 = vld [vmem:[%s10735_s14 + $0x3a4] ss:$16 sps:$4 sm:$0xff]   ;;  %v8130_v46 = vld [vmem:[%s10735_s14 + $0x3ac] ss:$16 sps:$4 sm:$0xff]   ;;  %v4321_v18 = vrot.slane %v10504_v35, %v8639_v49 }
 0x63d   :  { %v8125_v12 = vld [vmem:[%s10735_s14 + $0x3a0] ss:$16 sps:$4 sm:$0xff]   ;;  %v8128_v47 = vld [vmem:[%s10735_s14 + $0x3a8] ss:$16 sps:$4 sm:$0xff]  }
 0x63e   :  { %5964 = vmatprep.mubr.bf16.mxu0 %v5139_v48  ;;  %6046 = vmatprep.mubr.bf16.mxu1 %v5139_v48  ;;  %v8133_v48 = vld [vmem:[%s10735_s14 + $0x3c4] ss:$16 sps:$4 sm:$0xff]   ;;  %v8134_v35 = vld [vmem:[%s10735_s14 + $0x3c8] ss:$16 sps:$4 sm:$0xff]  }
 0x63f   :  { %5965 = vmatmul.mubr.bf16.vlgmr.msra.gmra.mrb[32].mxu0 %v5138_v51  ;;  %6047 = vmatmul.mubr.bf16.vlgmr.msra.gmra.mrb[32].mxu1 %v5138_v51  ;;  %v6940_v51 = vadd.f32 %v10512_v63, %v4321_v18  ;;  %v8140_v63 = vld [vmem:[%s10735_s14 + $0x3e8] ss:$16 sps:$4 sm:$0xff]  }
 0x640   :  { %5974 = vmatpush1.bf16.msra.mxu0 %v8047_v5  ;;  %6056 = vmatpush1.bf16.msra.mxu1 %v8050_v50  ;;  %v8136_v5 = vld [vmem:[%s10735_s14 + $0x3cc] ss:$16 sps:$4 sm:$0xff]   ;;  %v8131_v50 = vld [vmem:[%s10735_s14 + $0x3c0] ss:$16 sps:$4 sm:$0xff]  }
 0x641   :  { %6005 = vmatprep.mubr.bf16.mxu0 %v5141_v53  ;;  %6087 = vmatprep.mubr.bf16.mxu1 %v5141_v53  ;;  %v8137_v53 = vld [vmem:[%s10735_s14 + $0x3e0] ss:$16 sps:$4 sm:$0xff]  }
 0x642   :  { %5975 = vmatprep.subr.bf16.mxu0 %v8055_v23  ;;  %6057 = vmatprep.subr.bf16.mxu1 %v8058_v52  ;;  %v8139_v23 = vld [vmem:[%s10735_s14 + $0x3e4] ss:$16 sps:$4 sm:$0xff]   ;;  %v8142_v52 = vld [vmem:[%s10735_s14 + $0x3ec] ss:$16 sps:$4 sm:$0xff]  }
 0x644   :  { %5976 = vmatpush1.bf16.msra.mxu0 %v8053_v4  ;;  %6058 = vmatpush1.bf16.msra.mxu1 %v8056_v17  ;;  %v5136_v4 = vmax.f32 %v6940_v51, 0.0 }
 0x645   :  { %5977 = vmatprep.subr.bf16.mxu0 %v8061_v54  ;;  %6059 = vmatprep.subr.bf16.mxu1 %v8064_v20  ;;  %v23_v54 = vstv %s10738_s17  ;;  %v5270_v20 = vld [vmem:[%s10739_s15] sm:$0xf] }
 0x646   :  { %v5140_v17 = vpack.c.bf16 %v5136_v4, %v5136_v4  ;;  %24 = vst [vmem:[#allocation2] sm:$0x1] %v23_v54 }
 0x648   :  { %5978 = vmatpush1.bf16.msra.mxu0 %v8059_v55  ;;  %6060 = vmatpush1.bf16.msra.mxu1 %v8062_v56  ;;  %v5275_v55 = vrot.slane %v5270_v20, %v8467_v29  ;;  %v5283_v56 = vrot.slane %v5270_v20, %v8639_v49 }
 0x649   :  { %5979 = vmatprep.subr.bf16.mxu0 %v8067_v30  ;;  %6061 = vmatprep.subr.bf16.mxu1 %v8070_v57  ;;  %v5279_v30 = vrot.slane %v5270_v20, %v8475_v31  ;;  %v5287_v57 = vrot.slane %v5270_v20, %v8478_v32 }
 0x64c   :  { %5980 = vmatpush1.bf16.msra.mxu0 %v8065_v58  ;;  %6062 = vmatpush1.bf16.msra.mxu1 %v8068_v60 }
 0x64d   :  { %5981 = vmatprep.subr.bf16.mxu0 %v8073_v37  ;;  %6063 = vmatprep.subr.bf16.mxu1 %v8076_v61 }
 0x650   :  { %5982 = vmatpush1.bf16.msra.mxu0 %v8071_v62  ;;  %6064 = vmatpush1.bf16.msra.mxu1 %v8074_v0 }
 0x651   :  { %5983 = vmatprep.subr.bf16.mxu0 %v8079_v19  ;;  %6065 = vmatprep.subr.bf16.mxu1 %v8082_v1  ;;  %v6108_v19 = vld [vmem:[%s10740_s16] sm:$0xf] }
 0x654   :  { %5984 = vmatpush1.bf16.msra.mxu0 %v8077_v2  ;;  %6066 = vmatpush1.bf16.msra.mxu1 %v8080_v3 }
 0x655   :  { %5985 = vmatprep.subr.bf16.mxu0 %v8085_v21  ;;  %6067 = vmatprep.subr.bf16.mxu1 %v8088_v14 }
 0x658   :  { %5986 = vmatpush1.bf16.msra.mxu0 %v8083_v6  ;;  %6068 = vmatpush1.bf16.msra.mxu1 %v8086_v7 }
 0x659   :  { %5987 = vmatprep.subr.bf16.mxu0 %v8091_v8  ;;  %6069 = vmatprep.subr.bf16.mxu1 %v8094_v9 }
 0x65c   :  { %5988 = vmatpush1.bf16.msra.mxu0 %v8089_v15  ;;  %6070 = vmatpush1.bf16.msra.mxu1 %v8092_v16 }
 0x65d   :  { %5989 = vmatprep.subr.bf16.mxu0 %v8097_v22  ;;  %6071 = vmatprep.subr.bf16.mxu1 %v8100_v24  ;;  %v6113_v22 = vrot.slane %v6108_v19, %v8467_v29 }
 0x660   :  { %5990 = vmatpush1.bf16.msra.mxu0 %v8095_v25  ;;  %6072 = vmatpush1.bf16.msra.mxu1 %v8098_v26  ;;  %v6117_v26 = vrot.slane %v6108_v19, %v8475_v31 }
 0x661   :  { %5991 = vmatprep.subr.bf16.mxu0 %v8103_v27  ;;  %6073 = vmatprep.subr.bf16.mxu1 %v8106_v28 }
 0x664   :  { %5992 = vmatpush1.bf16.msra.mxu0 %v8101_v59  ;;  %6074 = vmatpush1.bf16.msra.mxu1 %v8104_v33 }
 0x665   :  { %5993 = vmatprep.subr.bf16.mxu0 %v8109_v34  ;;  %6075 = vmatprep.subr.bf16.mxu1 %v8112_v10  ;;  %v6121_v34 = vrot.slane %v6108_v19, %v8639_v49 }
 0x668   :  { %5994 = vmatpush1.bf16.msra.mxu0 %v8107_v36  ;;  %6076 = vmatpush1.bf16.msra.mxu1 %v8110_v38 }
 0x669   :  { %5995 = vmatprep.subr.bf16.mxu0 %v8115_v39  ;;  %6077 = vmatprep.subr.bf16.mxu1 %v8118_v40  ;;  %v6125_v39 = vrot.slane %v6108_v19, %v8478_v32 }
 0x66c   :  { %5996 = vmatpush1.bf16.msra.mxu0 %v8113_v41  ;;  %6078 = vmatpush1.bf16.msra.mxu1 %v8116_v11 }
 0x66d   :  { %5997 = vmatprep.subr.bf16.mxu0 %v8121_v42  ;;  %6079 = vmatprep.subr.bf16.mxu1 %v8124_v43  ;;  %v6925_v43 = vld [vmem:[#allocation2] ss:$0 sm:$0xff] }
 0x670   :  { %5998 = vmatpush1.bf16.msra.mxu0 %v8119_v13  ;;  %6080 = vmatpush1.bf16.msra.mxu1 %v8122_v44 }
 0x671   :  { %5999 = vmatprep.subr.bf16.mxu0 %v8127_v45  ;;  %6081 = vmatprep.subr.bf16.mxu1 %v8130_v46 }
 0x674   :  { %6000 = vmatpush1.bf16.msra.mxu0 %v8125_v12  ;;  %6082 = vmatpush1.bf16.msra.mxu1 %v8128_v47 }
 0x675   :  { %6001 = vmatprep.subr.bf16.mxu0 %v8133_v48  ;;  %6083 = vmatprep.subr.bf16.mxu1 %v8136_v5 }
 0x678   :  { %6002 = vmatpush1.bf16.msra.mxu0 %v8131_v50  ;;  %6084 = vmatpush1.bf16.msra.mxu1 %v8134_v35 }
 0x679   :  { %6003 = vmatprep.subr.bf16.mxu0 %v8139_v23  ;;  %6085 = vmatprep.subr.bf16.mxu1 %v8142_v52 }
 0x67c   :  { %6004 = vmatpush1.bf16.msra.mxu0 %v8137_v53  ;;  %6086 = vmatpush1.bf16.msra.mxu1 %v8140_v63 }
 0x67f   :  { %6006 = vmatmul.mubr.bf16.vlgmr.msra.gmra.mrb[32].mxu0 %v5140_v17  ;;  %6088 = vmatmul.mubr.bf16.vlgmr.msra.gmra.mrb[32].mxu1 %v5140_v17 }
 0x752   :  { %v6007_v58 = vpop.f32.mrb[32].mxu0  ;;  %v6089_v60 = vpop.f32.mrb[32].mxu1 }
 0x753   :  { %v6942_v37 = vadd.f32 %v6007_v58, %v5275_v55  ;;  %v6944_v61 = vadd.f32 %v6089_v60, %v5283_v56  ;;  %v6009_v62 = vpop.f32.mrb[33].mxu0  ;;  %v6091_v0 = vpop.f32.mrb[33].mxu1 }
 0x754   :  { %v6943_v1 = vadd.f32 %v6009_v62, %v5279_v30  ;;  %v6945_v2 = vadd.f32 %v6091_v0, %v5287_v57  ;;  %v6011_v3 = vpop.f32.mrb[34].mxu0  ;;  %v6093_v21 = vpop.f32.mrb[34].mxu1 }
 0x755   :  { %v6096_v14 = vmax.f32 %v6942_v37, 0.0  ;;  %v6098_v6 = vmax.f32 %v6944_v61, 0.0  ;;  %v6012_v7 = vpop.f32.mrb[35].mxu0  ;;  %v6094_v8 = vpop.f32.mrb[35].mxu1 }
 0x756   :  { %v6097_v9 = vmax.f32 %v6943_v1, 0.0  ;;  %v6099_v15 = vmax.f32 %v6945_v2, 0.0 }
 0x757   :  { %v6100_v16 = vpack.c.bf16 %v6096_v14, %v6096_v14  ;;  %v6102_v24 = vpack.c.bf16 %v6098_v6, %v6098_v6 }
 0x758   :  { %v6101_v25 = vpack.c.bf16 %v6097_v9, %v6097_v9  ;;  %v6103_v27 = vpack.c.bf16 %v6099_v15, %v6099_v15 }
 0x759   :  { %v6104_v28 = vunpack.c.l.bf16 %v6100_v16  ;;  %v6106_v59 = vunpack.c.l.bf16 %v6102_v24 }
 0x75a   :  { %v6105_v33 = vunpack.c.l.bf16 %v6101_v25  ;;  %v6107_v38 = vunpack.c.l.bf16 %v6103_v27 }
 0x75b   :  { %v6130_v10 = vmul.f32 %v6113_v22, %v6104_v28  ;;  %v6132_v40 = vmul.f32 %v6121_v34, %v6106_v59 }
 0x75c   :  { %v6131_v36 = vmul.f32 %v6117_v26, %v6105_v33  ;;  %v6133_v11 = vmul.f32 %v6125_v39, %v6107_v38 }
 0x75e   :  { %v6134_v41 = vadd.f32 %v6131_v36, %v6130_v10 }
 0x760   :  { %v6135_v42 = vadd.f32 %v6134_v41, %v6132_v40 }
 0x762   :  { %v6136_v29 = vadd.f32 %v6135_v42, %v6133_v11 }
 0x764   :  { %6137 = vadd.xlane.f32.xlu0 %v6136_v29 }
 0x7f1   :  { %v6138_v13 = vpop.xlane.xlu0 %6137 }
 0x7f2   :  { %v6146_v31 = vadd.f32 %v6925_v43, %v6138_v13 }
 0x7f4   :  { %6148 = vst.msk [vmem:[%s10741_s18] sm:$0xff] %vm6147_vm3, %v6146_v31 }

</bundles_post_ra>
